<compile_context>
chip_gen: v7x
topology: tpu7x:2x2x1
jax: 0.10.0
libtpu: 0.0.40
codegen_flags: <defaults>
</compile_context>

<pallas_src>
import jax
import jax.numpy as jnp
from jax.experimental import pallas as pl
from jax.experimental.pallas import tpu as pltpu

# ---------------- config (small shapes consistent with the module) ----------------
NUM_FRAME = 8                      # num_frame
NUM_JOINTS = 4                     # num_joints
EMBED_RATIO = 32                   # embed_dim_ratio
EMBED_DIM = EMBED_RATIO * NUM_JOINTS        # 128
DEPTH = 4                          # depth (module default)
NUM_HEADS = 8
HEAD_DIM = EMBED_DIM // NUM_HEADS           # 16
SCALE = HEAD_DIM ** -0.5
MLP_RATIO = 2.0
MLP_HIDDEN = int(EMBED_DIM * MLP_RATIO)     # 256
EPS = 1e-6                         # norm_layer = partial(nn.LayerNorm, eps=1e-6)
BATCH = 2


# ---------------- in-kernel math helpers ----------------
def _layer_norm(x, w, b, eps=EPS):
    # Single-pass: sum(x) and sum(x*x) are independent cross-lane reductions.
    mu = jnp.mean(x, axis=-1, keepdims=True)
    mu2 = jnp.mean(x * x, axis=-1, keepdims=True)
    var = jnp.maximum(mu2 - mu * mu, 0.0)
    return (x - mu) * jax.lax.rsqrt(var + eps) * w + b


def _gelu_tanh(x):
    # tanh-approx GELU: tanh goes to the EUP slot.
    c = 0.7978845608028654  # sqrt(2/pi)
    return 0.5 * x * (1.0 + jnp.tanh(c * (x + 0.044715 * x * x * x)))


def _softmax_lastdim(x):
    x = x - jnp.max(x, axis=-1, keepdims=True)
    e = jnp.exp(x)
    return e * pl.reciprocal(jnp.sum(e, axis=-1, keepdims=True), approx=True)


# ---------------- the fused kernel (one grid step == one transformer block) ----------------
def temporal_features_kernel(x_ref, pos_ref,
                             n1w_ref, n1b_ref, qkvw_ref, qkvb_ref,
                             projw_ref, projb_ref, n2w_ref, n2b_ref,
                             fc1w_ref, fc1b_ref, fc2w_ref, fc2b_ref,
                             tnw_ref, tnb_ref, out_ref, res_ref):
    d = pl.program_id(0)
    B, F, D = x_ref.shape
    M = B * F
    H, Dh = NUM_HEADS, HEAD_DIM

    # ---- init the residual stream at the first layer ----
    @pl.when(d == 0)
    def _():
        # x += temporal_pos_embed ; pos_drop(p=0.0) is identity.
        res_ref[...] = (x_ref[...] + pos_ref[...]).reshape(M, D)

    x = res_ref[...]                                            # (M, D) f32

    # ---- attention branch: x = x + proj(softmax(q k^T) v) ----
    h = _layer_norm(x, n1w_ref[0, 0], n1b_ref[0, 0])
    qkv = jnp.dot(h.astype(qkvw_ref.dtype), qkvw_ref[0],
                  preferred_element_type=jnp.float32) + qkvb_ref[0, 0]   # (M, 3D)
    # SCALE is already folded into the q columns of qkvw/qkvb (host side).
    qkv = qkv.astype(qkvw_ref.dtype)           # bf16 for the relayout + attn matmuls
    t = qkv.reshape(B, F, 3 * H, Dh)
    t = jnp.transpose(t, (0, 2, 1, 3))         # (B, 3H, F, Dh): ONE head-split relayout
    q = t[:, 0 * H:1 * H].reshape(B * H, F, Dh)
    k = t[:, 1 * H:2 * H].reshape(B * H, F, Dh)
    v = t[:, 2 * H:3 * H].reshape(B * H, F, Dh)

    att = jax.lax.dot_general(q, k, (((2,), (2,)), ((0,), (0,))),
                              preferred_element_type=jnp.float32)        # (B*H, F, F)
    att = _softmax_lastdim(att)                                          # attn_drop(0)=id
    o = jax.lax.dot_general(att.astype(v.dtype), v,
                            (((2,), (1,)), ((0,), (0,))),
                            preferred_element_type=jnp.float32)          # (B*H, F, Dh)
    o = o.astype(projw_ref.dtype)
    o = jnp.transpose(o.reshape(B, H, F, Dh), (0, 2, 1, 3)).reshape(M, D)  # merge heads
    ao = jnp.dot(o, projw_ref[0], preferred_element_type=jnp.float32) + projb_ref[0, 0]
    x = x + ao                                                           # drop_path = id

    # ---- MLP branch: x = x + mlp(norm2(x)) ----
    h = _layer_norm(x, n2w_ref[0, 0], n2b_ref[0, 0])
    h = jnp.dot(h.astype(fc1w_ref.dtype), fc1w_ref[0],
                preferred_element_type=jnp.float32) + fc1b_ref[0, 0]
    h = _gelu_tanh(h)
    h = jnp.dot(h.astype(fc2w_ref.dtype), fc2w_ref[0],
                preferred_element_type=jnp.float32) + fc2b_ref[0, 0]
    x = x + h

    res_ref[...] = x

    # ---- finalize: temporal_norm + write the (only) output block ----
    @pl.when(d == pl.num_programs(0) - 1)
    def _():
        y = _layer_norm(x, tnw_ref[0, 0], tnb_ref[0, 0])
        out_ref[...] = y.reshape(B, F, D)      # x.view(b, num_frames, -1) is a no-op


def _per_layer3(d):
    return (d, 0, 0)


def _const3(d):
    return (0, 0, 0)


def temporal_features(x, params, *, use_bf16_weights=True):
    B, F, D = x.shape
    (pos, n1w, n1b, qkvw, qkvb, projw, projb,
     n2w, n2b, fc1w, fc1b, fc2w, fc2b, tnw, tnb) = params
    depth = qkvw.shape[0]

    # Fold the attention SCALE into the q third of the qkv weight/bias (f32, host side).
    qkvw = qkvw.at[:, :, :D].multiply(SCALE)
    qkvb = qkvb.at[:, :D].multiply(SCALE)

    wdt = jnp.bfloat16 if use_bf16_weights else jnp.float32
    qkvw_c = qkvw.astype(wdt)
    projw_c = projw.astype(wdt)
    fc1w_c = fc1w.astype(wdt)
    fc2w_c = fc2w.astype(wdt)
    # TODO(synk): on v7x/v6e the weights could go to fp8/int8 with per-channel scales
    # to halve HBM traffic again; kept bf16 here for accuracy/simplicity.

    # Reshape small per-layer params to (depth, 1, N) so per-layer (1, 1, N) blocks
    # satisfy TPU tiling (middle dim equals the full array dim; last dim lane-aligned).
    n1w_r, n1b_r = n1w.reshape(depth, 1, D), n1b.reshape(depth, 1, D)
    qkvb_r = qkvb.reshape(depth, 1, 3 * D)
    projb_r = projb.reshape(depth, 1, D)
    n2w_r, n2b_r = n2w.reshape(depth, 1, D), n2b.reshape(depth, 1, D)
    fc1b_r = fc1b.reshape(depth, 1, MLP_HIDDEN)
    fc2b_r = fc2b.reshape(depth, 1, D)
    tnw_r, tnb_r = tnw.reshape(1, 1, D), tnb.reshape(1, 1, D)

    in_specs = [
        pl.BlockSpec((B, F, D), _const3),                 # x (resident, fetched once)
        pl.BlockSpec((1, F, D), _const3),                 # temporal_pos_embed
        pl.BlockSpec((1, 1, D), _per_layer3),             # norm1 w
        pl.BlockSpec((1, 1, D), _per_layer3),             # norm1 b
        pl.BlockSpec((1, D, 3 * D), _per_layer3),         # qkv W   (pipelined over depth)
        pl.BlockSpec((1, 1, 3 * D), _per_layer3),         # qkv b
        pl.BlockSpec((1, D, D), _per_layer3),             # proj W  (pipelined over depth)
        pl.BlockSpec((1, 1, D), _per_layer3),             # proj b
        pl.BlockSpec((1, 1, D), _per_layer3),             # norm2 w
        pl.BlockSpec((1, 1, D), _per_layer3),             # norm2 b
        pl.BlockSpec((1, D, MLP_HIDDEN), _per_layer3),    # fc1 W   (pipelined over depth)
        pl.BlockSpec((1, 1, MLP_HIDDEN), _per_layer3),    # fc1 b
        pl.BlockSpec((1, MLP_HIDDEN, D), _per_layer3),    # fc2 W   (pipelined over depth)
        pl.BlockSpec((1, 1, D), _per_layer3),             # fc2 b
        pl.BlockSpec((1, 1, D), _const3),                 # temporal_norm w
        pl.BlockSpec((1, 1, D), _const3),                 # temporal_norm b
    ]

    grid_spec = pltpu.PrefetchScalarGridSpec(
        num_scalar_prefetch=0,
        grid=(depth,),                                    # depth is sequential (residual carry)
        in_specs=in_specs,
        out_specs=pl.BlockSpec((B, F, D), _const3),       # resident output, written at last step
        scratch_shapes=[pltpu.VMEM((B * F, D), jnp.float32)],   # residual-stream accumulator
    )

    return pl.pallas_call(
        temporal_features_kernel,
        out_shape=jax.ShapeDtypeStruct((B, F, D), jnp.float32),
        grid_spec=grid_spec,
        compiler_params=pltpu.CompilerParams(dimension_semantics=("arbitrary",)),
    )(x, pos, n1w_r, n1b_r, qkvw_c, qkvb_r, projw_c, projb_r,
      n2w_r, n2b_r, fc1w_c, fc1b_r, fc2w_c, fc2b_r, tnw_r, tnb_r)


# ---------------- pure-JAX reference (f32, exact-erf GELU, exact divide) ----------------
def temporal_features_ref(x, params):
    (pos, n1w, n1b, qkvw, qkvb, projw, projb,
     n2w, n2b, fc1w, fc1b, fc2w, fc2b, tnw, tnb) = params
    B, F, D = x.shape
    depth = qkvw.shape[0]

    def ln(t, w, b):
        mu = jnp.mean(t, -1, keepdims=True)
        var = jnp.mean((t - mu) ** 2, -1, keepdims=True)
        return (t - mu) / jnp.sqrt(var + EPS) * w + b

    x = x + pos
    for d in range(depth):
        h = ln(x, n1w[d], n1b[d])
        qkv = h @ qkvw[d] + qkvb[d]
        qkv = qkv.reshape(B, F, 3, NUM_HEADS, HEAD_DIM).transpose(2, 0, 3, 1, 4)
        q, k, v = qkv[0], qkv[1], qkv[2]                     # (B,H,F,Dh)
        att = jnp.einsum('bhqd,bhkd->bhqk', q, k) * SCALE
        att = jax.nn.softmax(att, axis=-1)
        o = jnp.einsum('bhqk,bhkd->bhqd', att, v)
        o = o.transpose(0, 2, 1, 3).reshape(B, F, D)
        x = x + (o @ projw[d] + projb[d])
        h = ln(x, n2w[d], n2b[d])
        h = jax.nn.gelu(h @ fc1w[d] + fc1b[d], approximate=False)
        x = x + (h @ fc2w[d] + fc2b[d])
    return ln(x, tnw[0], tnb[0])


# ---------------- deterministic parameter init ----------------
def init_params(key):
    D, H1, DP, F = EMBED_DIM, MLP_HIDDEN, DEPTH, NUM_FRAME
    keys = jax.random.split(key, 8)

    def normal(k, shape, std=0.02):
        return (std * jax.random.normal(k, shape)).astype(jnp.float32)

    # NOTE: PyTorch inits temporal_pos_embed to zeros; use small randoms so the add is exercised.
    pos = normal(keys[0], (1, F, D))
    n1w = jnp.ones((DP, D), jnp.float32)
    n1b = jnp.zeros((DP, D), jnp.float32)
    qkvw = normal(keys[1], (DP, D, 3 * D))
    qkvb = normal(keys[2], (DP, 3 * D))
    projw = normal(keys[3], (DP, D, D))
    projb = normal(keys[4], (DP, D))
    n2w = jnp.ones((DP, D), jnp.float32)
    n2b = jnp.zeros((DP, D), jnp.float32)
    fc1w = normal(keys[5], (DP, D, H1))
    fc1b = normal(keys[6], (DP, H1))
    fc2w = normal(keys[7], (DP, H1, D))
    fc2b = jnp.zeros((DP, D), jnp.float32)
    tnw = jnp.ones((1, D), jnp.float32)
    tnb = jnp.zeros((1, D), jnp.float32)
    # TODO(synk): self.weighted_mean (Conv1d) is constructed in __init__ but never used in
    # forward(), so no parameters are created for it here.
    return (pos, n1w, n1b, qkvw, qkvb, projw, projb,
            n2w, n2b, fc1w, fc1b, fc2w, fc2b, tnw, tnb)


if __name__ == "__main__":
    key = jax.random.PRNGKey(0)
    kx, kp = jax.random.split(key)
    x = jax.random.normal(kx, (BATCH, NUM_FRAME, EMBED_DIM), dtype=jnp.float32)
    params = init_params(kp)

    out = temporal_features(x, params)
    jax.block_until_ready(out)
    assert out.shape == (BATCH, NUM_FRAME, EMBED_DIM), out.shape
    assert bool(jnp.all(jnp.isfinite(out)))

    # Loose parity check vs the f32 reference (bf16 weights + tanh GELU + approx
    # reciprocal + single-pass LN introduce small, bounded deviations).
    ref = temporal_features_ref(x, params)
    err = float(jnp.max(jnp.abs(out - ref)))
    assert err < 0.1, f"max abs err vs reference: {err}"
    print("KERNEL_OK")
</pallas_src>

<mosaic_0001>
module attributes {stable_mosaic.version = 11 : i64} {
  func.func @temporal_features_kernel(%arg0: i32, %arg1: memref<2x8x128xf32, #tpu.memory_space<vmem>>, %arg2: memref<1x8x128xf32, #tpu.memory_space<vmem>>, %arg3: memref<1x1x128xf32, #tpu.memory_space<vmem>>, %arg4: memref<1x1x128xf32, #tpu.memory_space<vmem>>, %arg5: memref<1x128x384xbf16, #tpu.memory_space<vmem>>, %arg6: memref<1x1x384xf32, #tpu.memory_space<vmem>>, %arg7: memref<1x128x128xbf16, #tpu.memory_space<vmem>>, %arg8: memref<1x1x128xf32, #tpu.memory_space<vmem>>, %arg9: memref<1x1x128xf32, #tpu.memory_space<vmem>>, %arg10: memref<1x1x128xf32, #tpu.memory_space<vmem>>, %arg11: memref<1x128x256xbf16, #tpu.memory_space<vmem>>, %arg12: memref<1x1x256xf32, #tpu.memory_space<vmem>>, %arg13: memref<1x256x128xbf16, #tpu.memory_space<vmem>>, %arg14: memref<1x1x128xf32, #tpu.memory_space<vmem>>, %arg15: memref<1x1x128xf32, #tpu.memory_space<vmem>>, %arg16: memref<1x1x128xf32, #tpu.memory_space<vmem>>, %arg17: memref<2x8x128xf32, #tpu.memory_space<vmem>>, %arg18: memref<16x128xf32, #tpu.memory_space<vmem>>) attributes {dimension_semantics = [#tpu.dimension_semantics<arbitrary>], iteration_bounds = array<i64: 4>, scalar_prefetch = 0 : i64, scratch_operands = 1 : i64, tpu.core_type = #tpu.core_type<tc>, window_params = [{pipeline_mode = #tpu.pipeline_mode<synchronous>, transform_indices = @transform_0, window_bounds = array<i64: 2, 8, 128>}, {pipeline_mode = #tpu.pipeline_mode<synchronous>, transform_indices = @transform_1, window_bounds = array<i64: 1, 8, 128>}, {transform_indices = @transform_2, window_bounds = array<i64: 1, 1, 128>}, {transform_indices = @transform_3, window_bounds = array<i64: 1, 1, 128>}, {transform_indices = @transform_4, window_bounds = array<i64: 1, 128, 384>}, {transform_indices = @transform_5, window_bounds = array<i64: 1, 1, 384>}, {transform_indices = @transform_6, window_bounds = array<i64: 1, 128, 128>}, {transform_indices = @transform_7, window_bounds = array<i64: 1, 1, 128>}, {transform_indices = @transform_8, window_bounds = array<i64: 1, 1, 128>}, {transform_indices = @transform_9, window_bounds = array<i64: 1, 1, 128>}, {transform_indices = @transform_10, window_bounds = array<i64: 1, 128, 256>}, {transform_indices = @transform_11, window_bounds = array<i64: 1, 1, 256>}, {transform_indices = @transform_12, window_bounds = array<i64: 1, 256, 128>}, {transform_indices = @transform_13, window_bounds = array<i64: 1, 1, 128>}, {pipeline_mode = #tpu.pipeline_mode<synchronous>, transform_indices = @transform_14, window_bounds = array<i64: 1, 1, 128>}, {pipeline_mode = #tpu.pipeline_mode<synchronous>, transform_indices = @transform_15, window_bounds = array<i64: 1, 1, 128>}, {pipeline_mode = #tpu.pipeline_mode<synchronous>, transform_indices = @transform_16, window_bounds = array<i64: 2, 8, 128>}]} {
    %c0_i32 = arith.constant 0 : i32
    %0 = arith.cmpi eq, %arg0, %c0_i32 : i32
    %1 = arith.extui %0 : i1 to i32
    %c0_i32_0 = arith.constant 0 : i32
    %2 = arith.cmpi ne, %1, %c0_i32_0 : i32
    scf.if %2 {
      %c0_64 = arith.constant 0 : index
      %c0_65 = arith.constant 0 : index
      %c0_66 = arith.constant 0 : index
      %144 = vector.load %arg1[%c0_64, %c0_65, %c0_66] : memref<2x8x128xf32, #tpu.memory_space<vmem>>, vector<2x8x128xf32>
      %c0_67 = arith.constant 0 : index
      %c0_68 = arith.constant 0 : index
      %c0_69 = arith.constant 0 : index
      %145 = vector.load %arg2[%c0_67, %c0_68, %c0_69] : memref<1x8x128xf32, #tpu.memory_space<vmem>>, vector<1x8x128xf32>
      %146 = vector.broadcast %145 : vector<1x8x128xf32> to vector<2x8x128xf32>
      %147 = arith.addf %144, %146 : vector<2x8x128xf32>
      %148 = vector.shape_cast %147 : vector<2x8x128xf32> to vector<16x128xf32>
      %c0_70 = arith.constant 0 : index
      %c0_71 = arith.constant 0 : index
      %149 = vector.load %arg18[%c0_70, %c0_71] : memref<16x128xf32, #tpu.memory_space<vmem>>, vector<16x128xf32>
      tpu.vector_store %arg18[%c0_70, %c0_71], %148 {strides = array<i32>} : memref<16x128xf32, #tpu.memory_space<vmem>>, vector<16x128xf32>,
    } else {
    }
    %c0 = arith.constant 0 : index
    %c0_1 = arith.constant 0 : index
    %3 = vector.load %arg18[%c0, %c0_1] : memref<16x128xf32, #tpu.memory_space<vmem>>, vector<16x128xf32>
    %c0_2 = arith.constant 0 : index
    %c0_3 = arith.constant 0 : index
    %c0_4 = arith.constant 0 : index
    %4 = vector.load %arg3[%c0_2, %c0_3, %c0_4] : memref<1x1x128xf32, #tpu.memory_space<vmem>>, vector<1x1x128xf32>
    %5 = vector.shape_cast %4 : vector<1x1x128xf32> to vector<128xf32>
    %c0_5 = arith.constant 0 : index
    %c0_6 = arith.constant 0 : index
    %c0_7 = arith.constant 0 : index
    %6 = vector.load %arg4[%c0_5, %c0_6, %c0_7] : memref<1x1x128xf32, #tpu.memory_space<vmem>>, vector<1x1x128xf32>
    %7 = vector.shape_cast %6 : vector<1x1x128xf32> to vector<128xf32>
    %cst = arith.constant dense<0.000000e+00> : vector<16xf32>
    %8 = vector.multi_reduction <add>, %3, %cst [1] : vector<16x128xf32> to vector<16xf32>
    %9 = vector.shape_cast %8 : vector<16xf32> to vector<16x1xf32>
    %cst_8 = arith.constant 1.280000e+02 : f32
    %10 = vector.broadcast %cst_8 : f32 to vector<16x1xf32>
    %11 = arith.divf %9, %10 : vector<16x1xf32>
    %12 = arith.mulf %3, %3 : vector<16x128xf32>
    %cst_9 = arith.constant dense<0.000000e+00> : vector<16xf32>
    %13 = vector.multi_reduction <add>, %12, %cst_9 [1] : vector<16x128xf32> to vector<16xf32>
    %14 = vector.shape_cast %13 : vector<16xf32> to vector<16x1xf32>
    %cst_10 = arith.constant 1.280000e+02 : f32
    %15 = vector.broadcast %cst_10 : f32 to vector<16x1xf32>
    %16 = arith.divf %14, %15 : vector<16x1xf32>
    %17 = arith.mulf %11, %11 : vector<16x1xf32>
    %18 = arith.subf %16, %17 : vector<16x1xf32>
    %cst_11 = arith.constant 0.000000e+00 : f32
    %19 = vector.broadcast %cst_11 : f32 to vector<16x1xf32>
    %20 = arith.maximumf %18, %19 : vector<16x1xf32>
    %21 = vector.broadcast %11 : vector<16x1xf32> to vector<16x128xf32>
    %22 = arith.subf %3, %21 : vector<16x128xf32>
    %cst_12 = arith.constant 9.99999997E-7 : f32
    %23 = vector.broadcast %cst_12 : f32 to vector<16x1xf32>
    %24 = arith.addf %20, %23 : vector<16x1xf32>
    %25 = math.rsqrt %24 : vector<16x1xf32>
    %26 = vector.broadcast %25 : vector<16x1xf32> to vector<16x128xf32>
    %27 = arith.mulf %22, %26 : vector<16x128xf32>
    %28 = vector.shape_cast %5 : vector<128xf32> to vector<1x128xf32>
    %29 = vector.broadcast %28 : vector<1x128xf32> to vector<16x128xf32>
    %30 = arith.mulf %27, %29 : vector<16x128xf32>
    %31 = vector.shape_cast %7 : vector<128xf32> to vector<1x128xf32>
    %32 = vector.broadcast %31 : vector<1x128xf32> to vector<16x128xf32>
    %33 = arith.addf %30, %32 : vector<16x128xf32>
    %34 = arith.truncf %33 : vector<16x128xf32> to vector<16x128xbf16>
    %c0_13 = arith.constant 0 : index
    %c0_14 = arith.constant 0 : index
    %c0_15 = arith.constant 0 : index
    %35 = vector.load %arg5[%c0_13, %c0_14, %c0_15] : memref<1x128x384xbf16, #tpu.memory_space<vmem>>, vector<1x128x384xbf16>
    %36 = vector.shape_cast %35 : vector<1x128x384xbf16> to vector<128x384xbf16>
    %cst_16 = arith.constant dense<0.000000e+00> : vector<16x384xf32>
    %37 = tpu.matmul %34, %36, %cst_16 {dimension_numbers = #tpu.dot_dimension_numbers<[1], [0], [0], [1], [0, 0, 1, 1], [], []>} : vector<16x128xbf16>, vector<128x384xbf16>, vector<16x384xf32> -> vector<16x384xf32>
    %c0_17 = arith.constant 0 : index
    %c0_18 = arith.constant 0 : index
    %c0_19 = arith.constant 0 : index
    %38 = vector.load %arg6[%c0_17, %c0_18, %c0_19] : memref<1x1x384xf32, #tpu.memory_space<vmem>>, vector<1x1x384xf32>
    %39 = vector.shape_cast %38 : vector<1x1x384xf32> to vector<384xf32>
    %40 = vector.shape_cast %39 : vector<384xf32> to vector<1x384xf32>
    %41 = vector.broadcast %40 : vector<1x384xf32> to vector<16x384xf32>
    %42 = arith.addf %37, %41 : vector<16x384xf32>
    %43 = arith.truncf %42 : vector<16x384xf32> to vector<16x384xbf16>
    %44 = vector.shape_cast %43 : vector<16x384xbf16> to vector<2x8x24x16xbf16>
    %45 = tpu.transpose %44, [0, 2, 1, 3] : vector<2x8x24x16xbf16> -> vector<2x24x8x16xbf16>
    %46 = vector.extract_strided_slice %45 {offsets = [0, 0, 0, 0], sizes = [2, 8, 8, 16], strides = [1, 1, 1, 1]} : vector<2x24x8x16xbf16> to vector<2x8x8x16xbf16>
    %47 = vector.shape_cast %46 : vector<2x8x8x16xbf16> to vector<16x8x16xbf16>
    %48 = vector.extract_strided_slice %45 {offsets = [0, 8, 0, 0], sizes = [2, 8, 8, 16], strides = [1, 1, 1, 1]} : vector<2x24x8x16xbf16> to vector<2x8x8x16xbf16>
    %49 = vector.shape_cast %48 : vector<2x8x8x16xbf16> to vector<16x8x16xbf16>
    %50 = vector.extract_strided_slice %45 {offsets = [0, 16, 0, 0], sizes = [2, 8, 8, 16], strides = [1, 1, 1, 1]} : vector<2x24x8x16xbf16> to vector<2x8x8x16xbf16>
    %51 = vector.shape_cast %50 : vector<2x8x8x16xbf16> to vector<16x8x16xbf16>
    %cst_20 = arith.constant dense<0.000000e+00> : vector<16x8x8xf32>
    %52 = tpu.matmul %47, %49, %cst_20 {dimension_numbers = #tpu.dot_dimension_numbers<[2], [2], [1], [1], [0, 0, 0, 1, 1, 1], [0], [0]>} : vector<16x8x16xbf16>, vector<16x8x16xbf16>, vector<16x8x8xf32> -> vector<16x8x8xf32>
    %cst_21 = arith.constant dense<0xFF800000> : vector<16x8xf32>
    %53 = vector.multi_reduction <maximumf>, %52, %cst_21 [2] : vector<16x8x8xf32> to vector<16x8xf32>
    %54 = vector.shape_cast %53 : vector<16x8xf32> to vector<16x8x1xf32>
    %55 = vector.broadcast %54 : vector<16x8x1xf32> to vector<16x8x8xf32>
    %56 = arith.subf %52, %55 : vector<16x8x8xf32>
    %57 = math.exp %56 : vector<16x8x8xf32>
    %cst_22 = arith.constant dense<0.000000e+00> : vector<16x8xf32>
    %58 = vector.multi_reduction <add>, %57, %cst_22 [2] : vector<16x8x8xf32> to vector<16x8xf32>
    %59 = vector.shape_cast %58 : vector<16x8xf32> to vector<16x8x1xf32>
    %60 = tpu.reciprocal %59 {approx = true} : vector<16x8x1xf32> -> vector<16x8x1xf32>
    %61 = vector.broadcast %60 : vector<16x8x1xf32> to vector<16x8x8xf32>
    %62 = arith.mulf %57, %61 : vector<16x8x8xf32>
    %63 = arith.truncf %62 : vector<16x8x8xf32> to vector<16x8x8xbf16>
    %cst_23 = arith.constant dense<0.000000e+00> : vector<16x8x16xf32>
    %64 = tpu.matmul %63, %51, %cst_23 {dimension_numbers = #tpu.dot_dimension_numbers<[2], [1], [1], [2], [0, 0, 0, 1, 1, 2], [0], [0]>} : vector<16x8x8xbf16>, vector<16x8x16xbf16>, vector<16x8x16xf32> -> vector<16x8x16xf32>
    %65 = arith.truncf %64 : vector<16x8x16xf32> to vector<16x8x16xbf16>
    %66 = vector.shape_cast %65 : vector<16x8x16xbf16> to vector<2x8x8x16xbf16>
    %67 = tpu.transpose %66, [0, 2, 1, 3] : vector<2x8x8x16xbf16> -> vector<2x8x8x16xbf16>
    %68 = vector.shape_cast %67 : vector<2x8x8x16xbf16> to vector<16x128xbf16>
    %c0_24 = arith.constant 0 : index
    %c0_25 = arith.constant 0 : index
    %c0_26 = arith.constant 0 : index
    %69 = vector.load %arg7[%c0_24, %c0_25, %c0_26] : memref<1x128x128xbf16, #tpu.memory_space<vmem>>, vector<1x128x128xbf16>
    %70 = vector.shape_cast %69 : vector<1x128x128xbf16> to vector<128x128xbf16>
    %cst_27 = arith.constant dense<0.000000e+00> : vector<16x128xf32>
    %71 = tpu.matmul %68, %70, %cst_27 {dimension_numbers = #tpu.dot_dimension_numbers<[1], [0], [0], [1], [0, 0, 1, 1], [], []>} : vector<16x128xbf16>, vector<128x128xbf16>, vector<16x128xf32> -> vector<16x128xf32>
    %c0_28 = arith.constant 0 : index
    %c0_29 = arith.constant 0 : index
    %c0_30 = arith.constant 0 : index
    %72 = vector.load %arg8[%c0_28, %c0_29, %c0_30] : memref<1x1x128xf32, #tpu.memory_space<vmem>>, vector<1x1x128xf32>
    %73 = vector.shape_cast %72 : vector<1x1x128xf32> to vector<128xf32>
    %74 = vector.shape_cast %73 : vector<128xf32> to vector<1x128xf32>
    %75 = vector.broadcast %74 : vector<1x128xf32> to vector<16x128xf32>
    %76 = arith.addf %71, %75 : vector<16x128xf32>
    %77 = arith.addf %3, %76 : vector<16x128xf32>
    %c0_31 = arith.constant 0 : index
    %c0_32 = arith.constant 0 : index
    %c0_33 = arith.constant 0 : index
    %78 = vector.load %arg9[%c0_31, %c0_32, %c0_33] : memref<1x1x128xf32, #tpu.memory_space<vmem>>, vector<1x1x128xf32>
    %79 = vector.shape_cast %78 : vector<1x1x128xf32> to vector<128xf32>
    %c0_34 = arith.constant 0 : index
    %c0_35 = arith.constant 0 : index
    %c0_36 = arith.constant 0 : index
    %80 = vector.load %arg10[%c0_34, %c0_35, %c0_36] : memref<1x1x128xf32, #tpu.memory_space<vmem>>, vector<1x1x128xf32>
    %81 = vector.shape_cast %80 : vector<1x1x128xf32> to vector<128xf32>
    %cst_37 = arith.constant dense<0.000000e+00> : vector<16xf32>
    %82 = vector.multi_reduction <add>, %77, %cst_37 [1] : vector<16x128xf32> to vector<16xf32>
    %83 = vector.shape_cast %82 : vector<16xf32> to vector<16x1xf32>
    %cst_38 = arith.constant 1.280000e+02 : f32
    %84 = vector.broadcast %cst_38 : f32 to vector<16x1xf32>
    %85 = arith.divf %83, %84 : vector<16x1xf32>
    %86 = arith.mulf %77, %77 : vector<16x128xf32>
    %cst_39 = arith.constant dense<0.000000e+00> : vector<16xf32>
    %87 = vector.multi_reduction <add>, %86, %cst_39 [1] : vector<16x128xf32> to vector<16xf32>
    %88 = vector.shape_cast %87 : vector<16xf32> to vector<16x1xf32>
    %cst_40 = arith.constant 1.280000e+02 : f32
    %89 = vector.broadcast %cst_40 : f32 to vector<16x1xf32>
    %90 = arith.divf %88, %89 : vector<16x1xf32>
    %91 = arith.mulf %85, %85 : vector<16x1xf32>
    %92 = arith.subf %90, %91 : vector<16x1xf32>
    %cst_41 = arith.constant 0.000000e+00 : f32
    %93 = vector.broadcast %cst_41 : f32 to vector<16x1xf32>
    %94 = arith.maximumf %92, %93 : vector<16x1xf32>
    %95 = vector.broadcast %85 : vector<16x1xf32> to vector<16x128xf32>
    %96 = arith.subf %77, %95 : vector<16x128xf32>
    %cst_42 = arith.constant 9.99999997E-7 : f32
    %97 = vector.broadcast %cst_42 : f32 to vector<16x1xf32>
    %98 = arith.addf %94, %97 : vector<16x1xf32>
    %99 = math.rsqrt %98 : vector<16x1xf32>
    %100 = vector.broadcast %99 : vector<16x1xf32> to vector<16x128xf32>
    %101 = arith.mulf %96, %100 : vector<16x128xf32>
    %102 = vector.shape_cast %79 : vector<128xf32> to vector<1x128xf32>
    %103 = vector.broadcast %102 : vector<1x128xf32> to vector<16x128xf32>
    %104 = arith.mulf %101, %103 : vector<16x128xf32>
    %105 = vector.shape_cast %81 : vector<128xf32> to vector<1x128xf32>
    %106 = vector.broadcast %105 : vector<1x128xf32> to vector<16x128xf32>
    %107 = arith.addf %104, %106 : vector<16x128xf32>
    %108 = arith.truncf %107 : vector<16x128xf32> to vector<16x128xbf16>
    %c0_43 = arith.constant 0 : index
    %c0_44 = arith.constant 0 : index
    %c0_45 = arith.constant 0 : index
    %109 = vector.load %arg11[%c0_43, %c0_44, %c0_45] : memref<1x128x256xbf16, #tpu.memory_space<vmem>>, vector<1x128x256xbf16>
    %110 = vector.shape_cast %109 : vector<1x128x256xbf16> to vector<128x256xbf16>
    %cst_46 = arith.constant dense<0.000000e+00> : vector<16x256xf32>
    %111 = tpu.matmul %108, %110, %cst_46 {dimension_numbers = #tpu.dot_dimension_numbers<[1], [0], [0], [1], [0, 0, 1, 1], [], []>} : vector<16x128xbf16>, vector<128x256xbf16>, vector<16x256xf32> -> vector<16x256xf32>
    %c0_47 = arith.constant 0 : index
    %c0_48 = arith.constant 0 : index
    %c0_49 = arith.constant 0 : index
    %112 = vector.load %arg12[%c0_47, %c0_48, %c0_49] : memref<1x1x256xf32, #tpu.memory_space<vmem>>, vector<1x1x256xf32>
    %113 = vector.shape_cast %112 : vector<1x1x256xf32> to vector<256xf32>
    %114 = vector.shape_cast %113 : vector<256xf32> to vector<1x256xf32>
    %115 = vector.broadcast %114 : vector<1x256xf32> to vector<16x256xf32>
    %116 = arith.addf %111, %115 : vector<16x256xf32>
    %cst_50 = arith.constant 5.000000e-01 : f32
    %117 = vector.broadcast %cst_50 : f32 to vector<16x256xf32>
    %118 = arith.mulf %117, %116 : vector<16x256xf32>
    %cst_51 = arith.constant 4.471500e-02 : f32
    %119 = vector.broadcast %cst_51 : f32 to vector<16x256xf32>
    %120 = arith.mulf %119, %116 : vector<16x256xf32>
    %121 = arith.mulf %120, %116 : vector<16x256xf32>
    %122 = arith.mulf %121, %116 : vector<16x256xf32>
    %123 = arith.addf %116, %122 : vector<16x256xf32>
    %cst_52 = arith.constant 0.797884583 : f32
    %124 = vector.broadcast %cst_52 : f32 to vector<16x256xf32>
    %125 = arith.mulf %124, %123 : vector<16x256xf32>
    %126 = math.tanh %125 : vector<16x256xf32>
    %cst_53 = arith.constant 1.000000e+00 : f32
    %127 = vector.broadcast %cst_53 : f32 to vector<16x256xf32>
    %128 = arith.addf %127, %126 : vector<16x256xf32>
    %129 = arith.mulf %118, %128 : vector<16x256xf32>
    %130 = arith.truncf %129 : vector<16x256xf32> to vector<16x256xbf16>
    %c0_54 = arith.constant 0 : index
    %c0_55 = arith.constant 0 : index
    %c0_56 = arith.constant 0 : index
    %131 = vector.load %arg13[%c0_54, %c0_55, %c0_56] : memref<1x256x128xbf16, #tpu.memory_space<vmem>>, vector<1x256x128xbf16>
    %132 = vector.shape_cast %131 : vector<1x256x128xbf16> to vector<256x128xbf16>
    %cst_57 = arith.constant dense<0.000000e+00> : vector<16x128xf32>
    %133 = tpu.matmul %130, %132, %cst_57 {dimension_numbers = #tpu.dot_dimension_numbers<[1], [0], [0], [1], [0, 0, 1, 1], [], []>} : vector<16x256xbf16>, vector<256x128xbf16>, vector<16x128xf32> -> vector<16x128xf32>
    %c0_58 = arith.constant 0 : index
    %c0_59 = arith.constant 0 : index
    %c0_60 = arith.constant 0 : index
    %134 = vector.load %arg14[%c0_58, %c0_59, %c0_60] : memref<1x1x128xf32, #tpu.memory_space<vmem>>, vector<1x1x128xf32>
    %135 = vector.shape_cast %134 : vector<1x1x128xf32> to vector<128xf32>
    %136 = vector.shape_cast %135 : vector<128xf32> to vector<1x128xf32>
    %137 = vector.broadcast %136 : vector<1x128xf32> to vector<16x128xf32>
    %138 = arith.addf %133, %137 : vector<16x128xf32>
    %139 = arith.addf %77, %138 : vector<16x128xf32>
    %c0_61 = arith.constant 0 : index
    %c0_62 = arith.constant 0 : index
    %140 = vector.load %arg18[%c0_61, %c0_62] : memref<16x128xf32, #tpu.memory_space<vmem>>, vector<16x128xf32>
    tpu.vector_store %arg18[%c0_61, %c0_62], %139 {strides = array<i32>} : memref<16x128xf32, #tpu.memory_space<vmem>>, vector<16x128xf32>,
    %c3_i32 = arith.constant 3 : i32
    %141 = arith.cmpi eq, %arg0, %c3_i32 : i32
    %142 = arith.extui %141 : i1 to i32
    %c0_i32_63 = arith.constant 0 : i32
    %143 = arith.cmpi ne, %142, %c0_i32_63 : i32
    scf.if %143 {
      %c0_64 = arith.constant 0 : index
      %c0_65 = arith.constant 0 : index
      %c0_66 = arith.constant 0 : index
      %144 = vector.load %arg15[%c0_64, %c0_65, %c0_66] : memref<1x1x128xf32, #tpu.memory_space<vmem>>, vector<1x1x128xf32>
      %145 = vector.shape_cast %144 : vector<1x1x128xf32> to vector<128xf32>
      %c0_67 = arith.constant 0 : index
      %c0_68 = arith.constant 0 : index
      %c0_69 = arith.constant 0 : index
      %146 = vector.load %arg16[%c0_67, %c0_68, %c0_69] : memref<1x1x128xf32, #tpu.memory_space<vmem>>, vector<1x1x128xf32>
      %147 = vector.shape_cast %146 : vector<1x1x128xf32> to vector<128xf32>
      %cst_70 = arith.constant dense<0.000000e+00> : vector<16xf32>
      %148 = vector.multi_reduction <add>, %139, %cst_70 [1] : vector<16x128xf32> to vector<16xf32>
      %149 = vector.shape_cast %148 : vector<16xf32> to vector<16x1xf32>
      %cst_71 = arith.constant 1.280000e+02 : f32
      %150 = vector.broadcast %cst_71 : f32 to vector<16x1xf32>
      %151 = arith.divf %149, %150 : vector<16x1xf32>
      %152 = arith.mulf %139, %139 : vector<16x128xf32>
      %cst_72 = arith.constant dense<0.000000e+00> : vector<16xf32>
      %153 = vector.multi_reduction <add>, %152, %cst_72 [1] : vector<16x128xf32> to vector<16xf32>
      %154 = vector.shape_cast %153 : vector<16xf32> to vector<16x1xf32>
      %cst_73 = arith.constant 1.280000e+02 : f32
      %155 = vector.broadcast %cst_73 : f32 to vector<16x1xf32>
      %156 = arith.divf %154, %155 : vector<16x1xf32>
      %157 = arith.mulf %151, %151 : vector<16x1xf32>
      %158 = arith.subf %156, %157 : vector<16x1xf32>
      %cst_74 = arith.constant 0.000000e+00 : f32
      %159 = vector.broadcast %cst_74 : f32 to vector<16x1xf32>
      %160 = arith.maximumf %158, %159 : vector<16x1xf32>
      %161 = vector.broadcast %151 : vector<16x1xf32> to vector<16x128xf32>
      %162 = arith.subf %139, %161 : vector<16x128xf32>
      %cst_75 = arith.constant 9.99999997E-7 : f32
      %163 = vector.broadcast %cst_75 : f32 to vector<16x1xf32>
      %164 = arith.addf %160, %163 : vector<16x1xf32>
      %165 = math.rsqrt %164 : vector<16x1xf32>
      %166 = vector.broadcast %165 : vector<16x1xf32> to vector<16x128xf32>
      %167 = arith.mulf %162, %166 : vector<16x128xf32>
      %168 = vector.shape_cast %145 : vector<128xf32> to vector<1x128xf32>
      %169 = vector.broadcast %168 : vector<1x128xf32> to vector<16x128xf32>
      %170 = arith.mulf %167, %169 : vector<16x128xf32>
      %171 = vector.shape_cast %147 : vector<128xf32> to vector<1x128xf32>
      %172 = vector.broadcast %171 : vector<1x128xf32> to vector<16x128xf32>
      %173 = arith.addf %170, %172 : vector<16x128xf32>
      %174 = vector.shape_cast %173 : vector<16x128xf32> to vector<2x8x128xf32>
      %c0_76 = arith.constant 0 : index
      %c0_77 = arith.constant 0 : index
      %c0_78 = arith.constant 0 : index
      %175 = vector.load %arg17[%c0_76, %c0_77, %c0_78] : memref<2x8x128xf32, #tpu.memory_space<vmem>>, vector<2x8x128xf32>
      tpu.vector_store %arg17[%c0_76, %c0_77, %c0_78], %174 {strides = array<i32>} : memref<2x8x128xf32, #tpu.memory_space<vmem>>, vector<2x8x128xf32>,
    } else {
    }
    return
  }
  func.func @transform_0(%arg0: i32) -> (i32, i32, i32) {
    %c0_i32 = arith.constant 0 : i32
    %c0_i32_0 = arith.constant 0 : i32
    %c0_i32_1 = arith.constant 0 : i32
    %c0_i32_2 = arith.constant 0 : i32
    return %c0_i32, %c0_i32_0, %c0_i32_1 : i32, i32, i32
  }
  func.func @transform_1(%arg0: i32) -> (i32, i32, i32) {
    %c0_i32 = arith.constant 0 : i32
    %c0_i32_0 = arith.constant 0 : i32
    %c0_i32_1 = arith.constant 0 : i32
    %c0_i32_2 = arith.constant 0 : i32
    return %c0_i32, %c0_i32_0, %c0_i32_1 : i32, i32, i32
  }
  func.func @transform_2(%arg0: i32) -> (i32, i32, i32) {
    %c0_i32 = arith.constant 0 : i32
    %c0_i32_0 = arith.constant 0 : i32
    %c0_i32_1 = arith.constant 0 : i32
    return %arg0, %c0_i32, %c0_i32_0 : i32, i32, i32
  }
  func.func @transform_3(%arg0: i32) -> (i32, i32, i32) {
    %c0_i32 = arith.constant 0 : i32
    %c0_i32_0 = arith.constant 0 : i32
    %c0_i32_1 = arith.constant 0 : i32
    return %arg0, %c0_i32, %c0_i32_0 : i32, i32, i32
  }
  func.func @transform_4(%arg0: i32) -> (i32, i32, i32) {
    %c0_i32 = arith.constant 0 : i32
    %c0_i32_0 = arith.constant 0 : i32
    %c0_i32_1 = arith.constant 0 : i32
    return %arg0, %c0_i32, %c0_i32_0 : i32, i32, i32
  }
  func.func @transform_5(%arg0: i32) -> (i32, i32, i32) {
    %c0_i32 = arith.constant 0 : i32
    %c0_i32_0 = arith.constant 0 : i32
    %c0_i32_1 = arith.constant 0 : i32
    return %arg0, %c0_i32, %c0_i32_0 : i32, i32, i32
  }
  func.func @transform_6(%arg0: i32) -> (i32, i32, i32) {
    %c0_i32 = arith.constant 0 : i32
    %c0_i32_0 = arith.constant 0 : i32
    %c0_i32_1 = arith.constant 0 : i32
    return %arg0, %c0_i32, %c0_i32_0 : i32, i32, i32
  }
  func.func @transform_7(%arg0: i32) -> (i32, i32, i32) {
    %c0_i32 = arith.constant 0 : i32
    %c0_i32_0 = arith.constant 0 : i32
    %c0_i32_1 = arith.constant 0 : i32
    return %arg0, %c0_i32, %c0_i32_0 : i32, i32, i32
  }
  func.func @transform_8(%arg0: i32) -> (i32, i32, i32) {
    %c0_i32 = arith.constant 0 : i32
    %c0_i32_0 = arith.constant 0 : i32
    %c0_i32_1 = arith.constant 0 : i32
    return %arg0, %c0_i32, %c0_i32_0 : i32, i32, i32
  }
  func.func @transform_9(%arg0: i32) -> (i32, i32, i32) {
    %c0_i32 = arith.constant 0 : i32
    %c0_i32_0 = arith.constant 0 : i32
    %c0_i32_1 = arith.constant 0 : i32
    return %arg0, %c0_i32, %c0_i32_0 : i32, i32, i32
  }
  func.func @transform_10(%arg0: i32) -> (i32, i32, i32) {
    %c0_i32 = arith.constant 0 : i32
    %c0_i32_0 = arith.constant 0 : i32
    %c0_i32_1 = arith.constant 0 : i32
    return %arg0, %c0_i32, %c0_i32_0 : i32, i32, i32
  }
  func.func @transform_11(%arg0: i32) -> (i32, i32, i32) {
    %c0_i32 = arith.constant 0 : i32
    %c0_i32_0 = arith.constant 0 : i32
    %c0_i32_1 = arith.constant 0 : i32
    return %arg0, %c0_i32, %c0_i32_0 : i32, i32, i32
  }
  func.func @transform_12(%arg0: i32) -> (i32, i32, i32) {
    %c0_i32 = arith.constant 0 : i32
    %c0_i32_0 = arith.constant 0 : i32
    %c0_i32_1 = arith.constant 0 : i32
    return %arg0, %c0_i32, %c0_i32_0 : i32, i32, i32
  }
  func.func @transform_13(%arg0: i32) -> (i32, i32, i32) {
    %c0_i32 = arith.constant 0 : i32
    %c0_i32_0 = arith.constant 0 : i32
    %c0_i32_1 = arith.constant 0 : i32
    return %arg0, %c0_i32, %c0_i32_0 : i32, i32, i32
  }
  func.func @transform_14(%arg0: i32) -> (i32, i32, i32) {
    %c0_i32 = arith.constant 0 : i32
    %c0_i32_0 = arith.constant 0 : i32
    %c0_i32_1 = arith.constant 0 : i32
    %c0_i32_2 = arith.constant 0 : i32
    return %c0_i32, %c0_i32_0, %c0_i32_1 : i32, i32, i32
  }
  func.func @transform_15(%arg0: i32) -> (i32, i32, i32) {
    %c0_i32 = arith.constant 0 : i32
    %c0_i32_0 = arith.constant 0 : i32
    %c0_i32_1 = arith.constant 0 : i32
    %c0_i32_2 = arith.constant 0 : i32
    return %c0_i32, %c0_i32_0, %c0_i32_1 : i32, i32, i32
  }
  func.func @transform_16(%arg0: i32) -> (i32, i32, i32) {
    %c0_i32 = arith.constant 0 : i32
    %c0_i32_0 = arith.constant 0 : i32
    %c0_i32_1 = arith.constant 0 : i32
    %c0_i32_2 = arith.constant 0 : i32
    return %c0_i32, %c0_i32_0, %c0_i32_1 : i32, i32, i32
  }
}

</mosaic_0001>

<bundles_post_ra>
// kernel: tpu_custom_call.1
= control target key start
LH: loop header
LB: loop body
LE: loop exit
PB: predicated region body
PF: predicated region fallthrough
CT: control target
= control target key end

     0   :  { %s7743_s0 = inlined_call_operand.hbm [shape: f32[2,8,128], index: 0, kind: input, shape index: {}]   ;;  %s7744_s1 = inlined_call_operand.hbm [shape: f32[1,8,128], index: 1, kind: input, shape index: {}]   ;;  %s7745_s2 = inlined_call_operand.hbm [shape: f32[4,1,128], index: 2, kind: input, shape index: {}]   ;;  %s7746_s3 = inlined_call_operand.hbm [shape: f32[4,1,128], index: 3, kind: input, shape index: {}]   ;;  %s7747_s4 = inlined_call_operand.hbm [shape: bf16[4,128,384], index: 4, kind: input, shape index: {}]   ;;  %s7748_s5 = inlined_call_operand.vmem [shape: f32[4,1,384], index: 5, kind: input, shape index: {}]   ;;  %s7749_s6 = inlined_call_operand.hbm [shape: bf16[4,128,128], index: 6, kind: input, shape index: {}]   ;;  %s7750_s7 = inlined_call_operand.vmem [shape: f32[4,1,128], index: 7, kind: input, shape index: {}]   ;;  %s7751_s8 = inlined_call_operand.vmem [shape: f32[4,1,128], index: 8, kind: input, shape index: {}]   ;;  %s7752_s9 = inlined_call_operand.vmem [shape: f32[4,1,128], index: 9, kind: input, shape index: {}]   ;;  %s7753_s10 = inlined_call_operand.hbm [shape: bf16[4,128,256], index: 10, kind: input, shape index: {}]   ;;  %s7754_s11 = inlined_call_operand.vmem [shape: f32[4,1,256], index: 11, kind: input, shape index: {}]   ;;  %s7755_s12 = inlined_call_operand.hbm [shape: bf16[4,256,128], index: 12, kind: input, shape index: {}]   ;;  %s7756_s13 = inlined_call_operand.vmem [shape: f32[4,1,128], index: 13, kind: input, shape index: {}]   ;;  %s7757_s14 = inlined_call_operand.vmem [shape: f32[1,1,128], index: 14, kind: input, shape index: {}]   ;;  %s7758_s15 = inlined_call_operand.vmem [shape: f32[1,1,128], index: 15, kind: input, shape index: {}]   ;;  %s7759_s16 = inlined_call_operand.hbm [shape: f32[2,8,128], index: 16, kind: output, shape index: {}]  }
   0x1   :  { %7781 = sst [smem:[#allocation22_spill]] %s7743_s0 }
   0x2   :  { %7782 = sst [smem:[#allocation23_spill]] %s7744_s1 }
   0x3   :  { %7783 = sst [smem:[#allocation24_spill]] %s7745_s2 }
   0x4   :  { %7784 = sst [smem:[#allocation25_spill]] %s7746_s3 }
   0x5   :  { %7785 = sst [smem:[#allocation26_spill]] %s7747_s4 }
   0x6   :  { %7786 = sst [smem:[#allocation27_spill]] %s7748_s5 }
   0x7   :  { %7787 = sst [smem:[#allocation28_spill]] %s7749_s6 }
   0x8   :  { %7788 = sst [smem:[#allocation29_spill]] %s7751_s8 }
   0x9   :  { %7789 = sst [smem:[#allocation30_spill]] %s7752_s9 }
   0xa   :  { %7790 = sst [smem:[#allocation31_spill]] %s7753_s10 }
   0xb   :  { %7791 = sst [smem:[#allocation32_spill]] %s7754_s11 }
   0xc   :  { %7792 = sst [smem:[#allocation33_spill]] %s7756_s13 }
   0xd   :  { %7793 = sst [smem:[#allocation34_spill]] %s7757_s14 }
   0xe   :  { %7794 = sst [smem:[#allocation35_spill]] %s7758_s15 }
   0xf   :  { %7795 = sst [smem:[#allocation36_spill]] %s7759_s16 }
  0x10   :  { %21 = vsyncpa [#allocation4], 0 }
  0x11   :  { %22 = vsyncpa [#allocation7], 0 }
  0x12   :  { %23 = vsyncpa [#allocation5], 0  ;;  %s6343_s21 = smov 0   ;;  %s6345_s22 = smov 0  }
  0x13   :  { %s6347_s23 = smov 0   ;;  %s6349_s24 = smov 0  }
  0x14 LB: > { %7796 = sst [smem:[#allocation19_spill]] %s6223_s23  ;;  %s6362_s25 = sadd.s32 4294967295, %s6227_s24   ;;  %s6227_s24 = sphi %s6349_s24, %s7844_s24   ;;  %s6223_s23 = sphi %s6347_s23, %s7846_s23   ;;  %s6219_s22 = sphi %s6345_s22, %s7848_s22   ;;  %s6215_s21 = sphi %s6343_s21, %s7847_s21  }
  0x15   : > { %s6365_s26 = sadd.s32 1, %s6227_s24   ;;  %s78_s28 = sadd.s32 1, %s6223_s23 }
  0x16   : > { %7797 = sst [smem:[#allocation20_spill]] %s6365_s26  ;;  %s75_s27 = ssub.s32 %s6227_s24, %s6365_s26 }
  0x17   : > { %p76_p0 = scmp.eq.s32.totalorder %s75_s27, 0  ;;  %p85_p1 = scmp.ne.s32.totalorder %s6223_s23, %s6219_s22 }
  0x18   : > { %p86_p2 = scmp.eq.s32.totalorder %s6227_s24, 0  ;;  %p91_p3 = scmp.ne.s32.totalorder %s6219_s22, %s6215_s21 }
  0x19   : > { %s6375_s29 = scalar_select %p76_p0, %s6223_s23, %s78_s28  }
  0x1a   : > { %p6377_p4 = por %p86_p2, %p85_p1  ;;  %p7765_p5 = scmp.eq.s32.totalorder %s6362_s25, 0 }
  0x1b   : > { %7798 = sst [smem:[#allocation21_spill]] %s6375_s29  ;;  %p5137_p6 = scmp.ge.s32.totalorder %s6227_s24, 1 }
  0x1c   : > { %p451_p7 = scmp.lt.s32.totalorder %s6227_s24, 5  ;;  %p6386_p8 = por %p7765_p5, %p91_p3 }
  0x1d   : > { %s6229_s18 = smov [#allocation3]   ;;  %p5693_p13 = scmp.lt.s32.totalorder %s6227_s24, 4 }
  0x1e   : > { %s7800_s0 = scalar_select %p6386_p8, 1, 0 }
  0x1f   : > { %p6391_p10 = pnand %p5137_p6, %p451_p7  ;;  %s463_s19 = sshll.u32 %s6229_s18, 4  ;;  %s464_s19 = int_to_ptr.vmem [resolvable:$true] %s463_s19 }
  0x20   : > { %s494_s21 = sand.u32 1, %s6227_s24   ;;  %s6406_s27 = sand.u32 1, %s6223_s23  }
  0x21   : > { %s7801_s17 = scalar_select %p6391_p10, 1, 0 }
  0x22   : > { %p5665_p11 = pneg %p6391_p10  ;;  %p6410_p0 = pnand %p5693_p13, %p6377_p4 }
  0x23   : > { %s7804_s26 = sld [smem:[#allocation22_spill]] }
  0x24   : > { %p6399_p12 = pnand %p5665_p11, %p7765_p5 }
  0x25   : > { %s7803_s28 = scalar_select %p6410_p0, 1, 0 }
  0x26   : > { %s7802_s20 = scalar_select %p6399_p12, 1, 0 }
  0x27   : > { %p7769_p2 = pneg %p6399_p12 }
  0x29   : > { %s5919_s16 = scalar_lea.hbm %s7804_s26, 256 }
  0x2a   : > { %p5920_p1 = scmp.ne.s32.totalorder %s7804_s26, %s5919_s16  ;;  %p5926_p4 = scmp.lt.u32.totalorder %s5919_s16, %s7804_s26 }
  0x2c   : > { %p5922_p3 = pnand %p7769_p2, %p5920_p1 }
  0x2e   : > { %p5923_p6 = pneg %p5922_p3 }
  0x30   : > { %p5928_p7 = pnand %p5926_p4, %p5923_p6 }
  0x32   : > { %5931 = shalt.err (!%p5928_p7)
}
  0x33   : > { %s5932_s13 = scalar_lea.vmem %s464_s19, 256  ;;  %p5940_p5 = scmp.lt.s32.totalorder %s464_s19, %s464_s19 }
  0x34   : > { %p5933_p11 = scmp.ne.s32.totalorder %s464_s19, %s5932_s13  ;;  %p5941_p8 = scmp.lt.s32.totalorder %s5932_s13, %s5932_s13 }
  0x36   : > { %p5935_p13 = pnand %p5933_p11, %p7769_p2  ;;  %p5942_p10 = por %p5941_p8, %p5940_p5 }
  0x38   : > { %p5936_p9 = pneg %p5935_p13 }
  0x3a   : > { %p5943_p0 = pnand %p5942_p10, %p5936_p9 }
  0x3c   : > { %5946 = shalt.err (!%p5943_p0)
}
  0x3d   : > { %s7772_s14 = smov 128   ;;  %s7773_s15 = smov 8  }
  0x3e   : > { %5668 = dma.hbm_to_vmem [thread:$0]  (!%p6399_p12), %s7804_s26, 256, %s464_s19, [#allocation4], %s7772_s14, %s7772_s14, %s7773_s15  }
  0x3f   : > { %s5141_s29 = sshll.u32 %s6227_s24, 4  ;;  %s7805_s2 = sld [smem:[#allocation24_spill]] }
  0x40   : > { %s497_s11 = scalar_lea.vmem [#allocation8], %s6406_s27  ;;  %s6450_s9 = scalar_lea.sflag [#allocation4], %s494_s21 }
  0x41   : > { %s504_s5 = sshll.u32 %s497_s11, 4  ;;  %p7806_p8 = scmp.ne.s32.totalorder %s7803_s28, 0  ;;  %s6448_s5 = int_to_ptr.vmem [resolvable:$true] %s504_s5 }
  0x43   : > { %p6456_p9 = pneg %p7806_p8 }
  0x45   : > { %s6445_s30 = scalar_lea.hbm %s7805_s2, %s5141_s29  ;;  %s5952_s13 = scalar_lea.hbm %s7805_s2, 64 }
  0x46   : > { %s5947_s8 = scalar_lea.hbm %s6445_s30, 16  ;;  %p5953_p1 = scmp.lt.u32.totalorder %s6445_s30, %s7805_s2 }
  0x47   : > { %p5948_p5 = scmp.ne.s32.totalorder %s6445_s30, %s5947_s8  ;;  %p5954_p3 = scmp.lt.u32.totalorder %s5952_s13, %s5947_s8 }
  0x48   : > { %s7807_s19 = scalar_select %p6456_p9, 1, 0 }
  0x49   : > { %p5950_p10 = pnand %p6456_p9, %p5948_p5  ;;  %p5955_p6 = por %p5954_p3, %p5953_p1 }
  0x4a   : > { %p5956_p4 = scmp.lt.u32.totalorder %s5947_s8, %s6445_s30 }
  0x4b   : > { %p5951_p0 = pneg %p5950_p10 }
  0x4c   : > { %p5957_p7 = por %p5956_p4, %p5955_p6 }
  0x4e   : > { %p5958_p11 = pnand %p5957_p7, %p5951_p0 }
  0x50   : > { %5961 = shalt.err (!%p5958_p11)
}
  0x51   : > { %s5962_s21 = scalar_lea.vmem %s6448_s5, 16  ;;  %s6232_s16 = smov [#allocation8]  }
  0x52   : > { %p5963_p13 = scmp.ne.s32.totalorder %s6448_s5, %s5962_s21  ;;  %s5967_s23 = sshll.u32 %s6232_s16, 4  ;;  %s5968_s23 = int_to_ptr.vmem [resolvable:$false] %s5967_s23 }
  0x53   : > { %s5969_s11 = scalar_lea.vmem %s5968_s23, 32  ;;  %p5970_p2 = scmp.lt.s32.totalorder %s6448_s5, %s5968_s23 }
  0x54   : > { %p5965_p5 = pnand %p5963_p13, %p6456_p9  ;;  %p5971_p12 = scmp.lt.s32.totalorder %s5969_s11, %s5962_s21 }
  0x56   : > { %p5966_p10 = pneg %p5965_p5  ;;  %p5972_p1 = por %p5971_p12, %p5970_p2 }
  0x58   : > { %p5973_p3 = pnand %p5972_p1, %p5966_p10 }
  0x5a   : > { %5976 = shalt.err (!%p5973_p3)
}
  0x5b   : > { %5675 = dma.hbm_to_vmem [thread:$0]  (!%p7806_p8), %s6445_s30, 16, %s6448_s5, %s6450_s9  }
  0x5c   : > { %s7808_s3 = sld [smem:[#allocation25_spill]]  ;;  %s514_s21 = scalar_lea.vmem [#allocation9], %s6406_s27 }
  0x5d   : > { %s521_s16 = sshll.u32 %s514_s21, 4  ;;  %s5637_s23 = smul.u32 192, %s6406_s27  ;;  %s522_s16 = int_to_ptr.vmem [resolvable:$true] %s521_s16 }
  0x62   : > { %s6485_s18 = scalar_lea.hbm %s7808_s3, %s5141_s29  ;;  %s5982_s14 = scalar_lea.hbm %s7808_s3, 64 }
  0x63   : > { %s5977_s11 = scalar_lea.hbm %s6485_s18, 16  ;;  %p5983_p6 = scmp.lt.u32.totalorder %s6485_s18, %s7808_s3 }
  0x64   : > { %p5978_p12 = scmp.ne.s32.totalorder %s6485_s18, %s5977_s11  ;;  %p5984_p4 = scmp.lt.u32.totalorder %s5982_s14, %s5977_s11 }
  0x65   : > { %p5986_p11 = scmp.lt.u32.totalorder %s5977_s11, %s6485_s18 }
  0x66   : > { %p5980_p2 = pnand %p5978_p12, %p6456_p9  ;;  %p5985_p7 = por %p5984_p4, %p5983_p6 }
  0x68   : > { %p5981_p0 = pneg %p5980_p2  ;;  %p5987_p13 = por %p5986_p11, %p5985_p7 }
  0x6a   : > { %p5988_p5 = pnand %p5987_p13, %p5981_p0 }
  0x6c   : > { %5991 = shalt.err (!%p5988_p5)
}
  0x6d   : > { %s5992_s13 = scalar_lea.vmem %s522_s16, 16  ;;  %s6233_s21 = smov [#allocation9]  }
  0x6e   : > { %p5993_p10 = scmp.ne.s32.totalorder %s522_s16, %s5992_s13  ;;  %s5997_s15 = sshll.u32 %s6233_s21, 4  ;;  %s5998_s15 = int_to_ptr.vmem [resolvable:$false] %s5997_s15 }
  0x6f   : > { %s5999_s5 = scalar_lea.vmem %s5998_s15, 32  ;;  %p6000_p12 = scmp.lt.s32.totalorder %s522_s16, %s5998_s15 }
  0x70   : > { %p5995_p1 = pnand %p5993_p10, %p6456_p9  ;;  %p6001_p2 = scmp.lt.s32.totalorder %s5999_s5, %s5992_s13 }
  0x72   : > { %p5996_p3 = pneg %p5995_p1  ;;  %p6002_p8 = por %p6001_p2, %p6000_p12 }
  0x74   : > { %p6003_p4 = pnand %p6002_p8, %p5996_p3 }
  0x76   : > { %6006 = shalt.err (!%p6003_p4)
}
  0x77   : > { %p7809_p6 = scmp.ne.s32.totalorder %s7803_s28, 0  ;;  %s5638_s14 = smul.u32 3072, %s6227_s24 }
  0x78   : > { %s532_s11 = scalar_lea.vmem [#allocation10], %s5637_s23  ;;  %s7810_s4 = sld [smem:[#allocation26_spill]] }
  0x79   : > { %5678 = dma.hbm_to_vmem [thread:$0]  (!%p7809_p6), %s6485_s18, 16, %s522_s16, %s6450_s9  }
  0x7a   : > { %s539_s30 = sshll.u32 %s532_s11, 4  ;;  %s5144_s15 = sshll.u32 %s6406_s27, 6  ;;  %s6513_s30 = int_to_ptr.vmem [resolvable:$true] %s539_s30 }
  0x7e   : > { %s6511_s21 = scalar_lea.hbm %s7810_s4, %s5638_s14  ;;  %s6012_s23 = scalar_lea.hbm %s7810_s4, 12288 }
  0x7f   : > { %s6007_s13 = scalar_lea.hbm %s6511_s21, 3072  ;;  %p6013_p11 = scmp.lt.u32.totalorder %s6511_s21, %s7810_s4 }
  0x80   : > { %p6008_p8 = scmp.ne.s32.totalorder %s6511_s21, %s6007_s13  ;;  %p6014_p13 = scmp.lt.u32.totalorder %s6012_s23, %s6007_s13 }
  0x81   : > { %p6016_p10 = scmp.lt.u32.totalorder %s6007_s13, %s6511_s21 }
  0x82   : > { %p6010_p0 = pnand %p6008_p8, %p6456_p9  ;;  %p6015_p5 = por %p6014_p13, %p6013_p11 }
  0x84   : > { %p6011_p7 = pneg %p6010_p0  ;;  %p6017_p1 = por %p6016_p10, %p6015_p5 }
  0x86   : > { %p6018_p3 = pnand %p6017_p1, %p6011_p7 }
  0x88   : > { %6021 = shalt.err (!%p6018_p3)
}
  0x89   : > { %s6022_s14 = scalar_lea.vmem %s6513_s30, 3072  ;;  %s6234_s8 = smov [#allocation10]  }
  0x8a   : > { %p6023_p12 = scmp.ne.s32.totalorder %s6513_s30, %s6022_s14  ;;  %s6027_s29 = sshll.u32 %s6234_s8, 4  ;;  %s6028_s29 = int_to_ptr.vmem [resolvable:$false] %s6027_s29 }
  0x8b   : > { %s6029_s18 = scalar_lea.vmem %s6028_s29, 6144  ;;  %p6030_p8 = scmp.lt.s32.totalorder %s6513_s30, %s6028_s29 }
  0x8c   : > { %p6025_p2 = pnand %p6023_p12, %p6456_p9  ;;  %p6031_p0 = scmp.lt.s32.totalorder %s6029_s18, %s6022_s14 }
  0x8e   : > { %p6026_p4 = pneg %p6025_p2  ;;  %p6032_p11 = por %p6031_p0, %p6030_p8 }
  0x90   : > { %p6033_p13 = pnand %p6032_p11, %p6026_p4 }
  0x92   : > { %6036 = shalt.err (!%p6033_p13)
}
  0x93   : > { %s6235_s13 = smov 192   ;;  %s6236_s16 = smov 12  }
  0x94   : > { %5681 = dma.hbm_to_vmem [thread:$0]  (!%p7809_p6), %s6511_s21, 3072, %s6513_s30, %s6450_s9, %s6235_s13, %s6235_s13, %s6236_s16  }
  0x95   : > { %s5298_s23 = sshll.u32 %s6227_s24, 10  ;;  %s7811_s6 = sld [smem:[#allocation28_spill]] }
  0x96   : > { %s560_s8 = scalar_lea.vmem [#allocation11], %s5144_s15  ;;  %s7777_s18 = sshll.u32 %s6406_s27, 7 }
  0x97   : > { %s567_s29 = sshll.u32 %s560_s8, 4  ;;  %s6546_s29 = int_to_ptr.vmem [resolvable:$true] %s567_s29 }
  0x9b   : > { %s6542_s14 = scalar_lea.hbm %s7811_s6, %s5298_s23  ;;  %s6042_s13 = scalar_lea.hbm %s7811_s6, 4096 }
  0x9c   : > { %s6037_s2 = scalar_lea.hbm %s6542_s14, 1024  ;;  %p6043_p1 = scmp.lt.u32.totalorder %s6542_s14, %s7811_s6 }
  0x9d   : > { %p6038_p7 = scmp.ne.s32.totalorder %s6542_s14, %s6037_s2  ;;  %p6044_p3 = scmp.lt.u32.totalorder %s6042_s13, %s6037_s2 }
  0x9e   : > { %p6046_p2 = scmp.lt.u32.totalorder %s6037_s2, %s6542_s14 }
  0x9f   : > { %p6040_p5 = pnand %p6038_p7, %p6456_p9  ;;  %p6045_p12 = por %p6044_p3, %p6043_p1 }
  0xa1   : > { %p6041_p10 = pneg %p6040_p5  ;;  %p6047_p4 = por %p6046_p2, %p6045_p12 }
  0xa3   : > { %p6048_p8 = pnand %p6047_p4, %p6041_p10 }
  0xa5   : > { %6051 = shalt.err (!%p6048_p8)
}
  0xa6   : > { %s6052_s15 = scalar_lea.vmem %s6546_s29, 1024  ;;  %s6237_s5 = smov [#allocation11]  }
  0xa7   : > { %p6053_p0 = scmp.ne.s32.totalorder %s6546_s29, %s6052_s15  ;;  %s6057_s11 = sshll.u32 %s6237_s5, 4  ;;  %s6058_s11 = int_to_ptr.vmem [resolvable:$false] %s6057_s11 }
  0xa8   : > { %s6059_s8 = scalar_lea.vmem %s6058_s11, 2048  ;;  %p6060_p7 = scmp.lt.s32.totalorder %s6546_s29, %s6058_s11 }
  0xa9   : > { %p6055_p11 = pnand %p6053_p0, %p6456_p9  ;;  %p6061_p5 = scmp.lt.s32.totalorder %s6059_s8, %s6052_s15 }
  0xab   : > { %p6056_p13 = pneg %p6055_p11  ;;  %p6062_p1 = por %p6061_p5, %p6060_p7 }
  0xad   : > { %p6063_p3 = pnand %p6062_p1, %p6056_p13 }
  0xaf   : > { %6066 = shalt.err (!%p6063_p3)
}
  0xb0   : > { %s7775_s2 = smov 64   ;;  %s7776_s30 = smov 4  }
  0xb1   : > { %5684 = dma.hbm_to_vmem [thread:$0]  (!%p7809_p6), %s6542_s14, 1024, %s6546_s29, %s6450_s9, %s7775_s2, %s7775_s2, %s7776_s30  }
  0xb2   : > { %s5299_s21 = sshll.u32 %s6227_s24, 11  ;;  %s7812_s10 = sld [smem:[#allocation31_spill]] }
  0xb3   : > { %s599_s15 = scalar_lea.vmem [#allocation12], %s7777_s18 }
  0xb4   : > { %s606_s5 = sshll.u32 %s599_s15, 4  ;;  %s6584_s5 = int_to_ptr.vmem [resolvable:$true] %s606_s5 }
  0xb8   : > { %s6580_s23 = scalar_lea.hbm %s7812_s10, %s5299_s21  ;;  %s6072_s8 = scalar_lea.hbm %s7812_s10, 8192 }
  0xb9   : > { %s6067_s11 = scalar_lea.hbm %s6580_s23, 2048  ;;  %p6073_p4 = scmp.lt.u32.totalorder %s6580_s23, %s7812_s10 }
  0xba   : > { %p6068_p10 = scmp.ne.s32.totalorder %s6580_s23, %s6067_s11  ;;  %p6074_p8 = scmp.lt.u32.totalorder %s6072_s8, %s6067_s11 }
  0xbb   : > { %p6076_p11 = scmp.lt.u32.totalorder %s6067_s11, %s6580_s23 }
  0xbc   : > { %p6070_p12 = pnand %p6068_p10, %p6456_p9  ;;  %p6075_p0 = por %p6074_p8, %p6073_p4 }
  0xbe   : > { %p6071_p2 = pneg %p6070_p12  ;;  %p6077_p13 = por %p6076_p11, %p6075_p0 }
  0xc0   : > { %p6078_p7 = pnand %p6077_p13, %p6071_p2 }
  0xc2   : > { %6081 = shalt.err (!%p6078_p7)
}
  0xc3   : > { %s6082_s15 = scalar_lea.vmem %s6584_s5, 2048  ;;  %s6240_s14 = smov [#allocation12]  }
  0xc4   : > { %p6083_p5 = scmp.ne.s32.totalorder %s6584_s5, %s6082_s15  ;;  %s6087_s29 = sshll.u32 %s6240_s14, 4  ;;  %s6088_s29 = int_to_ptr.vmem [resolvable:$false] %s6087_s29 }
  0xc5   : > { %s6089_s13 = scalar_lea.vmem %s6088_s29, 4096  ;;  %p6090_p10 = scmp.lt.s32.totalorder %s6584_s5, %s6088_s29 }
  0xc6   : > { %p6085_p1 = pnand %p6083_p5, %p6456_p9  ;;  %p6091_p12 = scmp.lt.s32.totalorder %s6089_s13, %s6082_s15 }
  0xc8   : > { %p6086_p3 = pneg %p6085_p1  ;;  %p6092_p4 = por %p6091_p12, %p6090_p10 }
  0xca   : > { %p6093_p8 = pnand %p6092_p4, %p6086_p3 }
  0xcc   : > { %6096 = shalt.err (!%p6093_p8)
}
  0xcd   : > { %s7813_s11 = smov 8   ;;  %s7814_s8 = smov 128  }
  0xce   : > { %5687 = dma.hbm_to_vmem [thread:$0]  (!%p7809_p6), %s6580_s23, 2048, %s6584_s5, %s6450_s9, %s7814_s8, %s7814_s8, %s7813_s11  }
  0xcf   : > { %s6241_s16 = smov [#allocation6]   ;;  %s6616_s13 = scalar_lea.hbm %s7755_s12, %s5299_s21 }
  0xd0   : > { %s477_s14 = sshll.u32 %s6241_s16, 4  ;;  %s7815_s1 = sld [smem:[#allocation23_spill]]  ;;  %s478_s14 = int_to_ptr.vmem [resolvable:$true] %s477_s14 }
  0xd1   : > { %p7816_p0 = scmp.ne.s32.totalorder %s7802_s20, 0 }
  0xd3   : > { %p7817_p11 = pneg %p7816_p0 }
  0xd6   : > { %s6097_s18 = scalar_lea.hbm %s7815_s1, 128 }
  0xd7   : > { %p6098_p2 = scmp.ne.s32.totalorder %s7815_s1, %s6097_s18  ;;  %p6104_p5 = scmp.lt.u32.totalorder %s6097_s18, %s7815_s1 }
  0xd9   : > { %p6100_p13 = pnand %p6098_p2, %p7817_p11 }
  0xdb   : > { %p6101_p7 = pneg %p6100_p13 }
  0xdd   : > { %p6106_p1 = pnand %p6104_p5, %p6101_p7 }
  0xdf   : > { %6109 = shalt.err (!%p6106_p1)
}
  0xe0   : > { %s6110_s24 = scalar_lea.vmem %s478_s14, 128  ;;  %p7818_p10 = pmov %p7817_p11 }
  0xe1   : > { %p6111_p3 = scmp.ne.s32.totalorder %s478_s14, %s6110_s24  ;;  %p6118_p8 = scmp.lt.s32.totalorder %s478_s14, %s478_s14 }
  0xe2   : > { %p6119_p6 = scmp.lt.s32.totalorder %s6110_s24, %s6110_s24 }
  0xe3   : > { %p6113_p12 = pnand %p6111_p3, %p7818_p10 }
  0xe4   : > { %p6120_p9 = por %p6119_p6, %p6118_p8 }
  0xe5   : > { %p6114_p4 = pneg %p6113_p12 }
  0xe7   : > { %p6121_p2 = pnand %p6120_p9, %p6114_p4 }
  0xe9   : > { %6124 = shalt.err (!%p6121_p2)
}
  0xea   : > { %5671 = dma.hbm_to_vmem [thread:$0]  (!%p7816_p0), %s7815_s1, 128, %s478_s14, [#allocation7]  }
  0xeb   : > { %s7819_s18 = sshll.u32 %s6406_s27, 7  ;;  %s6125_s21 = scalar_lea.hbm %s6616_s13, 2048 }
  0xec   : > { %s627_s2 = scalar_lea.vmem [#allocation13], %s7819_s18  ;;  %p6126_p9 = scmp.ne.s32.totalorder %s6616_s13, %s6125_s21 }
  0xed   : > { %s634_s30 = sshll.u32 %s627_s2, 4  ;;  %p7820_p6 = scmp.ne.s32.totalorder %s7807_s19, 0  ;;  %s6640_s30 = int_to_ptr.vmem [resolvable:$true] %s634_s30 }
  0xee   : > { %s6130_s8 = scalar_lea.hbm %s7755_s12, 8192  ;;  %p6131_p7 = scmp.lt.u32.totalorder %s6616_s13, %s7755_s12 }
  0xef   : > { %p6128_p11 = pnand %p6126_p9, %p7820_p6  ;;  %p6132_p5 = scmp.lt.u32.totalorder %s6130_s8, %s6125_s21 }
  0xf0   : > { %p6134_p1 = scmp.lt.u32.totalorder %s6125_s21, %s6616_s13 }
  0xf1   : > { %p6129_p13 = pneg %p6128_p11  ;;  %p6133_p0 = por %p6132_p5, %p6131_p7 }
  0xf3   : > { %p6135_p3 = por %p6134_p1, %p6133_p0 }
  0xf5   : > { %p6136_p10 = pnand %p6135_p3, %p6129_p13 }
  0xf7   : > { %6139 = shalt.err (!%p6136_p10)
}
  0xf8   : > { %s6140_s27 = scalar_lea.vmem %s6640_s30, 2048  ;;  %s6242_s14 = smov [#allocation13]  }
  0xf9   : > { %p6141_p12 = scmp.ne.s32.totalorder %s6640_s30, %s6140_s27  ;;  %s6145_s15 = sshll.u32 %s6242_s14, 4  ;;  %s6146_s15 = int_to_ptr.vmem [resolvable:$false] %s6145_s15 }
  0xfa   : > { %s6147_s23 = scalar_lea.vmem %s6146_s15, 4096  ;;  %p6148_p2 = scmp.lt.s32.totalorder %s6640_s30, %s6146_s15 }
  0xfb   : > { %p6143_p4 = pnand %p6141_p12, %p7820_p6  ;;  %p6149_p9 = scmp.lt.s32.totalorder %s6147_s23, %s6140_s27 }
  0xfd   : > { %p6144_p8 = pneg %p6143_p4  ;;  %p6150_p11 = por %p6149_p9, %p6148_p2 }
  0xff   : > { %p6151_p7 = pnand %p6150_p11, %p6144_p8 }
 0x101   : > { %6154 = shalt.err (!%p6151_p7)
}
 0x102   : > { %p7821_p13 = scmp.ne.s32.totalorder %s7803_s28, 0  ;;  %s7822_s5 = smov 4  }
 0x103   : > { %s7823_s24 = smov 64   ;;  %p7824_p6 = scmp.ne.s32.totalorder %s7801_s17, 0 }
 0x104   : > { %5690 = dma.hbm_to_vmem [thread:$0]  (!%p7821_p13), %s6616_s13, 2048, %s6640_s30, %s6450_s9, %s7823_s24, %s7823_s24, %s7822_s5  }
 0x105   : > { %652 = sbr.rel (%p7824_p6) target bundleno = 2942 (0xb7e), region = 84  ;;  %p7825_p5 = scmp.eq.s32.totalorder (!%p7824_p6), %s6362_s25, 0 }
 0x10c   : > { %6198 = dma.done.wait (%p7825_p5), [#allocation4], 256   ;;  %p7826_p0 = pmov %p7825_p5 }
 0x10e   : > { %6200 = vsyncadd (%p7826_p0), [#allocation4], 4294967040  ;;  %p7827_p1 = pmov %p7826_p0 }
 0x10f   : > { %p7828_p3 = pmov %p7826_p0 }
 0x110   : > { %6202 = dma.done.wait (%p7827_p1), [#allocation7], 128  }
 0x111   : > { %6204 = vsyncadd (%p7828_p3), [#allocation7], 4294967168  ;;  %s662_s28 = sand.u32 1, %s6362_s25   ;;  %s6679_s9 = sand.u32 1, %s6219_s22  }
 0x112   : > { %s663_s17 = scalar_lea.sflag [#allocation4], %s662_s28  ;;  %p7829_p10 = scmp.ne.s32.totalorder %s7800_s0, 0 }
 0x114   : > { %6206 = dma.done.wait (%p7829_p10), %s663_s17, 8224  }
 0x115   : > { %6208 = vsyncadd (%p7829_p10), %s663_s17, 4294959072  ;;  %s5639_s13 = smul.u32 192, %s6679_s9  ;;  %s5156_s3 = sshll.u32 %s6679_s9, 6 }
 0x116   : > { %s5157_s4 = sshll.u32 %s6679_s9, 7  ;;  %p796_p12 = scmp.lt.s32.totalorder %s6362_s25, 3 }
 0x117   : > { %s7830_s8 = sld [smem:[#allocation29_spill]]  ;;  %s7831_s14 = sld [smem:[#allocation30_spill]] }
 0x118   : > { %s6691_s18 = scalar_select %p796_p12, %s6362_s25, 3 }
 0x119   : > { %s7832_s24 = sld [smem:[#allocation27_spill]]  ;;  %s7833_s6 = sld [smem:[#allocation32_spill]] }
 0x11a   : > { %s5640_s0 = smul.u32 3, %s6691_s18  ;;  %s5159_s17 = sshll.u32 %s6691_s18, 1 }
 0x11b   : > { %s7834_s21 = sld [smem:[#allocation33_spill]]  ;;  %s673_s11 = scalar_lea.vmem [#allocation9], %s6679_s9 }
 0x11c   : > { %s6724_s29 = scalar_lea.vmem [#allocation11], %s5156_s3  ;;  %s6726_s27 = scalar_lea.vmem [#allocation12], %s5157_s4 }
 0x11d   : > { %s805_s16 = scalar_lea.vmem %s7830_s8, %s6691_s18  ;;  %s808_s15 = scalar_lea.vmem %s7831_s14, %s6691_s18 }
 0x11e   : > { %s6722_s8 = scalar_lea.vmem [#allocation10], %s5639_s13  ;;  %s6728_s14 = scalar_lea.vmem [#allocation13], %s5157_s4 }
 0x11f   : > { %s6709_s28 = scalar_lea.vmem %s7832_s24, %s5640_s0  ;;  %s6715_s10 = scalar_lea.vmem %s7833_s6, %s5159_s17 }
 0x120   : > { %p7835_p4 = scmp.ne.s32.totalorder %s6362_s25, 0 }
 0x121   : > { %s815_s20 = scalar_lea.vmem %s7834_s21, %s6691_s18  ;;  %v821_v0 = vld [vmem:[#allocation3] sm:$0xff] (!%p7835_p4)  ;;  %v823_v1 = vld [vmem:[#allocation6] sm:$0xff] (!%p7835_p4)  ;;  %v822_v2 = vld [vmem:[#allocation3 + $0x8] sm:$0xff] (!%p7835_p4) }
 0x122   : > { %820 = sbr.rel (%p7835_p4) target bundleno = 297 (0x129), region = 120  ;;  %v824_v3 = vadd.f32 (!%p7835_p4), %v823_v1, %v821_v0  ;;  %v825_v4 = vadd.f32 (!%p7835_p4), %v823_v1, %v822_v2 }
 0x124   : > { %826 = vst [vmem:[#allocation2] sm:$0xff] (!%p7835_p4), %v824_v3  ;;  %827 = vst [vmem:[#allocation2 + $0x8] sm:$0xff] (!%p7835_p4), %v825_v4 }
 0x129 PF: > { %v5753_v9 = vld [vmem:[%s6722_s8 + $0x4] ss:$12 sps:$4 sm:$0xff]   ;;  %v5755_v10 = vld [vmem:[%s6722_s8] ss:$12 sps:$4 sm:$0xff]   ;;  %v5756_v11 = vld [vmem:[%s6722_s8 + $0x8] ss:$12 sps:$4 sm:$0xff]   ;;  %v912_v0 = vlaneseq  ;;  %s7837_s5 = scalar_lea.vmem %s7750_s7, %s6691_s18 }
 0x12a   : > { %1055 = vmatprep.subr.bf16.mxu0 %v5753_v9  ;;  %v6243_v12 = vmov 0.0   ;;  %v5757_v13 = vld [vmem:[%s6722_s8 + $0x1c] ss:$12 sps:$4 sm:$0xff]   ;;  %v5759_v14 = vld [vmem:[%s6722_s8 + $0x18] ss:$12 sps:$4 sm:$0xff]   ;;  %v6244_v31 = vmov 0  }
 0x12b   : > { %v6732_v5 = vld [vmem:[#allocation2] sm:$0xff]  ;;  %v6734_v6 = vld [vmem:[#allocation2 + $0x8] sm:$0xff]  ;;  %5405 = vmatprep.subr.bf16.mxu1 %v6243_v12  ;;  %1056 = vmatpush1.bf16.msra.mxu0 %v5755_v10  ;;  %v5769_v22 = vld [vmem:[%s6722_s8 + $0x64] ss:$12 sps:$4 sm:$0xff]   ;;  %vm6245_vm0 = vmmov 0   ;;  %s7836_s1 = scalar_lea.vmem [#allocation8], %s6679_s9 }
 0x12c   : > { %832 = vadd.xlane.f32.xlu0 %v6732_v5  ;;  %v839_v7 = vmul.f32 %v6732_v5, %v6732_v5  ;;  %v840_v8 = vmul.f32 %v6734_v6, %v6734_v6  ;;  %5406 = vmatpush3.bf16.msra.mxu1 %v5756_v11  ;;  %v5760_v15 = vld [vmem:[%s6722_s8 + $0x20] ss:$12 sps:$4 sm:$0xff]   ;;  %v5763_v17 = vld [vmem:[%s6722_s8 + $0x30] ss:$12 sps:$4 sm:$0xff]   ;;  %v5764_v18 = vld [vmem:[%s6722_s8 + $0x38] ss:$12 sps:$4 sm:$0xff]  }
 0x12d   : > { %5407 = vmatprep.subr.bf16.mxu1 %v6243_v12  ;;  %1057 = vmatprep.subr.bf16.mxu0 %v5757_v13  ;;  %v5761_v16 = vld [vmem:[%s6722_s8 + $0x34] ss:$12 sps:$4 sm:$0xff]   ;;  %v5765_v19 = vld [vmem:[%s6722_s8 + $0x4c] ss:$12 sps:$4 sm:$0xff]   ;;  %v5768_v21 = vld [vmem:[%s6722_s8 + $0x50] ss:$12 sps:$4 sm:$0xff]  }
 0x12e   : > { %841 = vadd.xlane.f32.xlu1 %v839_v7  ;;  %v5767_v20 = vld [vmem:[%s6722_s8 + $0x48] ss:$12 sps:$4 sm:$0xff]   ;;  %v5771_v23 = vld [vmem:[%s6722_s8 + $0x60] ss:$12 sps:$4 sm:$0xff]   ;;  %v5775_v26 = vld [vmem:[%s6722_s8 + $0x78] ss:$12 sps:$4 sm:$0xff]   ;;  %1087 = vmatprep.mubr.bf16.mxu0 %v6244_v31 }
 0x12f   : > { %1058 = vmatpush1.bf16.msra.mxu0 %v5759_v14  ;;  %v5772_v24 = vld [vmem:[%s6722_s8 + $0x68] ss:$12 sps:$4 sm:$0xff]   ;;  %v5776_v27 = vld [vmem:[%s6722_s8 + $0x80] ss:$12 sps:$4 sm:$0xff]   ;;  %v5779_v29 = vld [vmem:[%s6722_s8 + $0x90] ss:$12 sps:$4 sm:$0xff]   ;;  %5421 = vmatprep.mubr.msk.bf16.mxu1 %vm6245_vm0, %v6243_v12 }
 0x130   : > { %834 = vadd.xlane.f32.xlu0 %v6734_v6  ;;  %5408 = vmatpush3.bf16.msra.mxu1 %v5760_v15  ;;  %v5773_v25 = vld [vmem:[%s6722_s8 + $0x7c] ss:$12 sps:$4 sm:$0xff]   ;;  %v5777_v28 = vld [vmem:[%s6722_s8 + $0x94] ss:$12 sps:$4 sm:$0xff]   ;;  %v5780_v30 = vld [vmem:[%s6722_s8 + $0x98] ss:$12 sps:$4 sm:$0xff]  }
 0x131   : > { %5409 = vmatprep.subr.bf16.mxu1 %v6243_v12  ;;  %1059 = vmatprep.subr.bf16.mxu0 %v5761_v16  ;;  %v5781_v32 = vld [vmem:[%s6722_s8 + $0xac] ss:$12 sps:$4 sm:$0xff]   ;;  %v5783_v33 = vld [vmem:[%s6722_s8 + $0xa8] ss:$12 sps:$4 sm:$0xff]   ;;  %v5784_v34 = vld [vmem:[%s6722_s8 + $0xb0] ss:$12 sps:$4 sm:$0xff]  }
 0x132   : > { %843 = vadd.xlane.f32.xlu1 %v840_v8  ;;  %v5161_v54 = vld [vmem:[%s7836_s1] ss:$0 sm:$0xff]  ;;  %v6789_v1 = vshrl.u32 %v912_v0, 7  ;;  %s6246_s6 = smov 96   ;;  %s6247_s9 = smov 112   ;;  %vm2243_vm1 = vcmask 130048  }
 0x133   : > { %1060 = vmatpush1.bf16.msra.mxu0 %v5763_v17  ;;  %v5162_v59 = vld [vmem:[%s673_s11] ss:$0 sm:$0xff]  ;;  %s6248_s19 = smov 80   ;;  %s6249_s13 = smov 48   ;;  %vm2980_vm2 = vcmask 64512   ;;  %vm3176_vm3 = vcmask 1043456  }
 0x134   : > { %5410 = vmatpush3.bf16.msra.mxu1 %v5764_v18  ;;  %1061 = vmatprep.subr.bf16.mxu0 %v5765_v19  ;;  %v914_v2 = vsub.s32 0, %v6789_v1  ;;  %v922_v3 = vsub.s32 2, %v6789_v1  ;;  %v910_v4 = vld [vmem:[%s6709_s28] sm:$0x7]  ;;  %s6250_s3 = smov 16   ;;  %s6251_s4 = smov 64  }
 0x135   : > { %5411 = vmatprep.subr.bf16.mxu1 %v6243_v12  ;;  %s6252_s0 = smov 32   ;;  %vm4303_vm4 = vcmask 261120   ;;  %vm4306_vm5 = vcmask 392192   ;;  %vm4309_vm6 = vcmask 523264   ;;  %vm4312_vm7 = vcmask 654336   ;;  %p5291_p8 = scmp.ne.s32.totalorder %s6362_s25, 3 }
 0x136   : > { %v923_v7 = vrot.slane %v910_v4, %v922_v3  ;;  %vm4315_vm8 = vcmask 785408   ;;  %vm4318_vm9 = vcmask 916480   ;;  %s7841_s8 = sld [smem:[#allocation34_spill]] (!%p5291_p8) }
 0x137   : > { %1062 = vmatpush1.bf16.msra.mxu0 %v5767_v20 }
 0x138   : > { %5412 = vmatpush3.bf16.msra.mxu1 %v5768_v21  ;;  %1063 = vmatprep.subr.bf16.mxu0 %v5769_v22 }
 0x139   : > { %5413 = vmatprep.subr.bf16.mxu1 %v6243_v12 }
 0x13b   : > { %1064 = vmatpush1.bf16.msra.mxu0 %v5771_v23 }
 0x13c   : > { %5414 = vmatpush3.bf16.msra.mxu1 %v5772_v24  ;;  %1065 = vmatprep.subr.bf16.mxu0 %v5773_v25 }
 0x13d   : > { %5415 = vmatprep.subr.bf16.mxu1 %v6243_v12 }
 0x13f   : > { %1066 = vmatpush1.bf16.msra.mxu0 %v5775_v26 }
 0x140   : > { %5416 = vmatpush3.bf16.msra.mxu1 %v5776_v27  ;;  %1067 = vmatprep.subr.bf16.mxu0 %v5777_v28 }
 0x141   : > { %5417 = vmatprep.subr.bf16.mxu1 %v6243_v12 }
 0x143   : > { %1068 = vmatpush1.bf16.msra.mxu0 %v5779_v29 }
 0x144   : > { %5418 = vmatpush3.bf16.msra.mxu1 %v5780_v30  ;;  %1069 = vmatprep.subr.bf16.mxu0 %v5781_v32 }
 0x145   : > { %5419 = vmatprep.subr.bf16.mxu1 %v6243_v12 }
 0x147   : > { %1070 = vmatpush1.bf16.msra.mxu0 %v5783_v33 }
 0x148   : > { %5420 = vmatpush3.bf16.msra.mxu1 %v5784_v34  ;;  %5449 = vmatprep.subr.bf16.mxu0 %v6243_v12 }
 0x149   : > { %5425 = vmatprep.subr.bf16.mxu1 %v6243_v12 }
 0x1b9   : > { %v833_v35 = vpop.xlane.xlu0 %832 }
 0x1ba   : > { %v837_v36 = vmul.f32 0.0078125, %v833_v35  ;;  %v6253_v35 = vmov 1983009808  }
 0x1bb   : > { %v842_v37 = vpop.xlane.xlu1 %841 }
 0x1bc   : > { %v847_v38 = vmul.f32 %v837_v36, %v837_v36  ;;  %v845_v39 = vmul.f32 0.0078125, %v842_v37  ;;  %v853_v51 = vsub.f32 %v6732_v5, %v837_v36  ;;  %v918_v5 = vsub.s32 1, %v6789_v1 }
 0x1bd   : > { %v835_v40 = vpop.xlane.xlu0 %834  ;;  %v1286_v36 = vunpack.c.l.s4 %v6253_v35 }
 0x1be   : > { %v849_v41 = vsub.f32 %v845_v39, %v847_v38  ;;  %v838_v42 = vmul.f32 0.0078125, %v835_v40  ;;  %v919_v10 = vrot.slane %v910_v4, %v918_v5 }
 0x1bf   : > { %v844_v43 = vpop.xlane.xlu1 %843 }
 0x1c0   : > { %v851_v44 = vmax.f32 %v849_v41, 0.0  ;;  %v848_v45 = vmul.f32 %v838_v42, %v838_v42  ;;  %v846_v46 = vmul.f32 0.0078125, %v844_v43  ;;  %v854_v55 = vsub.f32 %v6734_v6, %v838_v42 }
 0x1c1   : > { %v915_v6 = vrot.slane %v910_v4, %v914_v2  ;;  %v1287_v42 = vunpack.c.0.s8 %v1286_v36  ;;  %v6254_v43 = vmov 1934713408  }
 0x1c2   : > { %v855_v47 = vadd.f32 1e-06, %v851_v44  ;;  %v850_v48 = vsub.f32 %v846_v46, %v848_v45  ;;  %v1350_v44 = vunpack.c.l.s4 %v6254_v43 }
 0x1c4   : > { %5833 = vrsqrt.f32 %v855_v47  ;;  %v852_v49 = vmax.f32 %v850_v48, 0.0 }
 0x1c6   : > { %v856_v50 = vadd.f32 1e-06, %v852_v49 }
 0x1c8   : > { %5835 = vrsqrt.f32 %v856_v50 }
 0x1ce   : > { %v5834_v52 = vpop.eup %5833 }
 0x1cf   : > { %v859_v53 = vmul.f32 %v5834_v52, %v853_v51 }
 0x1d1   : > { %v867_v58 = vmul.f32 %v5161_v54, %v859_v53 }
 0x1d2   : > { %v5836_v56 = vpop.eup %5835 }
 0x1d3   : > { %v860_v57 = vmul.f32 %v5836_v56, %v854_v55  ;;  %v875_v61 = vadd.f32 %v5162_v59, %v867_v58 }
 0x1d5   : > { %v868_v60 = vmul.f32 %v5161_v54, %v860_v57 }
 0x1d7   : > { %v876_v62 = vadd.f32 %v5162_v59, %v868_v60  ;;  %v6835_v60 = vsub.s32 %v1287_v42, %v6789_v1 }
 0x1d9   : > { %v877_v63 = vpack.c.bf16 %v876_v62, %v875_v61 }
 0x1db   : > { %1088 = vmatmul.mubr.bf16.vlgmr.msra.gmra.mrb[0].mxu0 %v877_v63  ;;  %5422 = vmatmul.mubr.bf16.vlgmr.msra.gmra.mrb[0].mxu1 %v877_v63  ;;  %v1351_v63 = vunpack.c.0.s8 %v1350_v44 }
 0x1dc   : > { %5427 = vmatprep.mubr.msk.bf16.mxu1 %vm6245_vm0, %v6243_v12  ;;  %5451 = vmatprep.mubr.msk.bf16.mxu0 %vm6245_vm0, %v6243_v12 }
 0x2ae   : > { %v1089_v8 = vpop.f32.mrb[0].mxu0  ;;  %v1132_v9 = vpop.f32.mrb[0].mxu1 }
 0x2af   : > { %v1091_v11 = vpop.f32.mrb[1].mxu0  ;;  %v5423_v13 = vpop.f32.mrb[1].mxu1  ;;  %v1090_v16 = vadd.f32 %v1089_v8, %v915_v6  ;;  %v1133_v17 = vadd.f32 %v1132_v9, %v923_v7 }
 0x2b0   : > { %v1093_v14 = vpop.f32.mrb[2].mxu0  ;;  %v1135_v15 = vpop.f32.mrb[2].mxu1  ;;  %v1092_v22 = vadd.f32 %v1091_v11, %v919_v10  ;;  %v6842_v13 = vsub.s32 %v1351_v63, %v6789_v1 }
 0x2b1   : > { %v1094_v18 = vadd.f32 %v1093_v14, %v915_v6  ;;  %v1136_v19 = vadd.f32 %v1135_v15, %v923_v7  ;;  %v1095_v20 = vpop.f32.mrb[3].mxu0  ;;  %v5424_v21 = vpop.f32.mrb[3].mxu1 }
 0x2b2   : > { %v1096_v23 = vadd.f32 %v1095_v20, %v919_v10 }
 0x2b3   : > { %v6799_v24 = vpack.c.bf16 %v1094_v18, %v1090_v16  ;;  %v6801_v25 = vpack.c.bf16 %v1136_v19, %v1133_v17 }
 0x2b4   : > { %v1140_v26 = vpack.c.bf16 %v1096_v23, %v1092_v22 }
 0x2b5   : > { %1145 = vrot.lane.b32.xlu0 %v6799_v24, %s6246_s6  ;;  %1143 = vrot.lane.b32.xlu1 %v6799_v24, %s6247_s9  ;;  %v1191_v14 = vshrl.u32 %v6799_v24, 16 }
 0x2b6   : > { %v1223_v47 = vshrl.u32 %v1140_v26, 16 }
 0x2b9   : > { %1158 = vrot.lane.b32.xlu0 %v1140_v26, %s6247_s9  ;;  %1147 = vrot.lane.b32.xlu1 %v6799_v24, %s6248_s19 }
 0x2bd   : > { %1166 = vrot.lane.b32.xlu0 %v1140_v26, %s6249_s13  ;;  %1160 = vrot.lane.b32.xlu1 %v1140_v26, %s6246_s6 }
 0x2c1   : > { %1170 = vrot.lane.b32.xlu0 %v1140_v26, %s6250_s3  ;;  %1162 = vrot.lane.b32.xlu1 %v1140_v26, %s6248_s19 }
 0x2c5   : > { %1149 = vrot.lane.b32.xlu0 %v6799_v24, %s6251_s4  ;;  %1164 = vrot.lane.b32.xlu1 %v1140_v26, %s6251_s4 }
 0x2c9   : > { %1153 = vrot.lane.b32.xlu0 %v6799_v24, %s6252_s0  ;;  %1168 = vrot.lane.b32.xlu1 %v1140_v26, %s6252_s0 }
 0x2cd   : > { %1173 = vrot.lane.b32.xlu0 %v6801_v25, %s6247_s9  ;;  %1151 = vrot.lane.b32.xlu1 %v6799_v24, %s6249_s13 }
 0x2d1   : > { %1155 = vrot.lane.b32.xlu1 %v6799_v24, %s6250_s3 }
 0x2d5   : > { %1175 = vrot.lane.b32.xlu1 %v6801_v25, %s6246_s6 }
 0x2d9   : > { %1177 = vrot.lane.b32.xlu1 %v6801_v25, %s6248_s19 }
 0x327   : > { %v1144_v27 = vpop.permute.xlu1 %1143  ;;  %v6830_v28 = vpop.permute.xlu0 %1145 }
 0x328   : > { %v1192_v7 = vshrl.u32 %v1144_v27, 16  ;;  %v1199_v21 = vshrl.u32 %v6830_v28, 16  ;;  %v6847_v22 = vpack.i.b16 %v1144_v27, %v6799_v24 }
 0x32b   : > { %v6832_v29 = vpop.permute.xlu1 %1147  ;;  %v1159_v30 = vpop.permute.xlu0 %1158 }
 0x32c   : > { %v1224_v39 = vshrl.u32 %v1159_v30, 16  ;;  %v1221_v55 = vpack.i.b16 %v1159_v30, %v1140_v26  ;;  %v6851_v30 = vpack.i.b16 %v1192_v7, %v1191_v14 }
 0x32e   : > { %v1225_v56 = vpack.i.b16 %v1224_v39, %v1223_v47 }
 0x32f   : > { %v1161_v32 = vpop.permute.xlu1 %1160  ;;  %v1167_v34 = vpop.permute.xlu0 %1166 }
 0x330   : > { %v1240_v40 = vshrl.u32 %v1167_v34, 16  ;;  %v1231_v48 = vshrl.u32 %v1161_v32, 16 }
 0x333   : > { %v1163_v33 = vpop.permute.xlu1 %1162  ;;  %v1171_v41 = vpop.permute.xlu0 %1170 }
 0x334   : > { %v1232_v45 = vshrl.u32 %v1163_v33, 16  ;;  %v1248_v51 = vshrl.u32 %v1171_v41, 16  ;;  %v1229_v52 = vpack.i.b16 %v1163_v33, %v1161_v32  ;;  %v1200_v32 = vshrl.u32 %v6832_v29, 16 }
 0x336   : > { %v1233_v57 = vpack.i.b16 %v1232_v45, %v1231_v48 }
 0x337   : > { %v1165_v37 = vpop.permute.xlu1 %1164  ;;  %v1150_v3 = vpop.permute.xlu0 %1149 }
 0x338   : > { %v1239_v38 = vshrl.u32 %v1165_v37, 16  ;;  %v1237_v49 = vpack.i.b16 %v1167_v34, %v1165_v37  ;;  %v1207_v23 = vshrl.u32 %v1150_v3, 16  ;;  %v6857_v37 = vpack.i.b16 %v6832_v29, %v6830_v28 }
 0x339   : > { %v1201_v29 = vpack.i.b16 %v1200_v32, %v1199_v21 }
 0x33a   : > { %v1241_v50 = vpack.i.b16 %v1240_v40, %v1239_v38  ;;  %v1315_v61 = vcombine.low %v1221_v55, %v1237_v49  ;;  %v1316_v15 = vcombine.high %v1221_v55, %v1237_v49 }
 0x33b   : > { %v1169_v46 = vpop.permute.xlu1 %1168  ;;  %v1154_v33 = vpop.permute.xlu0 %1153 }
 0x33c   : > { %v1245_v53 = vpack.i.b16 %v1171_v41, %v1169_v46  ;;  %v1247_v54 = vshrl.u32 %v1169_v46, 16  ;;  %v1451_v62 = vcombine.low %v1225_v56, %v1241_v50  ;;  %v1323_v8 = vrot.slane %v1315_v61, %v6835_v60 }
 0x33d   : > { %v1330_v38 = vrot.slane %v1316_v15, %v6835_v60  ;;  %v1452_v24 = vcombine.high %v1225_v56, %v1241_v50  ;;  %v1215_v43 = vshrl.u32 %v1154_v33, 16 }
 0x33e   : > { %v1249_v58 = vpack.i.b16 %v1248_v51, %v1247_v54  ;;  %v1331_v59 = vcombine.low %v1229_v52, %v1245_v53  ;;  %v1459_v9 = vrot.slane %v1451_v62, %v6835_v60  ;;  %v1332_v10 = vcombine.high %v1229_v52, %v1245_v53 }
 0x33f   : > { %v1152_v6 = vpop.permute.xlu1 %1151  ;;  %v1466_v49 = vrot.slane %v1452_v24, %v6835_v60 }
 0x340   : > { %v1467_v0 = vcombine.low %v1233_v57, %v1249_v58  ;;  %v1339_v4 = vrot.slane %v1331_v59, %v6835_v60  ;;  %v1208_v16 = vshrl.u32 %v1152_v6, 16  ;;  %v6849_v26 = vpack.i.b16 %v1152_v6, %v1150_v3 }
 0x341   : > { %v1346_v34 = vrot.slane %v1332_v10, %v6835_v60  ;;  %v1468_v35 = vcombine.high %v1233_v57, %v1249_v58 }
 0x342   : > { %v1475_v11 = vrot.slane %v1467_v0, %v6835_v60  ;;  %v1379_v17 = vcombine.low %v1323_v8, %v1339_v4  ;;  %v1380_v18 = vcombine.high %v1323_v8, %v1339_v4  ;;  %v6860_v27 = vpack.i.b16 %v1208_v16, %v1207_v23 }
 0x343   : > { %v1156_v36 = vpop.permute.xlu1 %1155  ;;  %v1283_v44 = vcombine.low %v6847_v22, %v6849_v26  ;;  %v1395_v46 = vcombine.low %v1330_v38, %v1346_v34  ;;  %v1396_v47 = vcombine.high %v1330_v38, %v1346_v34  ;;  %v1482_v48 = vrot.slane %v1468_v35, %v6835_v60 }
 0x344   : > { %v1515_v19 = vcombine.low %v1459_v9, %v1475_v11  ;;  %v1516_v20 = vcombine.high %v1459_v9, %v1475_v11  ;;  %v1387_v39 = vrot.slane %v1379_v17, %v6842_v13  ;;  %v1394_v40 = vrot.slane %v1380_v18, %v6842_v13 }
 0x345   : > { %v6868_v45 = vpack.i.b16 %v1156_v36, %v1154_v33  ;;  %v1216_v28 = vshrl.u32 %v1156_v36, 16  ;;  %v1419_v50 = vcombine.low %v6851_v30, %v6860_v27  ;;  %v1291_v57 = vrot.slane %v1283_v44, %v6835_v60 }
 0x346   : > { %v1523_v41 = vrot.slane %v1515_v19, %v6842_v13  ;;  %v1530_v42 = vrot.slane %v1516_v20, %v6842_v13  ;;  %v5188_v53 = vcombine.low %v1387_v39, %v1394_v40  ;;  %v5190_v54 = vcombine.high %v1387_v39, %v1394_v40 }
 0x347   : > { %v1217_v51 = vpack.i.b16 %v1216_v28, %v1215_v43  ;;  %v1299_v52 = vcombine.low %v6857_v37, %v6868_v45  ;;  %v6879_v61 = vrot.slane %v1395_v46, %v6842_v13  ;;  %v6882_v62 = vrot.slane %v1396_v47, %v6842_v13 }
 0x348   : > { %v5192_v55 = vcombine.low %v1523_v41, %v1530_v42  ;;  %v5194_v56 = vcombine.high %v1523_v41, %v1530_v42  ;;  %v1531_v63 = vcombine.low %v1466_v49, %v1482_v48  ;;  %v1532_v0 = vcombine.high %v1466_v49, %v1482_v48 }
 0x349   : > { %v1307_v58 = vrot.slane %v1299_v52, %v6835_v60  ;;  %v1435_v59 = vcombine.low %v1201_v29, %v1217_v51  ;;  %v1427_v3 = vrot.slane %v1419_v50, %v6835_v60  ;;  %v1706_v8 = vrot.slane %v5188_v53, %v6835_v60 }
 0x34a   : > { %v1722_v9 = vrot.slane %v5190_v54, %v6835_v60  ;;  %v1774_v10 = vrot.slane %v5192_v55, %v6835_v60  ;;  %v1790_v11 = vrot.slane %v5194_v56, %v6835_v60  ;;  %v1284_v18 = vcombine.high %v6847_v22, %v6849_v26 }
 0x34b   : > { %v1347_v4 = vcombine.low %v1291_v57, %v1307_v58  ;;  %v1348_v6 = vcombine.high %v1291_v57, %v1307_v58  ;;  %v1443_v7 = vrot.slane %v1435_v59, %v6835_v60  ;;  %v1539_v32 = vrot.slane %v1531_v63, %v6842_v13 }
 0x34c   : > { %v1546_v33 = vrot.slane %v1532_v0, %v6842_v13  ;;  %v5198_v34 = vcombine.low %v6879_v61, %v6882_v62  ;;  %v1436_v35 = vcombine.high %v1201_v29, %v1217_v51  ;;  %v1739_v24 = vcombine.low %v1706_v8, %v1722_v9 }
 0x34d   : > { %v1355_v14 = vrot.slane %v1347_v4, %v6842_v13  ;;  %v1362_v15 = vrot.slane %v1348_v6, %v6842_v13  ;;  %v1483_v16 = vcombine.low %v1427_v3, %v1443_v7  ;;  %v1484_v17 = vcombine.high %v1427_v3, %v1443_v7 }
 0x34e   : > { %v1807_v39 = vcombine.low %v1774_v10, %v1790_v11  ;;  %v1420_v22 = vcombine.high %v6851_v30, %v6860_v27  ;;  %v1300_v26 = vcombine.high %v6857_v37, %v6868_v45  ;;  %v1740_v44 = vcombine.high %v1706_v8, %v1722_v9 }
 0x34f   : > { %v1491_v19 = vrot.slane %v1483_v16, %v6842_v13  ;;  %v1498_v20 = vrot.slane %v1484_v17, %v6842_v13  ;;  %v5187_v21 = vcombine.low %v1355_v14, %v1362_v15  ;;  %v5189_v23 = vcombine.high %v1355_v14, %v1362_v15 }
 0x350   : > { %v6909_v28 = vrot.slane %v5198_v34, %v6835_v60  ;;  %v5200_v29 = vcombine.high %v6879_v61, %v6882_v62  ;;  %v1298_v30 = vrot.slane %v1284_v18, %v6835_v60  ;;  %v1450_v37 = vrot.slane %v1436_v35, %v6835_v60 }
 0x351   : > { %v5191_v36 = vcombine.low %v1491_v19, %v1498_v20  ;;  %v5193_v38 = vcombine.high %v1491_v19, %v1498_v20  ;;  %v1699_v40 = vrot.slane %v5187_v21, %v6835_v60  ;;  %v1715_v41 = vrot.slane %v5189_v23, %v6835_v60 }
 0x352   : > { %v1747_v45 = vrot.slane %v1739_v24, %v6842_v13  ;;  %v1815_v46 = vrot.slane %v1807_v39, %v6842_v13  ;;  %v1808_v47 = vcombine.high %v1774_v10, %v1790_v11  ;;  %v5202_v48 = vcombine.low %v1539_v32, %v1546_v33 }
 0x353   : > { %v1767_v42 = vrot.slane %v5191_v36, %v6835_v60  ;;  %v1783_v43 = vrot.slane %v5193_v38, %v6835_v60  ;;  %v1434_v49 = vrot.slane %v1420_v22, %v6835_v60  ;;  %v1314_v50 = vrot.slane %v1300_v26, %v6835_v60 }
 0x354   : > { %v1723_v51 = vcombine.low %v1699_v40, %v1715_v41  ;;  %v2125_v53 = vpack.i.b16 %v1815_v46, %v1747_v45  ;;  %v6920_v54 = vrot.slane %v1740_v44, %v6842_v13  ;;  %v6923_v55 = vrot.slane %v1808_v47, %v6842_v13 }
 0x355   : > { %v1791_v27 = vcombine.low %v1767_v42, %v1783_v43  ;;  %v1792_v52 = vcombine.high %v1767_v42, %v1783_v43  ;;  %v5204_v56 = vcombine.high %v1539_v32, %v1546_v33  ;;  %v1499_v57 = vcombine.low %v1434_v49, %v1450_v37 }
 0x356   : > { %v1500_v58 = vcombine.high %v1434_v49, %v1450_v37  ;;  %v1724_v59 = vcombine.high %v1699_v40, %v1715_v41  ;;  %v2248_v61 = vsel %vm2243_vm1, %v2125_v53, 0  ;;  %v2137_v62 = vpack.i.b16 %v6923_v55, %v6920_v54 }
 0x357   : > { %v6929_v63 = vrot.slane %v1791_v27, %v6842_v13  ;;  %v2127_v0 = vshrl.u32 %v1815_v46, 16  ;;  %v1363_v3 = vcombine.low %v1298_v30, %v1314_v50  ;;  %v1364_v4 = vcombine.high %v1298_v30, %v1314_v50  ;;  %5426 = vmatpush3.bf16.xpose.msra.mxu1 %v2248_v61 }
 0x358   : > { %v6932_v6 = vrot.slane %v1723_v51, %v6842_v13  ;;  %v2126_v7 = vshrl.u32 %v1747_v45, 16  ;;  %v2432_v8 = vsel %vm2243_vm1, %v2137_v62, 0  ;;  %5431 = vmatprep.subr.bf16.mxu1 %v6243_v12  ;;  %v6937_v9 = vrot.slane %v1792_v52, %v6842_v13 }
 0x359   : > { %v6941_v10 = vcombine.high %v6923_v55, %v6244_v31  ;;  %v6944_v11 = vrot.slane %v5202_v48, %v6835_v60  ;;  %v6947_v14 = vrot.slane %v5200_v29, %v6835_v60  ;;  %v1507_v15 = vrot.slane %v1499_v57, %v6842_v13  ;;  %5450 = vmatpush3.bf16.xpose.msra.mxu0 %v2432_v8 }
 0x35a   : > { %v1514_v16 = vrot.slane %v1500_v58, %v6842_v13  ;;  %v6952_v17 = vrot.slane %v1724_v59, %v6842_v13  ;;  %v2101_v18 = vpack.i.b16 %v6929_v63, %v6932_v6  ;;  %5461 = vmatprep.subr.bf16.mxu0 %v6243_v12  ;;  %v2128_v19 = vpack.i.b16 %v2127_v0, %v2126_v7 }
 0x35b   : > { %v6959_v20 = vcombine.high %v6920_v54, %v6244_v31  ;;  %v6962_v21 = vrot.slane %v5204_v56, %v6835_v60  ;;  %v1371_v23 = vrot.slane %v1363_v3, %v6842_v13  ;;  %v1378_v32 = vrot.slane %v1364_v4, %v6842_v13 }
 0x35c   : > { %v2113_v33 = vpack.i.b16 %v6937_v9, %v6952_v17  ;;  %v5201_v36 = vcombine.low %v1507_v15, %v1514_v16  ;;  %v5203_v38 = vcombine.high %v1507_v15, %v1514_v16  ;;  %v2294_v24 = vsel %vm2243_vm1, %v2128_v19, 0 }
 0x35d   : > { %v2143_v34 = vpack.i.b16 %v6941_v10, %v6959_v20  ;;  %v2011_v35 = vcombine.low %v6944_v11, %v6962_v21  ;;  %v1825_v39 = vcombine.high %v1815_v46, %v6244_v31  ;;  %v1943_v22 = vcombine.low %v6909_v28, %v6947_v14 }
 0x35e   : > { %5428 = vmatmul.mubr.msk.bf16.vlgmr.msra.gmra.mrb[4].mxu1 %vm2243_vm1, %v2101_v18  ;;  %v5197_v26 = vcombine.low %v1371_v23, %v1378_v32  ;;  %v5199_v40 = vcombine.high %v1371_v23, %v1378_v32  ;;  %v2103_v42 = vshrl.u32 %v6929_v63, 16  ;;  %v1757_v43 = vcombine.high %v1747_v45, %v6244_v31 }
 0x35f   : > { %5432 = vmatpush3.bf16.xpose.msra.mxu1 %v2294_v24  ;;  %5433 = vmatprep.mubr.msk.bf16.mxu1 %vm6245_vm0, %v6243_v12  ;;  %v2524_v41 = vsel %vm2243_vm1, %v2143_v34, 0  ;;  %v6985_v44 = vrot.slane %v2011_v35, %v6842_v13  ;;  %v6988_v29 = vrot.slane %v5201_v36, %v6835_v60  ;;  %v6991_v30 = vrot.slane %v5203_v38, %v6835_v60 }
 0x360   : > { %5452 = vmatmul.mubr.msk.bf16.vlgmr.msra.gmra.mrb[4].mxu0 %vm2243_vm1, %v2113_v33  ;;  %5437 = vmatprep.subr.bf16.mxu1 %v6243_v12  ;;  %v2102_v37 = vshrl.u32 %v6932_v6, 16  ;;  %v6998_v27 = vcombine.high %v6937_v9, %v6244_v31  ;;  %v2131_v45 = vpack.i.b16 %v1825_v39, %v1757_v43  ;;  %v7002_v46 = vrot.slane %v1943_v22, %v6842_v13 }
 0x361   : > { %5462 = vmatpush3.bf16.xpose.msra.mxu0 %v2524_v41  ;;  %5463 = vmatprep.mubr.msk.bf16.mxu0 %vm6245_vm0, %v6243_v12  ;;  %v7005_v47 = vrot.slane %v5197_v26, %v6835_v60  ;;  %v7008_v48 = vrot.slane %v5199_v40, %v6835_v60  ;;  %v7012_v50 = vcombine.high %v6952_v17, %v6244_v31  ;;  %v2133_v57 = vshrl.u32 %v1825_v39, 16 }
 0x362   : > { %5473 = vmatprep.subr.bf16.mxu0 %v6243_v12  ;;  %v2104_v49 = vpack.i.b16 %v2103_v42, %v2102_v37  ;;  %v2197_v51 = vpack.i.b16 %v6985_v44, %v7002_v46  ;;  %v1995_v52 = vcombine.low %v6988_v29, %v6991_v30  ;;  %v2340_v56 = vsel %vm2243_vm1, %v2131_v45, 0 }
 0x363   : > { %v2119_v53 = vpack.i.b16 %v6998_v27, %v7012_v50  ;;  %v1927_v58 = vcombine.low %v7005_v47, %v7008_v48  ;;  %v1823_v61 = vcombine.high %v6929_v63, %v6244_v31  ;;  %v2132_v62 = vshrl.u32 %v1757_v43, 16 }
 0x364   : > { %v2616_v59 = vsel %vm2243_vm1, %v2197_v51, 0  ;;  %v7033_v0 = vcombine.high %v6985_v44, %v6244_v31  ;;  %v1755_v3 = vcombine.high %v6932_v6, %v6244_v31  ;;  %v7040_v4 = vrot.slane %v1995_v52, %v6842_v13 }
 0x365   : > { %v2134_v63 = vpack.i.b16 %v2133_v57, %v2132_v62  ;;  %v7045_v7 = vcombine.high %v7002_v46, %v6244_v31  ;;  %v7048_v15 = vrot.slane %v1927_v58, %v6842_v13  ;;  %v2012_v6 = vcombine.high %v6944_v11, %v6962_v21 }
 0x366   : > { %5434 = vmatmul.mubr.msk.bf16.vlgmr.msra.gmra.mrb[8].mxu1 %vm2243_vm1, %v2104_v49  ;;  %v2107_v8 = vpack.i.b16 %v1823_v61, %v1755_v3  ;;  %v2139_v23 = vshrl.u32 %v6923_v55, 16  ;;  %v1944_v32 = vcombine.high %v6909_v28, %v6947_v14  ;;  %v2109_v21 = vshrl.u32 %v1823_v61, 16 }
 0x367   : > { %5438 = vmatpush3.bf16.xpose.msra.mxu1 %v2340_v56  ;;  %5439 = vmatprep.mubr.msk.bf16.mxu1 %vm6245_vm0, %v6243_v12  ;;  %v2203_v16 = vpack.i.b16 %v7033_v0, %v7045_v7  ;;  %v2173_v18 = vpack.i.b16 %v7040_v4, %v7048_v15  ;;  %v2386_v19 = vsel %vm2243_vm1, %v2134_v63, 0  ;;  %v2138_v33 = vshrl.u32 %v6920_v54, 16 }
 0x368   : > { %5464 = vmatmul.mubr.msk.bf16.vlgmr.msra.gmra.mrb[8].mxu0 %vm2243_vm1, %v2119_v53  ;;  %5443 = vmatprep.subr.bf16.mxu1 %v6243_v12  ;;  %v7068_v34 = vrot.slane %v2012_v6, %v6842_v13  ;;  %v2108_v28 = vshrl.u32 %v1755_v3, 16  ;;  %v7074_v55 = vcombine.high %v7040_v4, %v6244_v31  ;;  %v7078_v35 = vrot.slane %v1944_v32, %v6842_v13 }
 0x369   : > { %5474 = vmatpush3.bf16.xpose.msra.mxu0 %v2616_v59  ;;  %5475 = vmatprep.mubr.msk.bf16.mxu0 %vm6245_vm0, %v6243_v12  ;;  %v2708_v11 = vsel %vm2243_vm1, %v2203_v16, 0  ;;  %v2140_v14 = vpack.i.b16 %v2139_v23, %v2138_v33  ;;  %v7082_v54 = vcombine.high %v7048_v15, %v6244_v31  ;;  %v1996_v24 = vcombine.high %v6988_v29, %v6991_v30 }
 0x36a   : > { %5485 = vmatprep.subr.bf16.mxu0 %v6243_v12  ;;  %v2110_v36 = vpack.i.b16 %v2109_v21, %v2108_v28  ;;  %v2209_v38 = vpack.i.b16 %v7068_v34, %v7078_v35  ;;  %v2145_v26 = vshrl.u32 %v6941_v10, 16  ;;  %v1928_v40 = vcombine.high %v7005_v47, %v7008_v48 }
 0x36b   : > { %v2179_v39 = vpack.i.b16 %v7074_v55, %v7082_v54  ;;  %v2478_v22 = vsel %vm2243_vm1, %v2140_v14, 0  ;;  %v2115_v42 = vshrl.u32 %v6937_v9, 16  ;;  %v2144_v43 = vshrl.u32 %v6959_v20, 16 }
 0x36c   : > { %v2800_v41 = vsel %vm2243_vm1, %v2209_v38, 0  ;;  %v7104_v10 = vcombine.high %v7068_v34, %v6244_v31  ;;  %v2114_v29 = vshrl.u32 %v6952_v17, 16  ;;  %v2010_v30 = vrot.slane %v1996_v24, %v6842_v13 }
 0x36d   : > { %v2146_v37 = vpack.i.b16 %v2145_v26, %v2144_v43  ;;  %v1962_v9 = vcombine.high %v7078_v35, %v6244_v31  ;;  %v1942_v20 = vrot.slane %v1928_v40, %v6842_v13  ;;  %v2199_v17 = vshrl.u32 %v6985_v44, 16 }
 0x36e   : > { %5440 = vmatmul.mubr.msk.bf16.vlgmr.msra.gmra.mrb[12].mxu1 %vm2243_vm1, %v2107_v8  ;;  %v2116_v45 = vpack.i.b16 %v2115_v42, %v2114_v29  ;;  %v2121_v52 = vshrl.u32 %v6998_v27, 16  ;;  %v2198_v53 = vshrl.u32 %v7002_v46, 16  ;;  %v2120_v44 = vshrl.u32 %v7012_v50, 16 }
 0x36f   : > { %5444 = vmatpush3.bf16.xpose.msra.mxu1 %v2386_v19  ;;  %5445 = vmatprep.mubr.msk.bf16.mxu1 %vm6245_vm0, %v6243_v12  ;;  %v2215_v47 = vpack.i.b16 %v7104_v10, %v1962_v9  ;;  %v2185_v48 = vpack.i.b16 %v2010_v30, %v1942_v20  ;;  %v2570_v49 = vsel %vm2243_vm1, %v2146_v37, 0  ;;  %v2028_v56 = vcombine.high %v2010_v30, %v6244_v31 }
 0x370   : > { %5476 = vmatmul.mubr.msk.bf16.vlgmr.msra.gmra.mrb[12].mxu0 %vm2243_vm1, %v2173_v18  ;;  %5455 = vmatprep.subr.bf16.mxu1 %v6243_v12  ;;  %v2200_v57 = vpack.i.b16 %v2199_v17, %v2198_v53  ;;  %v2122_v58 = vpack.i.b16 %v2121_v52, %v2120_v44  ;;  %v1960_v59 = vcombine.high %v1942_v20, %v6244_v31  ;;  %v2205_v46 = vshrl.u32 %v7033_v0, 16 }
 0x371   : > { %5486 = vmatpush3.bf16.xpose.msra.mxu0 %v2708_v11  ;;  %5487 = vmatprep.mubr.msk.bf16.mxu0 %vm6245_vm0, %v6243_v12  ;;  %v2892_v51 = vsel %vm2243_vm1, %v2215_v47, 0  ;;  %v2175_v50 = vshrl.u32 %v7040_v4, 16  ;;  %v2204_v62 = vshrl.u32 %v7045_v7, 16  ;;  %v2174_v3 = vshrl.u32 %v7048_v15, 16 }
 0x372   : > { %5497 = vmatprep.subr.bf16.mxu0 %v6243_v12  ;;  %v2191_v27 = vpack.i.b16 %v2028_v56, %v1960_v59  ;;  %v2662_v61 = vsel %vm2243_vm1, %v2200_v57, 0  ;;  %v2211_v16 = vshrl.u32 %v7068_v34, 16  ;;  %v2181_v4 = vshrl.u32 %v7074_v55, 16 }
 0x373   : > { %v2206_v63 = vpack.i.b16 %v2205_v46, %v2204_v62  ;;  %v2176_v8 = vpack.i.b16 %v2175_v50, %v2174_v3  ;;  %v2210_v7 = vshrl.u32 %v7078_v35, 16  ;;  %v2180_v15 = vshrl.u32 %v7082_v54, 16 }
 0x374   : > { %v2217_v23 = vshrl.u32 %v7104_v10, 16  ;;  %v2187_v32 = vshrl.u32 %v2010_v30, 16  ;;  %v2216_v11 = vshrl.u32 %v1962_v9, 16  ;;  %v2186_v21 = vshrl.u32 %v1942_v20, 16 }
 0x375   : > { %v2754_v0 = vsel %vm2243_vm1, %v2206_v63, 0  ;;  %v2212_v6 = vpack.i.b16 %v2211_v16, %v2210_v7  ;;  %v2182_v18 = vpack.i.b16 %v2181_v4, %v2180_v15  ;;  %v2193_v55 = vshrl.u32 %v2028_v56, 16 }
 0x376   : > { %5446 = vmatmul.mubr.msk.bf16.vlgmr.msra.gmra.mrb[16].mxu1 %vm2243_vm1, %v2110_v36  ;;  %v2218_v33 = vpack.i.b16 %v2217_v23, %v2216_v11  ;;  %v2188_v34 = vpack.i.b16 %v2187_v32, %v2186_v21  ;;  %v2192_v14 = vshrl.u32 %v1960_v59, 16 }
 0x377   : > { %5456 = vmatpush3.bf16.xpose.msra.mxu1 %v2478_v22  ;;  %5457 = vmatprep.mubr.msk.bf16.mxu1 %vm6245_vm0, %v6243_v12  ;;  %v2846_v19 = vsel %vm2243_vm1, %v2212_v6, 0 }
 0x378   : > { %5488 = vmatmul.mubr.msk.bf16.vlgmr.msra.gmra.mrb[16].mxu0 %vm2243_vm1, %v2179_v39  ;;  %5467 = vmatprep.subr.bf16.mxu1 %v6243_v12  ;;  %v2938_v28 = vsel %vm2243_vm1, %v2218_v33, 0  ;;  %v2194_v35 = vpack.i.b16 %v2193_v55, %v2192_v14 }
 0x379   : > { %5498 = vmatpush3.bf16.xpose.msra.mxu0 %v2800_v41  ;;  %5499 = vmatprep.mubr.msk.bf16.mxu0 %vm6245_vm0, %v6243_v12 }
 0x37a   : > { %5509 = vmatprep.subr.bf16.mxu0 %v6243_v12 }
 0x37e   : > { %5458 = vmatmul.mubr.msk.bf16.vlgmr.msra.gmra.mrb[20].mxu1 %vm2243_vm1, %v2116_v45 }
 0x37f   : > { %5468 = vmatpush3.bf16.xpose.msra.mxu1 %v2570_v49  ;;  %5469 = vmatprep.mubr.msk.bf16.mxu1 %vm6245_vm0, %v6243_v12 }
 0x380   : > { %5500 = vmatmul.mubr.msk.bf16.vlgmr.msra.gmra.mrb[20].mxu0 %vm2243_vm1, %v2185_v48  ;;  %5479 = vmatprep.subr.bf16.mxu1 %v6243_v12 }
 0x381   : > { %5510 = vmatpush3.bf16.xpose.msra.mxu0 %v2892_v51  ;;  %5511 = vmatprep.mubr.msk.bf16.mxu0 %vm6245_vm0, %v6243_v12 }
 0x382   : > { %5521 = vmatprep.subr.bf16.mxu0 %v6243_v12 }
 0x386   : > { %5470 = vmatmul.mubr.msk.bf16.vlgmr.msra.gmra.mrb[24].mxu1 %vm2243_vm1, %v2122_v58 }
 0x387   : > { %5480 = vmatpush3.bf16.xpose.msra.mxu1 %v2662_v61  ;;  %5481 = vmatprep.mubr.msk.bf16.mxu1 %vm6245_vm0, %v6243_v12 }
 0x388   : > { %5512 = vmatmul.mubr.msk.bf16.vlgmr.msra.gmra.mrb[24].mxu0 %vm2243_vm1, %v2191_v27  ;;  %5491 = vmatprep.subr.bf16.mxu1 %v6243_v12 }
 0x389   : > { %5523 = vmatprep.mubr.msk.bf16.mxu0 %vm6245_vm0, %v6243_v12 }
 0x38e   : > { %5482 = vmatmul.mubr.msk.bf16.vlgmr.msra.gmra.mrb[28].mxu1 %vm2243_vm1, %v2176_v8 }
 0x38f   : > { %5492 = vmatpush3.bf16.xpose.msra.mxu1 %v2754_v0  ;;  %5493 = vmatprep.mubr.msk.bf16.mxu1 %vm6245_vm0, %v6243_v12 }
 0x390   : > { %5503 = vmatprep.subr.bf16.mxu1 %v6243_v12 }
 0x396   : > { %5494 = vmatmul.mubr.msk.bf16.vlgmr.msra.gmra.mrb[32].mxu1 %vm2243_vm1, %v2182_v18 }
 0x397   : > { %5504 = vmatpush3.bf16.xpose.msra.mxu1 %v2846_v19  ;;  %5505 = vmatprep.mubr.msk.bf16.mxu1 %vm6245_vm0, %v6243_v12 }
 0x398   : > { %5515 = vmatprep.subr.bf16.mxu1 %v6243_v12 }
 0x39e   : > { %5506 = vmatmul.mubr.msk.bf16.vlgmr.msra.gmra.mrb[36].mxu1 %vm2243_vm1, %v2188_v34 }
 0x39f   : > { %5516 = vmatpush3.bf16.xpose.msra.mxu1 %v2938_v28  ;;  %5517 = vmatprep.mubr.msk.bf16.mxu1 %vm6245_vm0, %v6243_v12 }
 0x3a0   : > { %5527 = vmatprep.subr.bf16.mxu1 %v6243_v12 }
 0x3a6   : > { %5518 = vmatmul.mubr.msk.bf16.vlgmr.msra.gmra.mrb[40].mxu1 %vm2243_vm1, %v2194_v35 }
 0x3a7   : > { %5529 = vmatprep.mubr.msk.bf16.mxu1 %vm6245_vm0, %v6243_v12 }
 0x431   : > { %v7166_v36 = vpop.f32.mrb[4].mxu1 }
 0x432   : > { %v5429_v54 = vpop.f32.mrb[5].mxu1  ;;  %v2981_v38 = vsel %vm2980_vm2, %v7166_v36, -inf }
 0x433   : > { %v7170_v24 = vpop.f32.mrb[4].mxu0  ;;  %2982 = vmax.xlane.f32.xlu0 %v2981_v38  ;;  %v2287_v39 = vpop.f32.mrb[6].mxu1 }
 0x434   : > { %v5453_v22 = vpop.f32.mrb[5].mxu0  ;;  %v5430_v26 = vpop.f32.mrb[7].mxu1  ;;  %v2993_v42 = vsel %vm2980_vm2, %v7170_v24, -inf }
 0x435   : > { %v2471_v40 = vpop.f32.mrb[6].mxu0 }
 0x436   : > { %v5454_v41 = vpop.f32.mrb[7].mxu0 }
 0x437   : > { %2994 = vmax.xlane.f32.xlu0 %v2993_v42 }
 0x439   : > { %v7174_v43 = vpop.f32.mrb[8].mxu1 }
 0x43a   : > { %v5435_v10 = vpop.f32.mrb[9].mxu1  ;;  %v2984_v29 = vsel %vm2980_vm2, %v7174_v43, -inf }
 0x43b   : > { %v7178_v30 = vpop.f32.mrb[8].mxu0  ;;  %2985 = vmax.xlane.f32.xlu1 %v2984_v29  ;;  %v2333_v37 = vpop.f32.mrb[10].mxu1 }
 0x43c   : > { %v5465_v9 = vpop.f32.mrb[9].mxu0  ;;  %v2999_v45 = vsel %vm2980_vm2, %v7178_v30, -inf  ;;  %v5436_v20 = vpop.f32.mrb[11].mxu1 }
 0x43d   : > { %v2563_v47 = vpop.f32.mrb[10].mxu0  ;;  %3000 = vmax.xlane.f32.xlu0 %v2999_v45 }
 0x43e   : > { %v5466_v48 = vpop.f32.mrb[11].mxu0 }
 0x441   : > { %v7182_v49 = vpop.f32.mrb[12].mxu1 }
 0x442   : > { %v5441_v17 = vpop.f32.mrb[13].mxu1  ;;  %v2987_v51 = vsel %vm2980_vm2, %v7182_v49, -inf }
 0x443   : > { %v7186_v52 = vpop.f32.mrb[12].mxu0  ;;  %2988 = vmax.xlane.f32.xlu0 %v2987_v51  ;;  %v2379_v53 = vpop.f32.mrb[14].mxu1 }
 0x444   : > { %v5477_v44 = vpop.f32.mrb[13].mxu0  ;;  %v5442_v56 = vpop.f32.mrb[15].mxu1  ;;  %v3005_v59 = vsel %vm2980_vm2, %v7186_v52, -inf }
 0x445   : > { %v2655_v57 = vpop.f32.mrb[14].mxu0 }
 0x446   : > { %v5478_v58 = vpop.f32.mrb[15].mxu0 }
 0x447   : > { %3006 = vmax.xlane.f32.xlu0 %v3005_v59 }
 0x449   : > { %v7190_v27 = vpop.f32.mrb[16].mxu1 }
 0x44a   : > { %v5447_v61 = vpop.f32.mrb[17].mxu1  ;;  %v2990_v46 = vsel %vm2980_vm2, %v7190_v27, -inf }
 0x44b   : > { %v7194_v50 = vpop.f32.mrb[16].mxu0  ;;  %2991 = vmax.xlane.f32.xlu0 %v2990_v46  ;;  %v2425_v62 = vpop.f32.mrb[18].mxu1 }
 0x44c   : > { %v5489_v3 = vpop.f32.mrb[17].mxu0  ;;  %v5448_v63 = vpop.f32.mrb[19].mxu1  ;;  %v3011_v16 = vsel %vm2980_vm2, %v7194_v50, -inf }
 0x44d   : > { %v2747_v8 = vpop.f32.mrb[18].mxu0  ;;  %v7234_v61 = vpop.permute.xlu0 %1173 }
 0x44e   : > { %v5490_v0 = vpop.f32.mrb[19].mxu0  ;;  %v7236_v46 = vpop.permute.xlu1 %1175 }
 0x44f   : > { %3012 = vmax.xlane.f32.xlu0 %v3011_v16 }
 0x451   : > { %v7198_v4 = vpop.f32.mrb[20].mxu1 }
 0x452   : > { %v5459_v7 = vpop.f32.mrb[21].mxu1  ;;  %v2996_v15 = vsel %vm2980_vm2, %v7198_v4, -inf  ;;  %v7239_v8 = vpop.permute.xlu1 %1177 }
 0x453   : > { %v7202_v6 = vpop.f32.mrb[20].mxu0  ;;  %2997 = vmax.xlane.f32.xlu1 %v2996_v15  ;;  %v2517_v18 = vpop.f32.mrb[22].mxu1 }
 0x454   : > { %v5501_v19 = vpop.f32.mrb[21].mxu0  ;;  %v5460_v23 = vpop.f32.mrb[23].mxu1  ;;  %v3017_v51 = vsel %vm2980_vm2, %v7202_v6, -inf }
 0x455   : > { %v2839_v32 = vpop.f32.mrb[22].mxu0 }
 0x456   : > { %v5502_v11 = vpop.f32.mrb[23].mxu0 }
 0x459   : > { %v7204_v21 = vpop.f32.mrb[24].mxu1 }
 0x45a   : > { %v5471_v33 = vpop.f32.mrb[25].mxu1  ;;  %v3002_v44 = vsel %vm2980_vm2, %v7204_v21, -inf }
 0x45b   : > { %v7206_v34 = vpop.f32.mrb[24].mxu0  ;;  %v2609_v28 = vpop.f32.mrb[26].mxu1 }
 0x45c   : > { %v5513_v55 = vpop.f32.mrb[25].mxu0  ;;  %v5472_v14 = vpop.f32.mrb[27].mxu1  ;;  %v3023_v53 = vsel %vm2980_vm2, %v7206_v34, -inf }
 0x45d   : > { %v2931_v35 = vpop.f32.mrb[26].mxu0 }
 0x45e   : > { %v5514_v54 = vpop.f32.mrb[27].mxu0 }
 0x461   : > { %v7208_v38 = vpop.f32.mrb[28].mxu1 }
 0x462   : > { %v5483_v39 = vpop.f32.mrb[29].mxu1  ;;  %v3008_v56 = vsel %vm2980_vm2, %v7208_v38, -inf }
 0x463   : > { %v2701_v22 = vpop.f32.mrb[30].mxu1 }
 0x464   : > { %1179 = vrot.lane.b32.xlu1 %v6801_v25, %s6251_s4  ;;  %v5484_v26 = vpop.f32.mrb[31].mxu1 }
 0x465   : > { %1181 = vrot.lane.b32.xlu0 %v6801_v25, %s6249_s13 }
 0x469   : > { %v7214_v40 = vpop.f32.mrb[32].mxu1 }
 0x46a   : > { %v5495_v41 = vpop.f32.mrb[33].mxu1  ;;  %v3014_v57 = vsel %vm2980_vm2, %v7214_v40, -inf }
 0x46b   : > { %v2793_v42 = vpop.f32.mrb[34].mxu1 }
 0x46c   : > { %v5496_v10 = vpop.f32.mrb[35].mxu1 }
 0x471   : > { %v7216_v29 = vpop.f32.mrb[36].mxu1 }
 0x472   : > { %v5507_v37 = vpop.f32.mrb[37].mxu1  ;;  %v3020_v58 = vsel %vm2980_vm2, %v7216_v29, -inf }
 0x473   : > { %v2885_v9 = vpop.f32.mrb[38].mxu1 }
 0x474   : > { %v5508_v45 = vpop.f32.mrb[39].mxu1 }
 0x479   : > { %v7218_v20 = vpop.f32.mrb[40].mxu1 }
 0x47a   : > { %v5519_v47 = vpop.f32.mrb[41].mxu1  ;;  %v3026_v59 = vsel %vm2980_vm2, %v7218_v20, -inf }
 0x47b   : > { %v2977_v48 = vpop.f32.mrb[42].mxu1 }
 0x47c   : > { %v5520_v17 = vpop.f32.mrb[43].mxu1 }
 0x484   : > { %3018 = vmax.xlane.f32.xlu0 %v3017_v51 }
 0x488   : > { %3024 = vmax.xlane.f32.xlu0 %v3023_v53  ;;  %3003 = vmax.xlane.f32.xlu1 %v3002_v44 }
 0x48c   : > { %3009 = vmax.xlane.f32.xlu1 %v3008_v56 }
 0x490   : > { %3015 = vmax.xlane.f32.xlu1 %v3014_v57 }
 0x494   : > { %3021 = vmax.xlane.f32.xlu1 %v3020_v58 }
 0x498   : > { %3027 = vmax.xlane.f32.xlu1 %v3026_v59 }
 0x4c0   : > { %v2983_v62 = vpop.xlane.xlu0 %2982 }
 0x4c1   : > { %v3029_v3 = vsub.f32 %v7166_v36, %v2983_v62 }
 0x4c3   : > { %v3045_v63 = vmul.f32 1.442695, %v3029_v3 }
 0x4c4   : > { %v2995_v0 = vpop.xlane.xlu0 %2994 }
 0x4c5   : > { %5837 = vpow2.f32 %v3045_v63  ;;  %v3033_v42 = vsub.f32 %v7170_v24, %v2995_v0 }
 0x4c7   : > { %v3053_v9 = vmul.f32 1.442695, %v3033_v42 }
 0x4c8   : > { %v2986_v16 = vpop.xlane.xlu1 %2985 }
 0x4c9   : > { %v3030_v7 = vsub.f32 %v7174_v43, %v2986_v16 }
 0x4ca   : > { %v3001_v18 = vpop.xlane.xlu0 %3000 }
 0x4cb   : > { %v3047_v15 = vmul.f32 1.442695, %v3030_v7  ;;  %v3035_v48 = vsub.f32 %v7178_v30, %v3001_v18 }
 0x4cd   : > { %5839 = vpow2.f32 %v3047_v15  ;;  %v3057_v51 = vmul.f32 1.442695, %v3035_v48 }
 0x4cf   : > { %v7242_v19 = vpop.eup %5837 }
 0x4d0   : > { %v2989_v23 = vpop.xlane.xlu0 %2988  ;;  %v3077_v32 = vsel %vm2980_vm2, %v7242_v19, 0.0 }
 0x4d1   : > { %3078 = vadd.xlane.f32.xlu0 %v3077_v32  ;;  %v3031_v37 = vsub.f32 %v7182_v49, %v2989_v23 }
 0x4d3   : > { %v3049_v47 = vmul.f32 1.442695, %v3031_v37 }
 0x4d4   : > { %v3007_v11 = vpop.xlane.xlu0 %3006 }
 0x4d5   : > { %v3037_v53 = vsub.f32 %v7186_v52, %v3007_v11 }
 0x4d7   : > { %v7246_v36 = vpop.eup %5839  ;;  %v3061_v24 = vmul.f32 1.442695, %v3037_v53 }
 0x4d8   : > { %v2992_v33 = vpop.xlane.xlu0 %2991  ;;  %v3080_v28 = vsel %vm2980_vm2, %v7246_v36, 0.0 }
 0x4d9   : > { %3081 = vadd.xlane.f32.xlu1 %v3080_v28  ;;  %v3032_v41 = vsub.f32 %v7190_v27, %v2992_v33 }
 0x4db   : > { %v3051_v10 = vmul.f32 1.442695, %v3032_v41 }
 0x4dc   : > { %v3013_v55 = vpop.xlane.xlu0 %3012 }
 0x4dd   : > { %5841 = vpow2.f32 %v3051_v10  ;;  %v3039_v49 = vsub.f32 %v7194_v50, %v3013_v55 }
 0x4de   : > { %5843 = vpow2.f32 %v3053_v9 }
 0x4df   : > { %5845 = vpow2.f32 %v3049_v47  ;;  %v3065_v30 = vmul.f32 1.442695, %v3039_v49 }
 0x4e0   : > { %v2998_v43 = vpop.xlane.xlu1 %2997  ;;  %v1182_v14 = vpop.permute.xlu0 %1181 }
 0x4e1   : > { %v1272_v54 = vshrl.u32 %v1182_v14, 16  ;;  %v3034_v45 = vsub.f32 %v7198_v4, %v2998_v43 }
 0x4e3   : > { %v3055_v17 = vmul.f32 1.442695, %v3034_v45 }
 0x4e4   : > { %v1180_v35 = vpop.permute.xlu1 %1179 }
 0x4e5   : > { %v7250_v39 = vpack.i.b16 %v1182_v14, %v1180_v35  ;;  %v1271_v22 = vshrl.u32 %v1180_v35, 16  ;;  %5847 = vpow2.f32 %v3055_v17 }
 0x4e6   : > { %5849 = vpow2.f32 %v3057_v51 }
 0x4e7   : > { %v7252_v26 = vpack.i.b16 %v1272_v54, %v1271_v22  ;;  %1185 = vrot.lane.b32.xlu0 %v6801_v25, %s6250_s3  ;;  %v7264_v27 = vpop.eup %5841  ;;  %5851 = vpow2.f32 %v3061_v24 }
 0x4e8   : > { %v3086_v44 = vsel %vm2980_vm2, %v7264_v27, 0.0  ;;  %v7269_v4 = vpop.eup %5843  ;;  %5853 = vpow2.f32 %v3065_v30 }
 0x4e9   : > { %v7271_v56 = vpop.eup %5845  ;;  %v3089_v52 = vsel %vm2980_vm2, %v7269_v4, 0.0 }
 0x4ea   : > { %1183 = vrot.lane.b32.xlu1 %v6801_v25, %s6252_s0  ;;  %v3083_v58 = vsel %vm2980_vm2, %v7271_v56, 0.0 }
 0x4ef   : > { %v7275_v57 = vpop.eup %5847 }
 0x4f0   : > { %v3092_v50 = vsel %vm2980_vm2, %v7275_v57, 0.0  ;;  %v7281_v59 = vpop.eup %5849 }
 0x4f1   : > { %v3095_v3 = vsel %vm2980_vm2, %v7281_v59, 0.0  ;;  %v7285_v63 = vpop.eup %5851 }
 0x4f2   : > { %v3101_v18 = vsel %vm2980_vm2, %v7285_v63, 0.0  ;;  %v7290_v23 = vpop.eup %5853 }
 0x506   : > { %3087 = vadd.xlane.f32.xlu0 %v3086_v44 }
 0x50a   : > { %3090 = vadd.xlane.f32.xlu0 %v3089_v52 }
 0x50e   : > { %3093 = vadd.xlane.f32.xlu0 %v3092_v50  ;;  %3084 = vadd.xlane.f32.xlu1 %v3083_v58  ;;  %v1253_v50 = vpack.i.b16 %v7234_v61, %v6801_v25  ;;  %v1256_v58 = vshrl.u32 %v7234_v61, 16 }
 0x511   : > { %v3019_v62 = vpop.xlane.xlu0 %3018 }
 0x512   : > { %v3041_v0 = vsub.f32 %v7202_v6, %v3019_v62  ;;  %3096 = vadd.xlane.f32.xlu1 %v3095_v3  ;;  %v3107_v6 = vsel %vm2980_vm2, %v7290_v23, 0.0  ;;  %v1264_v3 = vshrl.u32 %v7239_v8, 16 }
 0x514   : > { %v3069_v16 = vmul.f32 1.442695, %v3041_v0  ;;  %v1255_v0 = vshrl.u32 %v6801_v25, 16 }
 0x515   : > { %v3025_v7 = vpop.xlane.xlu0 %3024  ;;  %v3004_v15 = vpop.xlane.xlu1 %3003 }
 0x516   : > { %5855 = vpow2.f32 %v3069_v16  ;;  %v3043_v32 = vsub.f32 %v7206_v34, %v3025_v7  ;;  %v3036_v11 = vsub.f32 %v7204_v21, %v3004_v15  ;;  %3102 = vadd.xlane.f32.xlu1 %v3101_v18  ;;  %v1263_v16 = vshrl.u32 %v7236_v46, 16 }
 0x517   : > { %v1555_v7 = vcombine.low %v1253_v50, %v7250_v39  ;;  %v1556_v15 = vcombine.high %v1253_v50, %v7250_v39 }
 0x518   : > { %v3073_v33 = vmul.f32 1.442695, %v3043_v32  ;;  %v3059_v28 = vmul.f32 1.442695, %v3036_v11  ;;  %v1261_v32 = vpack.i.b16 %v7239_v8, %v7236_v46  ;;  %v1265_v61 = vpack.i.b16 %v1264_v3, %v1263_v16 }
 0x519   : > { %v3010_v55 = vpop.xlane.xlu1 %3009  ;;  %v1563_v25 = vrot.slane %v1555_v7, %v6835_v60 }
 0x51a   : > { %5857 = vpow2.f32 %v3073_v33  ;;  %v3038_v43 = vsub.f32 %v7208_v38, %v3010_v55  ;;  %3108 = vadd.xlane.f32.xlu1 %v3107_v6  ;;  %v1257_v55 = vpack.i.b16 %v1256_v58, %v1255_v0 }
 0x51b   : > { %5859 = vpow2.f32 %v3059_v28 }
 0x51c   : > { %v3063_v14 = vmul.f32 1.442695, %v3038_v43  ;;  %v1624_v39 = vcombine.high %v1257_v55, %v7252_v26 }
 0x51d   : > { %v3016_v35 = vpop.xlane.xlu1 %3015 }
 0x51e   : > { %5861 = vpow2.f32 %v3063_v14  ;;  %v3040_v54 = vsub.f32 %v7214_v40, %v3016_v35  ;;  %v1570_v35 = vrot.slane %v1556_v15, %v6835_v60 }
 0x520   : > { %v7298_v34 = vpop.eup %5855  ;;  %v3067_v21 = vmul.f32 1.442695, %v3040_v54  ;;  %v1623_v54 = vcombine.low %v1257_v55, %v7252_v26 }
 0x521   : > { %v3022_v22 = vpop.xlane.xlu1 %3021  ;;  %v3113_v41 = vsel %vm2980_vm2, %v7298_v34, 0.0 }
 0x522   : > { %5863 = vpow2.f32 %v3067_v21  ;;  %v3042_v42 = vsub.f32 %v7216_v29, %v3022_v22  ;;  %3114 = vadd.xlane.f32.xlu1 %v3113_v41 }
 0x524   : > { %v7303_v10 = vpop.eup %5857  ;;  %v3071_v38 = vmul.f32 1.442695, %v3042_v42 }
 0x525   : > { %v7305_v37 = vpop.eup %5859  ;;  %v3028_v9 = vpop.xlane.xlu1 %3027  ;;  %v3119_v40 = vsel %vm2980_vm2, %v7303_v10, 0.0 }
 0x526   : > { %5865 = vpow2.f32 %v3071_v38  ;;  %v3044_v45 = vsub.f32 %v7218_v20, %v3028_v9  ;;  %v3098_v47 = vsel %vm2980_vm2, %v7305_v37, 0.0  ;;  %3120 = vadd.xlane.f32.xlu1 %v3119_v40  ;;  %v1631_v40 = vrot.slane %v1623_v54, %v6835_v60 }
 0x527   : > { %3099 = vadd.xlane.f32.xlu0 %v3098_v47 }
 0x528   : > { %v7312_v48 = vpop.eup %5861  ;;  %v3075_v29 = vmul.f32 1.442695, %v3044_v45  ;;  %v1638_v45 = vrot.slane %v1624_v39, %v6835_v60 }
 0x529   : > { %v3104_v17 = vsel %vm2980_vm2, %v7312_v48, 0.0 }
 0x52a   : > { %5867 = vpow2.f32 %v3075_v29 }
 0x52b   : > { %3105 = vadd.xlane.f32.xlu0 %v3104_v17 }
 0x52c   : > { %v7316_v51 = vpop.eup %5863 }
 0x52d   : > { %v3110_v53 = vsel %vm2980_vm2, %v7316_v51, 0.0 }
 0x52f   : > { %3111 = vadd.xlane.f32.xlu0 %v3110_v53 }
 0x530   : > { %v7320_v20 = vpop.eup %5865 }
 0x531   : > { %v3116_v24 = vsel %vm2980_vm2, %v7320_v20, 0.0 }
 0x533   : > { %3117 = vadd.xlane.f32.xlu0 %v3116_v24 }
 0x534   : > { %v7324_v49 = vpop.eup %5867 }
 0x535   : > { %v3122_v44 = vsel %vm2980_vm2, %v7324_v49, 0.0 }
 0x537   : > { %3123 = vadd.xlane.f32.xlu0 %v3122_v44 }
 0x55e   : > { %v3079_v30 = vpop.xlane.xlu0 %3078 }
 0x55f   : > { %5869 = vrcp.f32 %v3079_v30 }
 0x562   : > { %v1186_v62 = vpop.permute.xlu0 %1185 }
 0x563   : > { %v1280_v11 = vshrl.u32 %v1186_v62, 16 }
 0x566   : > { %v3082_v52 = vpop.xlane.xlu1 %3081 }
 0x567   : > { %5871 = vrcp.f32 %v3082_v52 }
 0x569   : > { %v5870_v16 = vpop.eup %5869 }
 0x56a   : > { %v1184_v18 = vpop.permute.xlu1 %1183 }
 0x56b   : > { %v1277_v33 = vpack.i.b16 %v1186_v62, %v1184_v18  ;;  %v1279_v28 = vshrl.u32 %v1184_v18, 16 }
 0x56d   : > { %v1281_v6 = vpack.i.b16 %v1280_v11, %v1279_v28  ;;  %v1571_v43 = vcombine.low %v1261_v32, %v1277_v33  ;;  %v1572_v14 = vcombine.high %v1261_v32, %v1277_v33 }
 0x56f   : > { %v1579_v21 = vrot.slane %v1571_v43, %v6835_v60  ;;  %v1586_v46 = vrot.slane %v1572_v14, %v6835_v60  ;;  %v1639_v8 = vcombine.low %v1265_v61, %v1281_v6  ;;  %v1640_v22 = vcombine.high %v1265_v61, %v1281_v6 }
 0x571   : > { %v1587_v41 = vcombine.low %v1563_v25, %v1579_v21  ;;  %v1588_v42 = vcombine.high %v1563_v25, %v1579_v21  ;;  %v1603_v38 = vcombine.low %v1570_v35, %v1586_v46  ;;  %v1604_v9 = vcombine.high %v1570_v35, %v1586_v46  ;;  %v5872_v21 = vpop.eup %5871 }
 0x572   : > { %v1647_v47 = vrot.slane %v1639_v8, %v6835_v60  ;;  %v1654_v29 = vrot.slane %v1640_v22, %v6835_v60  ;;  %v3141_v25 = vmul.f32 %v5870_v16, %v7242_v19 }
 0x573   : > { %v1595_v26 = vrot.slane %v1587_v41, %v6842_v13  ;;  %v1602_v17 = vrot.slane %v1588_v42, %v6842_v13  ;;  %v1611_v53 = vrot.slane %v1603_v38, %v6842_v13  ;;  %v1618_v24 = vrot.slane %v1604_v9, %v6842_v13 }
 0x574   : > { %v1655_v44 = vcombine.low %v1631_v40, %v1647_v47  ;;  %v1656_v30 = vcombine.high %v1631_v40, %v1647_v47  ;;  %v1671_v52 = vcombine.low %v1638_v45, %v1654_v29  ;;  %v1672_v50 = vcombine.high %v1638_v45, %v1654_v29 }
 0x575   : > { %v1827_v58 = vcombine.low %v1595_v26, %v1602_v17  ;;  %v5195_v62 = vcombine.high %v1595_v26, %v1602_v17  ;;  %v2031_v3 = vcombine.low %v1611_v53, %v1618_v24  ;;  %v5205_v0 = vcombine.high %v1611_v53, %v1618_v24 }
 0x576   : > { %v1663_v7 = vrot.slane %v1655_v44, %v6842_v13  ;;  %v1670_v15 = vrot.slane %v1656_v30, %v6842_v13  ;;  %v1679_v18 = vrot.slane %v1671_v52, %v6842_v13  ;;  %v1686_v32 = vrot.slane %v1672_v50, %v6842_v13 }
 0x577   : > { %v1834_v11 = vrot.slane %v1827_v58, %v6835_v60  ;;  %v1842_v33 = vrot.slane %v5195_v62, %v6835_v60  ;;  %v2038_v28 = vrot.slane %v2031_v3, %v6835_v60  ;;  %v2046_v55 = vrot.slane %v5205_v0, %v6835_v60 }
 0x578   : > { %v1861_v61 = vcombine.low %v1663_v7, %v1670_v15  ;;  %v5196_v6 = vcombine.high %v1663_v7, %v1670_v15  ;;  %v2065_v43 = vcombine.low %v1679_v18, %v1686_v32  ;;  %v5206_v14 = vcombine.high %v1679_v18, %v1686_v32 }
 0x579   : > { %v1843_v35 = vcombine.low %v1834_v11, %v1842_v33  ;;  %v1844_v54 = vcombine.high %v1834_v11, %v1842_v33  ;;  %v2047_v39 = vcombine.low %v2038_v28, %v2046_v55  ;;  %v2048_v19 = vcombine.high %v2038_v28, %v2046_v55 }
 0x57a   : > { %v1868_v46 = vrot.slane %v1861_v61, %v6835_v60  ;;  %v1876_v8 = vrot.slane %v5196_v6, %v6835_v60  ;;  %v2072_v22 = vrot.slane %v2065_v43, %v6835_v60  ;;  %v2080_v41 = vrot.slane %v5206_v14, %v6835_v60 }
 0x57b   : > { %v1851_v42 = vrot.slane %v1843_v35, %v6842_v13  ;;  %v7367_v38 = vrot.slane %v1844_v54, %v6842_v13  ;;  %v7370_v9 = vrot.slane %v2047_v39, %v6842_v13  ;;  %v3142_v26 = vmul.f32 %v5872_v21, %v7246_v36 }
 0x57c   : > { %v1877_v40 = vcombine.low %v1868_v46, %v1876_v8  ;;  %v1878_v45 = vcombine.high %v1868_v46, %v1876_v8  ;;  %v2081_v47 = vcombine.low %v2072_v22, %v2080_v41  ;;  %v2082_v29 = vcombine.high %v2072_v22, %v2080_v41 }
 0x57d   : > { %v2150_v17 = vshrl.u32 %v1851_v42, 16  ;;  %v1859_v53 = vcombine.high %v1851_v42, %v6244_v31  ;;  %v7376_v24 = vcombine.high %v7367_v38, %v6244_v31  ;;  %v2162_v52 = vshrl.u32 %v7367_v38, 16 }
 0x57e   : > { %v1885_v44 = vrot.slane %v1877_v40, %v6842_v13  ;;  %v7380_v30 = vrot.slane %v1878_v45, %v6842_v13  ;;  %v7384_v50 = vrot.slane %v2081_v47, %v6842_v13  ;;  %v2222_v62 = vshrl.u32 %v7370_v9, 16 }
 0x57f   : > { %v2156_v58 = vshrl.u32 %v1859_v53, 16  ;;  %v2168_v36 = vshrl.u32 %v7376_v24, 16  ;;  %v2063_v3 = vcombine.high %v7370_v9, %v6244_v31  ;;  %v2062_v54 = vrot.slane %v2048_v19, %v6842_v13 }
 0x580   : > { %v2149_v0 = vpack.i.b16 %v1885_v44, %v1851_v42  ;;  %v2151_v16 = vshrl.u32 %v1885_v44, 16  ;;  %v1893_v7 = vcombine.high %v1885_v44, %v6244_v31  ;;  %v2163_v15 = vshrl.u32 %v7380_v30, 16 }
 0x581   : > { %v2161_v18 = vpack.i.b16 %v7380_v30, %v7367_v38  ;;  %v7396_v32 = vcombine.high %v7380_v30, %v6244_v31  ;;  %v2221_v11 = vpack.i.b16 %v7384_v50, %v7370_v9  ;;  %v2223_v33 = vshrl.u32 %v7384_v50, 16 }
 0x582   : > { %v3178_v28 = vsel %vm3176_vm3, %v2149_v0, 0  ;;  %v2152_v55 = vpack.i.b16 %v2151_v16, %v2150_v17  ;;  %v2155_v61 = vpack.i.b16 %v1893_v7, %v1859_v53  ;;  %v2157_v6 = vshrl.u32 %v1893_v7, 16 }
 0x583   : > { %5522 = vmatpush3.bf16.msra.mxu0 %v3178_v28  ;;  %v2164_v43 = vpack.i.b16 %v2163_v15, %v2162_v52  ;;  %v2169_v14 = vshrl.u32 %v7396_v32, 16  ;;  %v2167_v35 = vpack.i.b16 %v7396_v32, %v7376_v24  ;;  %v3157_v21 = vpack.c.bf16 %v3141_v25, %v3141_v25 }
 0x584   : > { %v3224_v39 = vsel %vm3176_vm3, %v2152_v55, 0  ;;  %5533 = vmatprep.subr.bf16.mxu0 %v6243_v12  ;;  %v2158_v46 = vpack.i.b16 %v2157_v6, %v2156_v58  ;;  %v3158_v8 = vpack.c.bf16 %v3142_v26, %v3142_v26  ;;  %v2224_v41 = vpack.i.b16 %v2223_v33, %v2222_v62 }
 0x585   : > { %5528 = vmatpush3.bf16.msra.mxu1 %v3224_v39  ;;  %v2170_v22 = vpack.i.b16 %v2169_v14, %v2168_v36  ;;  %v3270_v42 = vsel %vm3176_vm3, %v2155_v61, 0  ;;  %v2097_v19 = vcombine.high %v7384_v50, %v6244_v31  ;;  %v2096_v25 = vrot.slane %v2082_v29, %v6842_v13 }
 0x586   : > { %5524 = vmatmul.mubr.msk.bf16.vlgmr.msra.gmra.mrb[28].mxu0 %vm2980_vm2, %v3157_v21  ;;  %5539 = vmatprep.subr.bf16.mxu1 %v6243_v12  ;;  %v3316_v40 = vsel %vm3176_vm3, %v2158_v46, 0  ;;  %v7418_v45 = vsel %vm3176_vm3, %v2224_v41, 0  ;;  %v2228_v47 = vshrl.u32 %v2063_v3, 16  ;;  %v2234_v26 = vshrl.u32 %v2062_v54, 16 }
 0x587   : > { %5534 = vmatpush3.bf16.msra.mxu0 %v3270_v42  ;;  %5535 = vmatprep.mubr.msk.bf16.mxu0 %vm6245_vm0, %v6243_v12  ;;  %v2064_v17 = vcombine.high %v2062_v54, %v6244_v31  ;;  %v2227_v53 = vpack.i.b16 %v2097_v19, %v2063_v3  ;;  %v2229_v44 = vshrl.u32 %v2097_v19, 16  ;;  %v2233_v52 = vpack.i.b16 %v2096_v25, %v2062_v54 }
 0x588   : > { %5530 = vmatmul.mubr.msk.bf16.vlgmr.msra.gmra.mrb[44].mxu1 %vm2980_vm2, %v3158_v8  ;;  %5545 = vmatprep.subr.bf16.mxu0 %v6243_v12  ;;  %v2235_v58 = vshrl.u32 %v2096_v25, 16  ;;  %v2098_v29 = vcombine.high %v2096_v25, %v6244_v31  ;;  %v3408_v42 = vsel %vm3176_vm3, %v2164_v43, 0  ;;  %v3500_v43 = vsel %vm3176_vm3, %v2170_v22, 0 }
 0x589   : > { %5540 = vmatpush3.bf16.msra.mxu1 %v3316_v40  ;;  %5541 = vmatprep.mubr.msk.bf16.mxu1 %vm6245_vm0, %v6243_v12  ;;  %v7428_v36 = vsel %vm3176_vm3, %v2227_v53, 0  ;;  %v2230_v62 = vpack.i.b16 %v2229_v44, %v2228_v47  ;;  %v7431_v0 = vsel %vm3176_vm3, %v2233_v52, 0  ;;  %v2240_v7 = vshrl.u32 %v2064_v17, 16 }
 0x58a   : > { %5551 = vmatprep.subr.bf16.mxu1 %v6243_v12  ;;  %v2236_v16 = vpack.i.b16 %v2235_v58, %v2234_v26  ;;  %v2239_v3 = vpack.i.b16 %v2098_v29, %v2064_v17  ;;  %v2241_v15 = vshrl.u32 %v2098_v29, 16  ;;  %v3362_v44 = vsel %vm3176_vm3, %v2161_v18, 0 }
 0x58b   : > { %v7434_v33 = vsel %vm3176_vm3, %v2230_v62, 0  ;;  %v3454_v18 = vsel %vm3176_vm3, %v2167_v35, 0  ;;  %v3546_v24 = vsel %vm3176_vm3, %v2221_v11, 0 }
 0x58c   : > { %v7437_v28 = vsel %vm3176_vm3, %v2236_v16, 0  ;;  %v7440_v55 = vsel %vm3176_vm3, %v2239_v3, 0  ;;  %v2242_v61 = vpack.i.b16 %v2241_v15, %v2240_v7 }
 0x58e   : > { %v7443_v6 = vsel %vm3176_vm3, %v2242_v61, 0 }
 0x593   : > { %v3088_v14 = vpop.xlane.xlu0 %3087 }
 0x594   : > { %5873 = vrcp.f32 %v3088_v14 }
 0x597   : > { %v3091_v54 = vpop.xlane.xlu0 %3090 }
 0x59b   : > { %v3094_v39 = vpop.xlane.xlu0 %3093  ;;  %v3085_v21 = vpop.xlane.xlu1 %3084 }
 0x59c   : > { %5875 = vrcp.f32 %v3094_v39 }
 0x59d   : > { %5877 = vrcp.f32 %v3085_v21 }
 0x59e   : > { %v5874_v46 = vpop.eup %5873  ;;  %5879 = vrcp.f32 %v3091_v54 }
 0x59f   : > { %v3144_v8 = vmul.f32 %v5874_v46, %v7264_v27  ;;  %v3097_v19 = vpop.xlane.xlu1 %3096 }
 0x5a0   : > { %5881 = vrcp.f32 %v3097_v19 }
 0x5a1   : > { %v3160_v41 = vpack.c.bf16 %v3144_v8, %v3144_v8 }
 0x5a3   : > { %5542 = vmatmul.mubr.msk.bf16.vlgmr.msra.gmra.mrb[48].mxu1 %vm2980_vm2, %v3160_v41 }
 0x5a4   : > { %5552 = vmatpush3.bf16.msra.mxu1 %v3408_v42  ;;  %5553 = vmatprep.mubr.msk.bf16.mxu1 %vm6245_vm0, %v6243_v12 }
 0x5a5   : > { %5563 = vmatprep.subr.bf16.mxu1 %v6243_v12 }
 0x5a6   : > { %v5876_v40 = vpop.eup %5875 }
 0x5a7   : > { %v5878_v25 = vpop.eup %5877  ;;  %v3146_v47 = vmul.f32 %v5876_v40, %v7275_v57  ;;  %v3103_v57 = vpop.xlane.xlu1 %3102 }
 0x5a8   : > { %v3143_v26 = vmul.f32 %v5878_v25, %v7271_v56  ;;  %v5880_v53 = vpop.eup %5879  ;;  %5883 = vrcp.f32 %v3103_v57 }
 0x5a9   : > { %v3162_v27 = vpack.c.bf16 %v3146_v47, %v3146_v47  ;;  %v3145_v56 = vmul.f32 %v5880_v53, %v7269_v4  ;;  %v5788_v53 = vld [vmem:[%s6724_s29 + $0x18] sm:$0xff]  }
 0x5aa   : > { %v3159_v17 = vpack.c.bf16 %v3143_v26, %v3143_v26  ;;  %v5882_v38 = vpop.eup %5881 }
 0x5ab   : > { %5554 = vmatmul.mubr.msk.bf16.vlgmr.msra.gmra.mrb[52].mxu1 %vm2980_vm2, %v3162_v27  ;;  %v3161_v22 = vpack.c.bf16 %v3145_v56, %v3145_v56  ;;  %v3109_v4 = vpop.xlane.xlu1 %3108  ;;  %v3147_v52 = vmul.f32 %v5882_v38, %v7281_v59  ;;  %v5785_v27 = vld [vmem:[%s6724_s29] sm:$0xff]  }
 0x5ac   : > { %5536 = vmatmul.mubr.msk.bf16.vlgmr.msra.gmra.mrb[32].mxu0 %vm2980_vm2, %v3159_v17  ;;  %5564 = vmatpush3.bf16.msra.mxu1 %v3500_v43  ;;  %v5787_v17 = vld [vmem:[%s6724_s29 + $0x10] sm:$0xff]  }
 0x5ad   : > { %5546 = vmatpush3.bf16.msra.mxu0 %v3362_v44  ;;  %5547 = vmatprep.mubr.msk.bf16.mxu0 %vm6245_vm0, %v6243_v12  ;;  %v3163_v29 = vpack.c.bf16 %v3147_v52, %v3147_v52 }
 0x5ae   : > { %5557 = vmatprep.subr.bf16.mxu0 %v6243_v12  ;;  %5565 = vmatprep.mubr.msk.bf16.mxu1 %vm6245_vm0, %v6243_v12 }
 0x5af   : > { %5575 = vmatprep.subr.bf16.mxu1 %v6243_v12  ;;  %v3115_v32 = vpop.xlane.xlu1 %3114 }
 0x5b2   : > { %v5884_v62 = vpop.eup %5883 }
 0x5b3   : > { %v3149_v59 = vmul.f32 %v5884_v62, %v7285_v63  ;;  %v3121_v11 = vpop.xlane.xlu1 %3120 }
 0x5b4   : > { %v3100_v30 = vpop.xlane.xlu0 %3099  ;;  %5548 = vmatmul.mubr.msk.bf16.vlgmr.msra.gmra.mrb[36].mxu0 %vm2980_vm2, %v3161_v22 }
 0x5b5   : > { %5885 = vrcp.f32 %v3100_v30  ;;  %5558 = vmatpush3.bf16.msra.mxu0 %v3454_v18  ;;  %5559 = vmatprep.mubr.msk.bf16.mxu0 %vm6245_vm0, %v6243_v12  ;;  %v3165_v9 = vpack.c.bf16 %v3149_v59, %v3149_v59 }
 0x5b6   : > { %5569 = vmatprep.subr.bf16.mxu0 %v6243_v12  ;;  %5887 = vrcp.f32 %v3109_v4 }
 0x5b8   : > { %v3106_v58 = vpop.xlane.xlu0 %3105 }
 0x5b9   : > { %5889 = vrcp.f32 %v3106_v58 }
 0x5ba   : > { %5891 = vrcp.f32 %v3115_v32 }
 0x5bc   : > { %5560 = vmatmul.mubr.msk.bf16.vlgmr.msra.gmra.mrb[40].mxu0 %vm2980_vm2, %v3163_v29  ;;  %v3112_v35 = vpop.xlane.xlu0 %3111 }
 0x5bd   : > { %5570 = vmatpush3.bf16.msra.mxu0 %v3546_v24  ;;  %5571 = vmatprep.mubr.msk.bf16.mxu0 %vm6245_vm0, %v6243_v12  ;;  %5893 = vrcp.f32 %v3112_v35 }
 0x5be   : > { %5581 = vmatprep.subr.bf16.mxu0 %v6243_v12  ;;  %5895 = vrcp.f32 %v3121_v11 }
 0x5bf   : > { %v5886_v16 = vpop.eup %5885 }
 0x5c0   : > { %v3148_v3 = vmul.f32 %v5886_v16, %v7305_v37  ;;  %v5888_v7 = vpop.eup %5887  ;;  %v3118_v14 = vpop.xlane.xlu0 %3117 }
 0x5c1   : > { %v3151_v63 = vmul.f32 %v5888_v7, %v7290_v23  ;;  %5897 = vrcp.f32 %v3118_v14 }
 0x5c2   : > { %v3164_v15 = vpack.c.bf16 %v3148_v3, %v3148_v3 }
 0x5c3   : > { %v5890_v50 = vpop.eup %5889 }
 0x5c4   : > { %5566 = vmatmul.mubr.msk.bf16.vlgmr.msra.gmra.mrb[56].mxu1 %vm2980_vm2, %v3164_v15  ;;  %5572 = vmatmul.mubr.msk.bf16.vlgmr.msra.gmra.mrb[44].mxu0 %vm2980_vm2, %v3165_v9  ;;  %v3150_v61 = vmul.f32 %v5890_v50, %v7312_v48  ;;  %v5892_v37 = vpop.eup %5891  ;;  %v3124_v39 = vpop.xlane.xlu0 %3123 }
 0x5c5   : > { %5576 = vmatpush3.bf16.msra.mxu1 %v7418_v45  ;;  %5582 = vmatpush3.bf16.msra.mxu0 %v7428_v36  ;;  %v3167_v36 = vpack.c.bf16 %v3151_v63, %v3151_v63  ;;  %v3153_v23 = vmul.f32 %v5892_v37, %v7298_v34  ;;  %5899 = vrcp.f32 %v3124_v39 }
 0x5c6   : > { %5577 = vmatprep.mubr.msk.bf16.mxu1 %vm6245_vm0, %v6243_v12  ;;  %5583 = vmatprep.mubr.msk.bf16.mxu0 %vm6245_vm0, %v6243_v12  ;;  %v3166_v45 = vpack.c.bf16 %v3150_v61, %v3150_v61 }
 0x5c7   : > { %5587 = vmatprep.subr.bf16.mxu1 %v6243_v12  ;;  %5593 = vmatprep.subr.bf16.mxu0 %v6243_v12  ;;  %v5894_v54 = vpop.eup %5893  ;;  %v3169_v46 = vpack.c.bf16 %v3153_v23, %v3153_v23 }
 0x5c8   : > { %v3152_v48 = vmul.f32 %v5894_v54, %v7316_v51  ;;  %v5896_v21 = vpop.eup %5895 }
 0x5c9   : > { %v3155_v34 = vmul.f32 %v5896_v21, %v7303_v10 }
 0x5cb   : > { %v3171_v41 = vpack.c.bf16 %v3155_v34, %v3155_v34 }
 0x5cc   : > { %5578 = vmatmul.mubr.msk.bf16.vlgmr.msra.gmra.mrb[60].mxu1 %vm2980_vm2, %v3166_v45  ;;  %5584 = vmatmul.mubr.msk.bf16.vlgmr.msra.gmra.mrb[48].mxu0 %vm2980_vm2, %v3167_v36 }
 0x5cd   : > { %5588 = vmatpush3.bf16.msra.mxu1 %v7434_v33  ;;  %5594 = vmatpush3.bf16.msra.mxu0 %v7431_v0  ;;  %v3168_v33 = vpack.c.bf16 %v3152_v48, %v3152_v48  ;;  %v5898_v0 = vpop.eup %5897 }
 0x5ce   : > { %5589 = vmatprep.mubr.msk.bf16.mxu1 %vm6245_vm0, %v6243_v12  ;;  %5595 = vmatprep.mubr.msk.bf16.mxu0 %vm6245_vm0, %v6243_v12  ;;  %v3154_v51 = vmul.f32 %v5898_v0, %v7320_v20 }
 0x5cf   : > { %5599 = vmatprep.subr.bf16.mxu1 %v6243_v12  ;;  %5605 = vmatprep.subr.bf16.mxu0 %v6243_v12  ;;  %v5900_v42 = vpop.eup %5899 }
 0x5d0   : > { %v3170_v8 = vpack.c.bf16 %v3154_v51, %v3154_v51  ;;  %v3156_v10 = vmul.f32 %v5900_v42, %v7324_v49  ;;  %v5786_v49 = vld [vmem:[%s6724_s29 + $0x8] sm:$0xff]  }
 0x5d2   : > { %v3172_v20 = vpack.c.bf16 %v3156_v10, %v3156_v10 }
 0x5d4   : > { %5590 = vmatmul.mubr.msk.bf16.vlgmr.msra.gmra.mrb[64].mxu1 %vm2980_vm2, %v3168_v33  ;;  %5596 = vmatmul.mubr.msk.bf16.vlgmr.msra.gmra.mrb[52].mxu0 %vm2980_vm2, %v3169_v46 }
 0x5d5   : > { %5600 = vmatpush3.bf16.msra.mxu1 %v7437_v28  ;;  %5606 = vmatpush3.bf16.msra.mxu0 %v7440_v55 }
 0x5d6   : > { %5601 = vmatprep.mubr.msk.bf16.mxu1 %vm6245_vm0, %v6243_v12  ;;  %5607 = vmatprep.mubr.msk.bf16.mxu0 %vm6245_vm0, %v6243_v12 }
 0x5d7   : > { %5611 = vmatprep.subr.bf16.mxu1 %v6243_v12  ;;  %5617 = vmatprep.subr.bf16.mxu0 %v6243_v12 }
 0x5dc   : > { %5602 = vmatmul.mubr.msk.bf16.vlgmr.msra.gmra.mrb[68].mxu1 %vm2980_vm2, %v3170_v8  ;;  %5608 = vmatmul.mubr.msk.bf16.vlgmr.msra.gmra.mrb[56].mxu0 %vm2980_vm2, %v3171_v41 }
 0x5dd   : > { %5612 = vmatpush3.bf16.msra.mxu1 %v7443_v6  ;;  %5613 = vmatprep.mubr.msk.bf16.mxu1 %vm6245_vm0, %v6243_v12 }
 0x5de   : > { %5633 = vmatprep.mubr.msk.bf16.mxu0 %vm6245_vm0, %v6243_v12  ;;  %5618 = vmatpush3.bf16.msra.mxu0 %v5785_v27 }
 0x5df   : > { %5619 = vmatprep.subr.bf16.mxu0 %v6243_v12 }
 0x5e2   : > { %5620 = vmatpush3.bf16.msra.mxu0 %v5786_v49 }
 0x5e3   : > { %5621 = vmatprep.subr.bf16.mxu0 %v6243_v12 }
 0x5e4   : > { %5614 = vmatmul.mubr.msk.bf16.vlgmr.msra.gmra.mrb[72].mxu1 %vm2980_vm2, %v3172_v20 }
 0x5e5   : > { %4623 = vmatprep.mubr.bf16.mxu1 %v6244_v31 }
 0x5e6   : > { %5622 = vmatpush3.bf16.msra.mxu0 %v5787_v17 }
 0x5e7   : > { %5623 = vmatprep.subr.bf16.mxu0 %v6243_v12 }
 0x5ea   : > { %5624 = vmatpush3.bf16.msra.mxu0 %v5788_v53 }
 0x5eb   : > { %5625 = vmatprep.subr.bf16.mxu0 %v6243_v12 }
 0x659   : > { %v3214_v28 = vpop.f32.mrb[28].mxu0 }
 0x65a   : > { %v5525_v55 = vpop.f32.mrb[29].mxu0 }
 0x65b   : > { %v3217_v40 = vpop.f32.mrb[30].mxu0  ;;  %v3260_v6 = vpop.f32.mrb[44].mxu1 }
 0x65c   : > { %v5526_v19 = vpop.f32.mrb[31].mxu0  ;;  %v5531_v25 = vpop.f32.mrb[45].mxu1 }
 0x65d   : > { %v3263_v47 = vpop.f32.mrb[46].mxu1 }
 0x65e   : > { %v5532_v26 = vpop.f32.mrb[47].mxu1 }
 0x676   : > { %v3352_v43 = vpop.f32.mrb[48].mxu1 }
 0x677   : > { %v5543_v44 = vpop.f32.mrb[49].mxu1 }
 0x678   : > { %v3355_v56 = vpop.f32.mrb[50].mxu1 }
 0x679   : > { %v5544_v57 = vpop.f32.mrb[51].mxu1 }
 0x67e   : > { %v3444_v22 = vpop.f32.mrb[52].mxu1 }
 0x67f   : > { %v3306_v38 = vpop.f32.mrb[32].mxu0  ;;  %v5241_v30 = vpack.c.bf16 %v3444_v22, %v3260_v6  ;;  %v5555_v18 = vpop.f32.mrb[53].mxu1 }
 0x680   : > { %v5537_v4 = vpop.f32.mrb[33].mxu0  ;;  %v3447_v52 = vpop.f32.mrb[54].mxu1 }
 0x681   : > { %v3309_v58 = vpop.f32.mrb[34].mxu0  ;;  %v5556_v29 = vpop.f32.mrb[55].mxu1  ;;  %v3967_v0 = vrot.slane %v5241_v30, %v6835_v60 }
 0x682   : > { %v5538_v62 = vpop.f32.mrb[35].mxu0 }
 0x687   : > { %v3398_v24 = vpop.f32.mrb[36].mxu0 }
 0x688   : > { %v5239_v32 = vpack.c.bf16 %v3398_v24, %v3214_v28  ;;  %v5549_v59 = vpop.f32.mrb[37].mxu0 }
 0x689   : > { %v3401_v35 = vpop.f32.mrb[38].mxu0 }
 0x68a   : > { %v5550_v16 = vpop.f32.mrb[39].mxu0  ;;  %v3933_v50 = vrot.slane %v5239_v32, %v6835_v60 }
 0x68f   : > { %v3490_v3 = vpop.f32.mrb[40].mxu0 }
 0x690   : > { %v5240_v7 = vpack.c.bf16 %v3490_v3, %v3306_v38  ;;  %v5561_v15 = vpop.f32.mrb[41].mxu0 }
 0x691   : > { %v3493_v9 = vpop.f32.mrb[42].mxu0 }
 0x692   : > { %v3941_v11 = vrot.slane %v5240_v7, %v6835_v60  ;;  %v5562_v63 = vpop.f32.mrb[43].mxu0 }
 0x694   : > { %v3942_v61 = vcombine.low %v3933_v50, %v3941_v11  ;;  %v3943_v14 = vcombine.high %v3933_v50, %v3941_v11 }
 0x696   : > { %v3950_v21 = vrot.slane %v3942_v61, %v6842_v13  ;;  %v3957_v51 = vrot.slane %v3943_v14, %v6842_v13 }
 0x697   : > { %v3536_v37 = vpop.f32.mrb[56].mxu1  ;;  %v7542_v45 = vpop.f32.mrb[44].mxu0 }
 0x698   : > { %v5567_v36 = vpop.f32.mrb[57].mxu1  ;;  %v5573_v54 = vpop.f32.mrb[45].mxu0  ;;  %v5242_v23 = vpack.c.bf16 %v3536_v37, %v3352_v43  ;;  %v3958_v42 = vcombine.high %v3950_v21, %v6244_v31  ;;  %v3959_v40 = vcombine.high %v3957_v51, %v6244_v31  ;;  %v4066_v6 = vshrl.u32 %v3950_v21, 16 }
 0x699   : > { %v3539_v48 = vpop.f32.mrb[58].mxu1  ;;  %v3585_v39 = vpop.f32.mrb[46].mxu0  ;;  %v4082_v44 = vshrl.u32 %v3957_v51, 16 }
 0x69a   : > { %v5568_v33 = vpop.f32.mrb[59].mxu1  ;;  %v5574_v46 = vpop.f32.mrb[47].mxu0  ;;  %v3975_v34 = vrot.slane %v5242_v23, %v6835_v60  ;;  %v4074_v43 = vshrl.u32 %v3958_v42, 16  ;;  %v4090_v58 = vshrl.u32 %v3959_v40, 16 }
 0x69c   : > { %v3976_v8 = vcombine.low %v3967_v0, %v3975_v34  ;;  %v3977_v41 = vcombine.high %v3967_v0, %v3975_v34 }
 0x69e   : > { %v3984_v10 = vrot.slane %v3976_v8, %v6842_v13  ;;  %v3991_v20 = vrot.slane %v3977_v41, %v6842_v13 }
 0x69f   : > { %v7551_v28 = vpop.f32.mrb[60].mxu1  ;;  %v3674_v55 = vpop.f32.mrb[48].mxu0 }
 0x6a0   : > { %v5579_v19 = vpop.f32.mrb[61].mxu1  ;;  %v5585_v25 = vpop.f32.mrb[49].mxu0  ;;  %v3992_v47 = vcombine.high %v3984_v10, %v6244_v31  ;;  %v3993_v26 = vcombine.high %v3991_v20, %v6244_v31  ;;  %v4064_v27 = vpack.i.b16 %v3984_v10, %v3950_v21  ;;  %v4067_v49 = vshrl.u32 %v3984_v10, 16 }
 0x6a1   : > { %v3631_v17 = vpop.f32.mrb[62].mxu1  ;;  %v3677_v53 = vpop.f32.mrb[50].mxu0  ;;  %v4080_v56 = vpack.i.b16 %v3991_v20, %v3957_v51  ;;  %v4083_v57 = vshrl.u32 %v3991_v20, 16 }
 0x6a2   : > { %v5580_v22 = vpop.f32.mrb[63].mxu1  ;;  %v5586_v38 = vpop.f32.mrb[51].mxu0  ;;  %v4068_v30 = vpack.i.b16 %v4067_v49, %v4066_v6  ;;  %v4072_v18 = vpack.i.b16 %v3992_v47, %v3958_v42  ;;  %v4075_v4 = vshrl.u32 %v3992_v47, 16  ;;  %v4088_v52 = vpack.i.b16 %v3993_v26, %v3959_v40 }
 0x6a3   : > { %v4084_v29 = vpack.i.b16 %v4083_v57, %v4082_v44  ;;  %v4091_v62 = vshrl.u32 %v3993_v26, 16  ;;  %v4126_v24 = vcombine.low %v4064_v27, %v4080_v56 }
 0x6a4   : > { %v4076_v32 = vpack.i.b16 %v4075_v4, %v4074_v43  ;;  %v4134_v59 = vcombine.low %v4072_v18, %v4088_v52 }
 0x6a5   : > { %v4092_v35 = vpack.i.b16 %v4091_v62, %v4090_v58  ;;  %v4194_v16 = vcombine.low %v4068_v30, %v4084_v29  ;;  %v7557_v15 = vrot.slane %v4126_v24, %v6835_v60 }
 0x6a6   : > { %v7560_v9 = vrot.slane %v4134_v59, %v6835_v60 }
 0x6a7   : > { %v3720_v3 = vpop.f32.mrb[64].mxu1  ;;  %v3766_v7 = vpop.f32.mrb[52].mxu0  ;;  %v4202_v61 = vcombine.low %v4076_v32, %v4092_v35  ;;  %v7568_v39 = vrot.slane %v4194_v16, %v6835_v60 }
 0x6a8   : > { %v5243_v50 = vpack.c.bf16 %v3766_v7, %v7542_v45  ;;  %v5591_v11 = vpop.f32.mrb[65].mxu1  ;;  %v5597_v63 = vpop.f32.mrb[53].mxu0  ;;  %v4159_v36 = vcombine.high %v7557_v15, %v7560_v9  ;;  %v4158_v54 = vcombine.low %v7557_v15, %v7560_v9 }
 0x6a9   : > { %v3723_v14 = vpop.f32.mrb[66].mxu1  ;;  %v3769_v37 = vpop.f32.mrb[54].mxu0  ;;  %v7571_v21 = vrot.slane %v4202_v61, %v6835_v60 }
 0x6aa   : > { %v5592_v23 = vpop.f32.mrb[67].mxu1  ;;  %v5598_v48 = vpop.f32.mrb[55].mxu0  ;;  %v4001_v20 = vrot.slane %v5243_v50, %v6835_v60 }
 0x6ab   : > { %v4227_v45 = vcombine.high %v7568_v39, %v7571_v21  ;;  %v4226_v33 = vcombine.low %v7568_v39, %v7571_v21 }
 0x6ad   : > { %v4234_v15 = vrot.slane %v4226_v33, %v6842_v13 }
 0x6af   : > { %v3812_v46 = vpop.f32.mrb[68].mxu1  ;;  %v3858_v0 = vpop.f32.mrb[56].mxu0 }
 0x6b0   : > { %v5245_v34 = vpack.c.bf16 %v3812_v46, %v7551_v28  ;;  %v5244_v51 = vpack.c.bf16 %v3858_v0, %v3674_v55  ;;  %v5603_v8 = vpop.f32.mrb[69].mxu1  ;;  %v5609_v41 = vpop.f32.mrb[57].mxu0  ;;  %v5789_v46 = vld [vmem:[%s6724_s29 + $0x20] sm:$0xff]  }
 0x6b1   : > { %v3815_v42 = vpop.f32.mrb[70].mxu1  ;;  %v3861_v10 = vpop.f32.mrb[58].mxu0  ;;  %5626 = vmatpush3.bf16.msra.mxu0 %v5789_v46 }
 0x6b2   : > { %v4009_v40 = vrot.slane %v5244_v51, %v6835_v60  ;;  %v5604_v6 = vpop.f32.mrb[71].mxu1  ;;  %v5610_v19 = vpop.f32.mrb[59].mxu0  ;;  %v4035_v55 = vrot.slane %v5245_v34, %v6835_v60  ;;  %5627 = vmatprep.subr.bf16.mxu0 %v6243_v12 }
 0x6b3   : > { %v4166_v6 = vrot.slane %v4158_v54, %v6842_v13  ;;  %v5791_v54 = vld [vmem:[%s6724_s29 + $0x30] sm:$0xff]  }
 0x6b4   : > { %v4010_v25 = vcombine.low %v4001_v20, %v4009_v40  ;;  %v4011_v47 = vcombine.high %v4001_v20, %v4009_v40  ;;  %v4173_v20 = vrot.slane %v4159_v36, %v6842_v13  ;;  %v4241_v36 = vrot.slane %v4227_v45, %v6842_v13 }
 0x6b6   : > { %v4018_v53 = vrot.slane %v4010_v25, %v6842_v13  ;;  %v4025_v44 = vrot.slane %v4011_v47, %v6842_v13  ;;  %v5790_v25 = vld [vmem:[%s6724_s29 + $0x28] sm:$0xff]  }
 0x6b7   : > { %v3904_v26 = vpop.f32.mrb[72].mxu1  ;;  %5628 = vmatpush3.bf16.msra.mxu0 %v5790_v25  ;;  %v5795_v25 = vld [vmem:[%s6726_s27 + $0x4] ss:$8 sps:$4 sm:$0xff]  }
 0x6b8   : > { %v5615_v27 = vpop.f32.mrb[73].mxu1  ;;  %v5246_v49 = vpack.c.bf16 %v3904_v26, %v3720_v3  ;;  %v4026_v22 = vcombine.high %v4018_v53, %v6244_v31  ;;  %v4027_v18 = vcombine.high %v4025_v44, %v6244_v31  ;;  %v4098_v4 = vshrl.u32 %v4018_v53, 16  ;;  %5629 = vmatprep.subr.bf16.mxu0 %v6243_v12  ;;  %4591 = vmatprep.subr.bf16.mxu1 %v5795_v25  ;;  %v5832_v25 = vld [vmem:[%s6728_s14 + $0x38] sm:$0xff]  }
 0x6b9   : > { %v3907_v17 = vpop.f32.mrb[74].mxu1  ;;  %v4114_v32 = vshrl.u32 %v4025_v44, 16 }
 0x6ba   : > { %v5616_v28 = vpop.f32.mrb[75].mxu1  ;;  %v4043_v43 = vrot.slane %v5246_v49, %v6835_v60  ;;  %v4106_v24 = vshrl.u32 %v4026_v22, 16  ;;  %v4122_v11 = vshrl.u32 %v4027_v18, 16 }
 0x6bb   : > { %5630 = vmatpush3.bf16.msra.mxu0 %v5791_v54  ;;  %v5813_v54 = vld [vmem:[%s6726_s27 + $0x64] ss:$8 sps:$4 sm:$0xff]  }
 0x6bc   : > { %v4044_v56 = vcombine.low %v4035_v55, %v4043_v43  ;;  %v4045_v57 = vcombine.high %v4035_v55, %v4043_v43  ;;  %5631 = vmatprep.subr.bf16.mxu0 %v6243_v12 }
 0x6be   : > { %v4052_v38 = vrot.slane %v4044_v56, %v6842_v13  ;;  %v4059_v30 = vrot.slane %v4045_v57, %v6842_v13 }
 0x6c0   : > { %v4060_v52 = vcombine.high %v4052_v38, %v6244_v31  ;;  %v4061_v58 = vcombine.high %v4059_v30, %v6244_v31  ;;  %v4096_v29 = vpack.i.b16 %v4052_v38, %v4018_v53  ;;  %v4099_v62 = vshrl.u32 %v4052_v38, 16 }
 0x6c1   : > { %v4112_v59 = vpack.i.b16 %v4059_v30, %v4025_v44  ;;  %v4115_v35 = vshrl.u32 %v4059_v30, 16 }
 0x6c2   : > { %v4100_v16 = vpack.i.b16 %v4099_v62, %v4098_v4  ;;  %v4104_v3 = vpack.i.b16 %v4060_v52, %v4026_v22  ;;  %v4107_v7 = vshrl.u32 %v4060_v52, 16  ;;  %v4120_v50 = vpack.i.b16 %v4061_v58, %v4027_v18  ;;  %v5792_v52 = vld [vmem:[%s6724_s29 + $0x38] sm:$0xff]  }
 0x6c3   : > { %v4116_v63 = vpack.i.b16 %v4115_v35, %v4114_v32  ;;  %v4123_v61 = vshrl.u32 %v4061_v58, 16  ;;  %v4142_v14 = vcombine.low %v4096_v29, %v4112_v59  ;;  %5632 = vmatpush3.bf16.msra.mxu0 %v5792_v52 }
 0x6c4   : > { %v4108_v37 = vpack.i.b16 %v4107_v7, %v4106_v24  ;;  %v4150_v23 = vcombine.low %v4104_v3, %v4120_v50 }
 0x6c5   : > { %v4124_v48 = vpack.i.b16 %v4123_v61, %v4122_v11  ;;  %v4210_v31 = vcombine.low %v4100_v16, %v4116_v63  ;;  %v4149_v0 = vrot.slane %v4142_v14, %v6835_v60 }
 0x6c6   : > { %v4157_v34 = vrot.slane %v4150_v23, %v6835_v60 }
 0x6c7   : > { %v4218_v51 = vcombine.low %v4108_v37, %v4124_v48  ;;  %v4217_v42 = vrot.slane %v4210_v31, %v6835_v60  ;;  %v5247_v48 = vld [vmem:[%s7837_s5] ss:$0 sm:$0xff] }
 0x6c8   : > { %v4175_v8 = vcombine.high %v4149_v0, %v4157_v34  ;;  %v4174_v41 = vcombine.low %v4149_v0, %v4157_v34 }
 0x6c9   : > { %v4225_v10 = vrot.slane %v4218_v51, %v6835_v60  ;;  %v5913_v51 = vld [vmem:[#allocation2] sm:$0xff] }
 0x6ca   : > { %v4189_v40 = vrot.slane %v4175_v8, %v6842_v13  ;;  %v4182_v19 = vrot.slane %v4174_v41, %v6842_v13 }
 0x6cb   : > { %v4243_v47 = vcombine.high %v4217_v42, %v4225_v10  ;;  %v4242_v26 = vcombine.low %v4217_v42, %v4225_v10  ;;  %v5914_v10 = vld [vmem:[#allocation2 + $0x8] sm:$0xff] }
 0x6cc   : > { %v4192_v27 = vcombine.low %v4173_v20, %v4189_v40  ;;  %v4191_v60 = vcombine.high %v4166_v6, %v4182_v19  ;;  %v4193_v49 = vcombine.high %v4173_v20, %v4189_v40  ;;  %v4190_v17 = vcombine.low %v4166_v6, %v4182_v19  ;;  %v5793_v19 = vld [vmem:[%s6726_s27] ss:$8 sps:$4 sm:$0xff]  }
 0x6cd   : > { %v4257_v53 = vrot.slane %v4243_v47, %v6842_v13  ;;  %v4250_v9 = vrot.slane %v4242_v26, %v6842_v13  ;;  %4592 = vmatpush1.bf16.msra.mxu1 %v5793_v19  ;;  %v5796_v47 = vld [vmem:[%s6726_s27 + $0x10] ss:$8 sps:$4 sm:$0xff]   ;;  %v5798_v26 = vld [vmem:[%s6726_s27 + $0x14] ss:$8 sps:$4 sm:$0xff]  }
 0x6ce   : > { %v4265_v56 = vshrl.u32 %v4190_v17, 16  ;;  %v4271_v57 = vshrl.u32 %v4191_v60, 16  ;;  %v4277_v45 = vshrl.u32 %v4192_v27, 16  ;;  %v4283_v22 = vshrl.u32 %v4193_v49, 16  ;;  %4593 = vmatprep.subr.bf16.mxu1 %v5798_v26  ;;  %v5831_v19 = vld [vmem:[%s6728_s14 + $0x78] sm:$0xff]  }
 0x6cf   : > { %v4260_v28 = vcombine.low %v4241_v36, %v4257_v53  ;;  %v4259_v55 = vcombine.high %v4234_v15, %v4250_v9  ;;  %v4261_v43 = vcombine.high %v4241_v36, %v4257_v53  ;;  %v4258_v44 = vcombine.low %v4234_v15, %v4250_v9  ;;  %v5807_v36 = vld [vmem:[%s6726_s27 + $0x44] ss:$8 sps:$4 sm:$0xff]   ;;  %v5805_v53 = vld [vmem:[%s6726_s27 + $0x40] ss:$8 sps:$4 sm:$0xff]   ;;  %v5810_v15 = vld [vmem:[%s6726_s27 + $0x54] ss:$8 sps:$4 sm:$0xff]  }
 0x6d0   : > { %v5808_v9 = vld [vmem:[%s6726_s27 + $0x50] ss:$8 sps:$4 sm:$0xff]  }
 0x6d1   : > { %v4276_v38 = vpack.i.b16 %v4260_v28, %v4192_v27  ;;  %v4270_v30 = vpack.i.b16 %v4259_v55, %v4191_v60  ;;  %v4282_v18 = vpack.i.b16 %v4261_v43, %v4193_v49  ;;  %v4266_v39 = vshrl.u32 %v4258_v44, 16  ;;  %4594 = vmatpush1.bf16.msra.mxu1 %v5796_v47  ;;  %v5799_v27 = vld [vmem:[%s6726_s27 + $0x20] ss:$8 sps:$4 sm:$0xff]   ;;  %v5801_v60 = vld [vmem:[%s6726_s27 + $0x24] ss:$8 sps:$4 sm:$0xff]  }
 0x6d2   : > { %v4272_v13 = vshrl.u32 %v4259_v55, 16  ;;  %v4278_v21 = vshrl.u32 %v4260_v28, 16  ;;  %v4284_v33 = vshrl.u32 %v4261_v43, 16  ;;  %v4264_v4 = vpack.i.b16 %v4258_v44, %v4190_v17  ;;  %v5804_v49 = vld [vmem:[%s6726_s27 + $0x34] ss:$8 sps:$4 sm:$0xff]   ;;  %4595 = vmatprep.subr.bf16.mxu1 %v5801_v60 }
 0x6d3   : > { %4292 = vrot.lane.b32.xlu1 %v4276_v38, %s6251_s4  ;;  %4288 = vrot.lane.b32.xlu0 %v4270_v30, %s6252_s0  ;;  %v4267_v58 = vpack.i.b16 %v4266_v39, %v4265_v56  ;;  %v5802_v17 = vld [vmem:[%s6726_s27 + $0x30] ss:$8 sps:$4 sm:$0xff]   ;;  %v5811_v28 = vld [vmem:[%s6726_s27 + $0x60] ss:$8 sps:$4 sm:$0xff]  }
 0x6d4   : > { %v4273_v29 = vpack.i.b16 %v4272_v13, %v4271_v57  ;;  %v4279_v62 = vpack.i.b16 %v4278_v21, %v4277_v45  ;;  %v4285_v24 = vpack.i.b16 %v4284_v33, %v4283_v22  ;;  %v5816_v55 = vld [vmem:[%s6726_s27 + $0x74] ss:$8 sps:$4 sm:$0xff]   ;;  %v5814_v43 = vld [vmem:[%s6726_s27 + $0x70] ss:$8 sps:$4 sm:$0xff]  }
 0x6d5   : > { %4596 = vmatpush1.bf16.msra.mxu1 %v5799_v27  ;;  %v4499_v47 = vld [vmem:[%s6715_s10] sm:$0x3] }
 0x6d6   : > { %4597 = vmatprep.subr.bf16.mxu1 %v5804_v49  ;;  %v4504_v26 = vrot.slane %v4499_v47, %v914_v2  ;;  %v4508_v27 = vrot.slane %v4499_v47, %v918_v5 }
 0x6d7   : > { %4296 = vrot.lane.b32.xlu0 %v4282_v18, %s6246_s6  ;;  %4286 = vrot.lane.b32.xlu1 %v4267_v58, %s6250_s3 }
 0x6d9   : > { %4598 = vmatpush1.bf16.msra.mxu1 %v5802_v17 }
 0x6da   : > { %4599 = vmatprep.subr.bf16.mxu1 %v5807_v36 }
 0x6db   : > { %4290 = vrot.lane.b32.xlu1 %v4273_v29, %s6249_s13 }
 0x6dd   : > { %4600 = vmatpush1.bf16.msra.mxu1 %v5805_v53 }
 0x6de   : > { %4601 = vmatprep.subr.bf16.mxu1 %v5810_v15 }
 0x6df   : > { %4294 = vrot.lane.b32.xlu1 %v4279_v62, %s6248_s19 }
 0x6e1   : > { %4602 = vmatpush1.bf16.msra.mxu1 %v5808_v9 }
 0x6e2   : > { %4603 = vmatprep.subr.bf16.mxu1 %v5813_v54 }
 0x6e3   : > { %4298 = vrot.lane.b32.xlu1 %v4285_v24, %s6247_s9 }
 0x6e5   : > { %4604 = vmatpush1.bf16.msra.mxu1 %v5811_v28 }
 0x6e6   : > { %4605 = vmatprep.subr.bf16.mxu1 %v5816_v55 }
 0x6e9   : > { %4606 = vmatpush1.bf16.msra.mxu1 %v5814_v43 }
 0x745   : > { %v4293_v12 = vpop.permute.xlu1 %4292  ;;  %v4289_v35 = vpop.permute.xlu0 %4288 }
 0x749   : > { %v4287_v32 = vpop.permute.xlu1 %4286  ;;  %v4297_v61 = vpop.permute.xlu0 %4296 }
 0x74a   : > { %v4302_v59 = vsel %vm2243_vm1, %v4264_v4, %v4287_v32  ;;  %v5256_v32 = vld [vmem:[%s805_s16] ss:$0 sm:$0xff] }
 0x74b   : > { %v4305_v3 = vsel %vm4303_vm4, %v4302_v59, %v4289_v35 }
 0x74d   : > { %v4291_v16 = vpop.permute.xlu1 %4290 }
 0x74e   : > { %v4308_v7 = vsel %vm4306_vm5, %v4305_v3, %v4291_v16 }
 0x74f   : > { %v4311_v11 = vsel %vm4309_vm6, %v4308_v7, %v4293_v12  ;;  %v5257_v7 = vld [vmem:[%s808_s15] ss:$0 sm:$0xff] }
 0x751   : > { %v4295_v50 = vpop.permute.xlu1 %4294 }
 0x752   : > { %v4314_v63 = vsel %vm4312_vm7, %v4311_v11, %v4295_v50 }
 0x753   : > { %v4317_v37 = vsel %vm4315_vm8, %v4314_v63, %v4297_v61 }
 0x755   : > { %v4299_v14 = vpop.permute.xlu1 %4298 }
 0x756   : > { %v4320_v23 = vsel %vm4318_vm9, %v4317_v37, %v4299_v14  ;;  %v5817_v14 = vld [vmem:[%s6728_s14 + $0x40] sm:$0xff]  }
 0x757   : > { %5634 = vmatmul.mubr.bf16.vlgmr.msra.gmra.mrb[60].mxu0 %v4320_v23  ;;  %v5818_v37 = vld [vmem:[%s6728_s14] sm:$0xff]   ;;  %v5819_v23 = vld [vmem:[%s6728_s14 + $0x48] sm:$0xff]   ;;  %5383 = vmatprep.subr.bf16.mxu0 %v5817_v14 }
 0x758   : > { %5384 = vmatpush3.bf16.msra.mxu0 %v5818_v37 }
 0x759   : > { %5385 = vmatprep.subr.bf16.mxu0 %v5819_v23 }
 0x82a   : > { %v4427_v31 = vpop.f32.mrb[60].mxu0 }
 0x82b   : > { %v4428_v46 = vadd.f32 %v5247_v48, %v4427_v31  ;;  %v5635_v0 = vpop.f32.mrb[61].mxu0  ;;  %v5821_v31 = vld [vmem:[%s6728_s14 + $0x50] sm:$0xff]  }
 0x82c   : > { %v4430_v34 = vpop.f32.mrb[62].mxu0  ;;  %v5823_v0 = vld [vmem:[%s6728_s14 + $0x58] sm:$0xff]  }
 0x82d   : > { %v7634_v8 = vadd.f32 %v5913_v51, %v4428_v46  ;;  %v4431_v41 = vadd.f32 %v5247_v48, %v4430_v34  ;;  %v5636_v42 = vpop.f32.mrb[63].mxu0  ;;  %v5820_v48 = vld [vmem:[%s6728_s14 + $0x8] sm:$0xff]   ;;  %v5822_v46 = vld [vmem:[%s6728_s14 + $0x10] sm:$0xff]   ;;  %v5824_v34 = vld [vmem:[%s6728_s14 + $0x18] sm:$0xff]  }
 0x82e   : > { %5386 = vmatpush3.bf16.msra.mxu0 %v5820_v48  ;;  %v5825_v51 = vld [vmem:[%s6728_s14 + $0x60] sm:$0xff]   ;;  %v5827_v42 = vld [vmem:[%s6728_s14 + $0x68] sm:$0xff]  }
 0x82f   : > { %v7636_v20 = vadd.f32 %v5914_v10, %v4431_v41  ;;  %4438 = vadd.xlane.f32.xlu0 %v7634_v8  ;;  %v4444_v40 = vmul.f32 %v7634_v8, %v7634_v8  ;;  %5387 = vmatprep.subr.bf16.mxu0 %v5821_v31  ;;  %v5826_v41 = vld [vmem:[%s6728_s14 + $0x20] sm:$0xff]   ;;  %v5828_v10 = vld [vmem:[%s6728_s14 + $0x28] sm:$0xff]   ;;  %v5274_v31 = vld [vmem:[%s815_s20] ss:$0 sm:$0xff] }
 0x831   : > { %4440 = vadd.xlane.f32.xlu1 %v7636_v20  ;;  %v4445_v6 = vmul.f32 %v7636_v20, %v7636_v20 }
 0x832   : > { %5388 = vmatpush3.bf16.msra.mxu0 %v5822_v46 }
 0x833   : > { %4446 = vadd.xlane.f32.xlu0 %v4444_v40  ;;  %5389 = vmatprep.subr.bf16.mxu0 %v5823_v0  ;;  %v5829_v40 = vld [vmem:[%s6728_s14 + $0x70] sm:$0xff]  }
 0x836   : > { %5390 = vmatpush3.bf16.msra.mxu0 %v5824_v34 }
 0x837   : > { %4448 = vadd.xlane.f32.xlu0 %v4445_v6  ;;  %5391 = vmatprep.subr.bf16.mxu0 %v5825_v51  ;;  %v5830_v6 = vld [vmem:[%s6728_s14 + $0x30] sm:$0xff]   ;;  %s7842_s14 = sld [smem:[#allocation35_spill]] (!%p5291_p8) }
 0x83a   : > { %5392 = vmatpush3.bf16.msra.mxu0 %v5826_v41 }
 0x83b   : > { %5393 = vmatprep.subr.bf16.mxu0 %v5827_v42 }
 0x83e   : > { %5394 = vmatpush3.bf16.msra.mxu0 %v5828_v10 }
 0x83f   : > { %5395 = vmatprep.subr.bf16.mxu0 %v5829_v40 }
 0x842   : > { %5396 = vmatpush3.bf16.msra.mxu0 %v5830_v6 }
 0x843   : > { %5397 = vmatprep.subr.bf16.mxu0 %v5831_v19 }
 0x846   : > { %5398 = vmatpush3.bf16.msra.mxu0 %v5832_v25 }
 0x8bc   : > { %v4439_v44 = vpop.xlane.xlu0 %4438 }
 0x8bd   : > { %v4442_v56 = vmul.f32 0.0078125, %v4439_v44 }
 0x8be   : > { %v4441_v57 = vpop.xlane.xlu1 %4440 }
 0x8bf   : > { %v4452_v22 = vmul.f32 %v4442_v56, %v4442_v56  ;;  %v4443_v38 = vmul.f32 0.0078125, %v4441_v57  ;;  %v4458_v62 = vsub.f32 %v7634_v8, %v4442_v56 }
 0x8c0   : > { %v4447_v45 = vpop.xlane.xlu0 %4446 }
 0x8c1   : > { %v4450_v30 = vmul.f32 0.0078125, %v4447_v45  ;;  %v4453_v13 = vmul.f32 %v4443_v38, %v4443_v38  ;;  %v4459_v59 = vsub.f32 %v7636_v20, %v4443_v38 }
 0x8c3   : > { %v4454_v18 = vsub.f32 %v4450_v30, %v4452_v22 }
 0x8c4   : > { %v4449_v39 = vpop.xlane.xlu0 %4448 }
 0x8c5   : > { %v4456_v21 = vmax.f32 %v4454_v18, 0.0  ;;  %v4451_v33 = vmul.f32 0.0078125, %v4449_v39 }
 0x8c7   : > { %v4460_v4 = vadd.f32 1e-06, %v4456_v21  ;;  %v4455_v52 = vsub.f32 %v4451_v33, %v4453_v13 }
 0x8c9   : > { %5901 = vrsqrt.f32 %v4460_v4  ;;  %v4457_v58 = vmax.f32 %v4455_v52, 0.0 }
 0x8cb   : > { %v4461_v29 = vadd.f32 1e-06, %v4457_v58 }
 0x8cd   : > { %5903 = vrsqrt.f32 %v4461_v29 }
 0x8d3   : > { %v5902_v24 = vpop.eup %5901 }
 0x8d4   : > { %v4464_v12 = vmul.f32 %v5902_v24, %v4458_v62 }
 0x8d6   : > { %v4472_v3 = vmul.f32 %v5256_v32, %v4464_v12 }
 0x8d7   : > { %v5904_v35 = vpop.eup %5903 }
 0x8d8   : > { %v4465_v16 = vmul.f32 %v5904_v35, %v4459_v59  ;;  %v4480_v11 = vadd.f32 %v5257_v7, %v4472_v3 }
 0x8da   : > { %v4473_v50 = vmul.f32 %v5256_v32, %v4465_v16 }
 0x8dc   : > { %v4481_v63 = vadd.f32 %v5257_v7, %v4473_v50 }
 0x8de   : > { %v4482_v61 = vpack.c.bf16 %v4481_v63, %v4480_v11 }
 0x8e0   : > { %4624 = vmatmul.mubr.bf16.vlgmr.msra.gmra.mrb[76].mxu1 %v4482_v61 }
 0x9b3   : > { %v4625_v60 = vpop.f32.mrb[76].mxu1 }
 0x9b4   : > { %v4626_v49 = vadd.f32 %v4625_v60, %v4504_v26  ;;  %v4627_v17 = vpop.f32.mrb[77].mxu1 }
 0x9b5   : > { %v4628_v36 = vadd.f32 %v4627_v17, %v4508_v27  ;;  %v4629_v53 = vpop.f32.mrb[78].mxu1 }
 0x9b6   : > { %v4638_v15 = vmul.f32 0.044715, %v4626_v49  ;;  %v4630_v9 = vadd.f32 %v4629_v53, %v4504_v26  ;;  %v4631_v54 = vpop.f32.mrb[79].mxu1  ;;  %v4634_v59 = vmul.f32 0.5, %v4626_v49 }
 0x9b7   : > { %v4639_v28 = vmul.f32 0.044715, %v4628_v36  ;;  %v4632_v55 = vadd.f32 %v4631_v54, %v4508_v27  ;;  %v4635_v3 = vmul.f32 0.5, %v4628_v36 }
 0x9b8   : > { %v4642_v43 = vmul.f32 %v4638_v15, %v4626_v49  ;;  %v4640_v44 = vmul.f32 0.044715, %v4630_v9  ;;  %v4636_v35 = vmul.f32 0.5, %v4630_v9 }
 0x9b9   : > { %v4643_v56 = vmul.f32 %v4639_v28, %v4628_v36  ;;  %v4641_v57 = vmul.f32 0.044715, %v4632_v55  ;;  %v4637_v7 = vmul.f32 0.5, %v4632_v55 }
 0x9ba   : > { %v4646_v45 = vmul.f32 %v4642_v43, %v4626_v49  ;;  %v4644_v22 = vmul.f32 %v4640_v44, %v4630_v9 }
 0x9bb   : > { %v4647_v2 = vmul.f32 %v4643_v56, %v4628_v36  ;;  %v4645_v38 = vmul.f32 %v4641_v57, %v4632_v55  ;;  %v5292_v57 = vld [vmem:[%s7841_s8] ss:$0 sm:$0xff] (!%p5291_p8) }
 0x9bc   : > { %v4650_v1 = vadd.f32 %v4646_v45, %v4626_v49  ;;  %v4648_v5 = vmul.f32 %v4644_v22, %v4630_v9  ;;  %v5293_v22 = vld [vmem:[%s7842_s14] ss:$0 sm:$0xff] (!%p5291_p8) }
 0x9bd   : > { %v4649_v30 = vmul.f32 %v4645_v38, %v4632_v55  ;;  %v4651_v18 = vadd.f32 %v4647_v2, %v4628_v36 }
 0x9be   : > { %v4654_v39 = vmul.f32 0.7978846, %v4650_v1  ;;  %v4652_v13 = vadd.f32 %v4648_v5, %v4630_v9 }
 0x9bf   : > { %v4653_v21 = vadd.f32 %v4649_v30, %v4632_v55  ;;  %v4655_v33 = vmul.f32 0.7978846, %v4651_v18 }
 0x9c0   : > { %5905 = vtanh.f32 %v4654_v39  ;;  %v4656_v4 = vmul.f32 0.7978846, %v4652_v13 }
 0x9c1   : > { %v4657_v52 = vmul.f32 0.7978846, %v4653_v21  ;;  %5907 = vtanh.f32 %v4655_v33 }
 0x9c2   : > { %5909 = vtanh.f32 %v4656_v4 }
 0x9c3   : > { %5911 = vtanh.f32 %v4657_v52 }
 0x9ca   : > { %v5906_v58 = vpop.eup %5905 }
 0x9cb   : > { %v5908_v29 = vpop.eup %5907  ;;  %v4662_v62 = vadd.f32 1.0, %v5906_v58 }
 0x9cc   : > { %v5910_v24 = vpop.eup %5909  ;;  %v4663_v12 = vadd.f32 1.0, %v5908_v29 }
 0x9cd   : > { %v5912_v32 = vpop.eup %5911  ;;  %v4664_v16 = vadd.f32 1.0, %v5910_v24  ;;  %v4666_v11 = vmul.f32 %v4662_v62, %v4634_v59 }
 0x9ce   : > { %v4665_v50 = vadd.f32 1.0, %v5912_v32  ;;  %v4667_v61 = vmul.f32 %v4663_v12, %v4635_v3 }
 0x9cf   : > { %v4668_v63 = vmul.f32 %v4664_v16, %v4636_v35 }
 0x9d0   : > { %v4669_v14 = vmul.f32 %v4665_v50, %v4637_v7 }
 0x9d1   : > { %v4670_v37 = vpack.c.bf16 %v4668_v63, %v4666_v11 }
 0x9d2   : > { %v4671_v23 = vpack.c.bf16 %v4669_v14, %v4667_v61 }
 0x9d4   : > { %4839 = vmatprep.mubr.bf16.mxu0 %v4671_v23 }
 0x9d5   : > { %4840 = vmatmul.mubr.bf16.vlgmr.msra.gmra.mrb[64].mxu0 %v4670_v37 }
 0xaa8   : > { %v5399_v48 = vpop.f32.mrb[64].mxu0 }
 0xaa9   : > { %v5400_v46 = vpop.f32.mrb[65].mxu0 }
 0xaaa   : > { %v5401_v0 = vadd.f32 %v5400_v46, %v5399_v48  ;;  %v5402_v34 = vpop.f32.mrb[66].mxu0 }
 0xaab   : > { %v5403_v51 = vpop.f32.mrb[67].mxu0 }
 0xaac   : > { %v4842_v41 = vadd.f32 %v5401_v0, %v5274_v31  ;;  %v5404_v42 = vadd.f32 %v5403_v51, %v5402_v34  ;;  %4855 = sbr.rel (%p5291_p8) target bundleno = 2910 (0xb5e), region = 124 }
 0xaae   : > { %v4848_v10 = vadd.f32 %v4842_v41, %v7634_v8  ;;  %v4845_v40 = vadd.f32 %v5404_v42, %v5274_v31 }
 0xab0   : > { %4850 = vst [vmem:[#allocation2] sm:$0xff] %v4848_v10  ;;  %v4849_v6 = vadd.f32 %v4845_v40, %v7636_v20  ;;  %4858 = vadd.xlane.f32.xlu0 (!%p5291_p8), %v4848_v10  ;;  %v4864_v19 = vmul.f32 (!%p5291_p8), %v4848_v10, %v4848_v10 }
 0xab2   : > { %4851 = vst [vmem:[#allocation2 + $0x8] sm:$0xff] %v4849_v6  ;;  %4866 = vadd.xlane.f32.xlu1 (!%p5291_p8), %v4864_v19  ;;  %v4865_v25 = vmul.f32 (!%p5291_p8), %v4849_v6, %v4849_v6 }
 0xab4   : > { %4860 = vadd.xlane.f32.xlu0 %v4849_v6 }
 0xab6   : > { %4868 = vadd.xlane.f32.xlu1 %v4865_v25 }
 0xb3d   : > { %v4859_v47 = vpop.xlane.xlu0 %4858 }
 0xb3e   : > { %v4862_v26 = vmul.f32 0.0078125, %v4859_v47 }
 0xb3f   : > { %v4867_v27 = vpop.xlane.xlu1 %4866 }
 0xb40   : > { %v4872_v60 = vmul.f32 %v4862_v26, %v4862_v26  ;;  %v4870_v49 = vmul.f32 0.0078125, %v4867_v27  ;;  %v4878_v44 = vsub.f32 %v4848_v10, %v4862_v26 }
 0xb41   : > { %v4861_v8 = vpop.xlane.xlu0 %4860 }
 0xb42   : > { %v4874_v17 = vsub.f32 %v4870_v49, %v4872_v60  ;;  %v4863_v36 = vmul.f32 0.0078125, %v4861_v8 }
 0xb43   : > { %v4869_v53 = vpop.xlane.xlu1 %4868 }
 0xb44   : > { %v4876_v20 = vmax.f32 %v4874_v17, 0.0  ;;  %v4873_v15 = vmul.f32 %v4863_v36, %v4863_v36  ;;  %v4871_v9 = vmul.f32 0.0078125, %v4869_v53  ;;  %v4879_v38 = vsub.f32 %v4849_v6, %v4863_v36 }
 0xb46   : > { %v4880_v54 = vadd.f32 1e-06, %v4876_v20  ;;  %v4875_v28 = vsub.f32 %v4871_v9, %v4873_v15 }
 0xb48   : > { %5915 = vrsqrt.f32 %v4880_v54  ;;  %v4877_v55 = vmax.f32 %v4875_v28, 0.0 }
 0xb4a   : > { %v4881_v43 = vadd.f32 1e-06, %v4877_v55 }
 0xb4c   : > { %5917 = vrsqrt.f32 %v4881_v43 }
 0xb52   : > { %v5916_v56 = vpop.eup %5915 }
 0xb53   : > { %v4884_v45 = vmul.f32 %v5916_v56, %v4878_v44 }
 0xb55   : > { %v4892_v2 = vmul.f32 %v5292_v57, %v4884_v45 }
 0xb56   : > { %v5918_v1 = vpop.eup %5917 }
 0xb57   : > { %v4900_v5 = vadd.f32 %v5293_v22, %v4892_v2  ;;  %v4885_v30 = vmul.f32 %v5918_v1, %v4879_v38 }
 0xb59   : > { %4902 = vst [vmem:[#allocation14] sm:$0xff] %v4900_v5  ;;  %v4893_v18 = vmul.f32 %v5292_v57, %v4885_v30 }
 0xb5b   : > { %v4901_v39 = vadd.f32 %v5293_v22, %v4893_v18 }
 0xb5d   : > { %4903 = vst [vmem:[#allocation14 + $0x8] sm:$0xff] %v4901_v39 }
 0xb5e PF: > { %p5696_p2 = scmp.eq.s32.totalorder %s6362_s25, 3  ;;  %s6255_s1 = smov [#allocation14]  }
 0xb5f   : > { %s4910_s6 = sshll.u32 %s6255_s1, 4  ;;  %s4911_s6 = int_to_ptr.vmem [resolvable:$true] %s4910_s6 }
 0xb60   : > { %s6155_s9 = scalar_lea.vmem %s4911_s6, 256  ;;  %p6162_p13 = scmp.lt.s32.totalorder %s4911_s6, %s4911_s6 }
 0xb61   : > { %p6156_p9 = scmp.ne.s32.totalorder %s4911_s6, %s6155_s9  ;;  %p6163_p6 = scmp.lt.s32.totalorder %s6155_s9, %s6155_s9 }
 0xb63   : > { %p6157_p11 = pnand %p6156_p9, %p5696_p2  ;;  %p6164_p5 = por %p6163_p6, %p6162_p13 }
 0xb65   : > { %p6158_p7 = pneg %p6157_p11 }
 0xb67   : > { %p6165_p0 = pnand %p6164_p5, %p6158_p7 }
 0xb69   : > { %6168 = shalt.err (!%p6165_p0)
}
 0xb6a   : > { %s7843_s3 = sld [smem:[#allocation36_spill]] }
 0xb70   : > { %s6169_s4 = scalar_lea.hbm %s7843_s3, 256 }
 0xb71   : > { %p6170_p1 = scmp.ne.s32.totalorder %s7843_s3, %s6169_s4  ;;  %p6175_p12 = scmp.lt.u32.totalorder %s6169_s4, %s7843_s3 }
 0xb73   : > { %p6171_p3 = pnand %p6170_p1, %p5696_p2 }
 0xb75   : > { %p6172_p10 = pneg %p6171_p3 }
 0xb77   : > { %p6177_p4 = pnand %p6175_p12, %p6172_p10 }
 0xb79   : > { %6180 = shalt.err (!%p6177_p4)
}
 0xb7a   : > { %s6256_s24 = smov 128   ;;  %s6257_s28 = smov 8  }
 0xb7b   : > { %5662 = dma.vmem_to_hbm [thread:$0]  (%p5696_p2), %s4911_s6, 256, %s7843_s3, [#allocation5], %s6256_s24, %s6256_s24, %s6257_s28  }
 0xb7c   : > { %6210 = dma.done.wait (%p5696_p2), [#allocation5], 256  }
 0xb7d   : > { %6212 = vsyncadd (%p5696_p2), [#allocation5], 4294967040 }
 0xb7e PF: > { %s7844_s24 = sld [smem:[#allocation20_spill]]  ;;  %s7845_s30 = sld [smem:[#allocation19_spill]] }
 0xb7f   : > { %s7846_s23 = sld [smem:[#allocation21_spill]]  ;;  %s7847_s21 = smov %s6219_s22 }
 0xb84   : > { %p26_p8 = scmp.ge.s32.totalorder %s7844_s24, 6   ;;  %s7848_s22 = smov %s7845_s30 }
 0xb86   :  { %28 = sbr.rel (!%p26_p8) target bundleno = 20 (0x14), region = 209 }
 0xb8d   :  { %4926 = vsyncpa [#allocation4], 1 }
 0xb8e   :  { %4928 = vsyncpa [#allocation4 + $0x1], 1 }
 0xb8f   :  { %4929 = vsyncpa [#allocation7], 1 }
 0xb90   :  { %4930 = vsyncpa [#allocation5], 1 }
 0xb91   :  { %4932 = vsyncpa [#allocation5 + $0x1], 1 }

</bundles_post_ra>
